<compile_context>
chip_gen: v6e
topology: v6e:2x2x1
jax: 0.10.0
libtpu: 0.0.40
codegen_flags: <defaults>
</compile_context>

<pallas_src>
import jax
import jax.numpy as jnp
from jax.experimental import pallas as pl
from jax.experimental.pallas import tpu as pltpu

LATENT_DIM = 256
CON_DIM = 128
TIME_DIM = 128
N_LAY = 3
CT_DIM = CON_DIM + TIME_DIM  # condition + time, always concatenated together


def _layer_dims():
    """(h_in_dim, out_dim) per linear layer, in kernel order:
    down0..down2, middle, up (already reversed: up2, up1, up0 of construction), output."""
    now = LATENT_DIM
    down, up = [], []
    for _ in range(N_LAY):
        out = now // 2
        down.append((now, out))
        up.append((out, now))
        now = out
    middle = (now, out)                       # (32, 32)
    return down + [middle] + up[::-1] + [(LATENT_DIM, LATENT_DIM)]


_LAYER_DIMS = _layer_dims()
# Fuse cat(h, ct) into a single matmul only when the concat is lane-aligned.
_FUSE = tuple(dh % 128 == 0 for dh, _ in _LAYER_DIMS)


# ----------------------------- Pallas kernel ---------------------------------
def _unet_kernel(latent_ref, ct_ref, *refs):
    """refs = per-layer weight refs (2 if fused: W_full, b ; else 3: W_h, W_ct, b),
    followed by out_ref (last)."""
    *wrefs, out_ref = refs
    latent = latent_ref[...]                       # (tb, 256) f32
    ct = ct_ref[...]                               # (tb, 256) f32
    ct_bf = ct.astype(jnp.bfloat16)

    # Unpack the flat weight-ref list according to the static fusion plan.
    layers = []
    idx = 0
    for fuse in _FUSE:
        n = 2 if fuse else 3
        layers.append(tuple(wrefs[idx:idx + n]))
        idx += n

    def lin(h, li):
        """Equivalent of cat(h, condition, time) @ W + b (exact split / fused forms)."""
        h_bf = h.astype(jnp.bfloat16)
        if _FUSE[li]:
            w_ref, b_ref = layers[li]
            hc = jnp.concatenate([h_bf, ct_bf], axis=-1)   # dh % 128 == 0 -> lane-aligned
            y = jnp.dot(hc, w_ref[...], preferred_element_type=jnp.float32)
        else:
            wh_ref, wct_ref, b_ref = layers[li]
            y = jnp.dot(h_bf, wh_ref[...], preferred_element_type=jnp.float32)
            y = y + jnp.dot(ct_bf, wct_ref[...], preferred_element_type=jnp.float32)
        return y + b_ref[...]                       # bias add in f32

    relu = lambda x: jnp.maximum(x, 0.0)

    h = latent
    skips = []
    li = 0
    for _ in range(N_LAY):                          # down path: 512->128, 384->64, 320->32
        h = relu(lin(h, li))
        skips.append(h)
        li += 1
    h = relu(lin(h, li))                            # middle: 288->32
    li += 1
    for s in skips[::-1]:                           # up path: 288->64, 320->128, 384->256
        h = h + s                                   # residual skip (f32)
        h = relu(lin(h, li))
        li += 1
    h = h + latent
    out_ref[...] = lin(h, li).astype(out_ref.dtype)  # output: 512->256, no activation


# ----------------------------- wrapper / glue ---------------------------------
def _choose_tb(batch):
    """Largest power-of-two tile (<=1024, VMEM-safe even on v7x) dividing `batch`,
    preferring >=2 grid steps so the parallel axis can use both v7x TensorCores."""
    fallback = None
    for tb in (1024, 512, 256, 128, 64, 32, 16, 8):
        if batch % tb == 0:
            if fallback is None:
                fallback = tb
            if batch // tb >= 2:
                return tb
    return fallback if fallback is not None else batch


def init_params(key):
    """f32 reference params matching PyTorch Linear default init (uniform +-1/sqrt(fan_in)).
    Weights stored as (fan_in, out) so y = cat(h, ct) @ W + b."""
    params = []
    for dh, do in _LAYER_DIMS:
        fan_in = dh + CT_DIM
        key, kw, kb = jax.random.split(key, 3)
        bound = 1.0 / float(fan_in) ** 0.5
        w = jax.random.uniform(kw, (fan_in, do), jnp.float32, -bound, bound)
        b = jax.random.uniform(kb, (1, do), jnp.float32, -bound, bound)
        params.append((w, b))
    return params


def to_kernel_params(params):
    """Convert f32 reference params into the kernel layout: bf16 weights
    (full for fused layers, split [:dh]/[dh:] otherwise) + f32 bias."""
    kparams = []
    for (w, b), (dh, _), fuse in zip(params, _LAYER_DIMS, _FUSE):
        if fuse:
            kparams.append((w.astype(jnp.bfloat16), b))
        else:
            kparams.append((w[:dh].astype(jnp.bfloat16),
                            w[dh:].astype(jnp.bfloat16), b))
    return kparams


def unet_forward(latent, condition, time, kparams, *, tb=None):
    B = latent.shape[0]
    if tb is None:
        tb = _choose_tb(B)
    assert B % tb == 0, (B, tb)
    ct = jnp.concatenate([condition, time], axis=1).astype(jnp.float32)  # (B, 256)

    weight_args = []
    for layer in kparams:
        weight_args.extend(layer)
    # Constant across the grid -> keep them fully VMEM-resident, no per-step pipelining.
    weight_specs = [pl.BlockSpec(memory_space=pltpu.MemorySpace.VMEM)
                    for _ in weight_args]

    grid = (B // tb,)
    in_specs = [
        pl.BlockSpec((tb, LATENT_DIM), lambda i: (i, 0)),
        pl.BlockSpec((tb, CT_DIM), lambda i: (i, 0)),
    ] + weight_specs
    out_specs = pl.BlockSpec((tb, LATENT_DIM), lambda i: (i, 0))

    flops = 2 * B * sum((dh + CT_DIM) * do for dh, do in _LAYER_DIMS)
    weight_bytes = sum(int(w.size) * w.dtype.itemsize for w in weight_args)
    bytes_accessed = B * (LATENT_DIM + CT_DIM + LATENT_DIM) * 4 + weight_bytes
    cost = pl.CostEstimate(flops=flops, transcendentals=0,
                           bytes_accessed=bytes_accessed)

    return pl.pallas_call(
        _unet_kernel,
        out_shape=jax.ShapeDtypeStruct((B, LATENT_DIM), jnp.float32),
        grid_spec=pltpu.PrefetchScalarGridSpec(
            num_scalar_prefetch=0,
            grid=grid,
            in_specs=in_specs,
            out_specs=out_specs,
        ),
        compiler_params=pltpu.CompilerParams(
            dimension_semantics=("parallel",)),
        cost_estimate=cost,
    )(latent.astype(jnp.float32), ct, *weight_args)


# ----------------------------- references -------------------------------------
def unet_ref(latent, condition, time, params):
    """Pure-JAX f32 reference mirroring the PyTorch forward exactly."""
    ct = jnp.concatenate([condition, time], axis=1)
    relu = lambda x: jnp.maximum(x, 0.0)

    def lin(h, p):
        w, b = p
        return jnp.concatenate([h, ct], axis=1) @ w + b

    h = latent
    skips = []
    for i in range(N_LAY):
        h = relu(lin(h, params[i]))
        skips.append(h)
    h = relu(lin(h, params[N_LAY]))
    for i, s in enumerate(skips[::-1]):
        h = h + s
        h = relu(lin(h, params[N_LAY + 1 + i]))
    h = h + latent
    return lin(h, params[-1])


def unet_ref_matched(latent, condition, time, kparams):
    """Pure-JAX reference using the exact bf16-matmul / f32-elementwise precision
    of the kernel (for a tight numerical check)."""
    ct = jnp.concatenate([condition, time], axis=1).astype(jnp.float32)
    ct_bf = ct.astype(jnp.bfloat16)
    relu = lambda x: jnp.maximum(x, 0.0)

    def lin(h, li):
        h_bf = h.astype(jnp.bfloat16)
        if _FUSE[li]:
            w, b = kparams[li]
            y = jnp.dot(jnp.concatenate([h_bf, ct_bf], axis=-1), w,
                        preferred_element_type=jnp.float32)
        else:
            wh, wct, b = kparams[li]
            y = jnp.dot(h_bf, wh, preferred_element_type=jnp.float32)
            y = y + jnp.dot(ct_bf, wct, preferred_element_type=jnp.float32)
        return y + b

    h = latent
    skips = []
    li = 0
    for _ in range(N_LAY):
        h = relu(lin(h, li)); skips.append(h); li += 1
    h = relu(lin(h, li)); li += 1
    for s in skips[::-1]:
        h = h + s
        h = relu(lin(h, li)); li += 1
    h = h + latent
    return lin(h, li)


if __name__ == "__main__":
    key = jax.random.PRNGKey(0)
    k_p, k_l, k_c, k_t = jax.random.split(key, 4)
    params = init_params(k_p)
    kparams = to_kernel_params(params)

    # Small but tileable batch: tb=128 -> 2-step "parallel" grid (fills both v7x TCs).
    B = 256
    latent = jax.random.normal(k_l, (B, LATENT_DIM), jnp.float32)
    condition = jax.random.normal(k_c, (B, CON_DIM), jnp.float32)
    time = jax.random.normal(k_t, (B, TIME_DIM), jnp.float32)

    out = jax.block_until_ready(unet_forward(latent, condition, time, kparams))
    assert out.shape == (B, LATENT_DIM)

    # Tight check vs a pure-JAX reference using the kernel's exact bf16 matmul precision.
    ref_m = unet_ref_matched(latent, condition, time, kparams)
    assert jnp.allclose(out, ref_m, atol=2e-3, rtol=2e-3), "mismatch vs matched-precision ref"

    # Loose structural check vs the full-f32 PyTorch-semantics reference
    # (bf16 MXU inputs introduce ~1% relative error through 8 layers).
    ref_f = unet_ref(latent, condition, time, params)
    assert jnp.allclose(out, ref_f, atol=1.5e-1, rtol=1.5e-1), "mismatch vs f32 reference"

    print("KERNEL_OK")
</pallas_src>

<mosaic_0001>
module attributes {stable_mosaic.version = 11 : i64} {
  func.func @_unet_kernel(%arg0: i32, %arg1: memref<128x256xf32, #tpu.memory_space<vmem>>, %arg2: memref<128x256xf32, #tpu.memory_space<vmem>>, %arg3: memref<512x128xbf16, #tpu.memory_space<vmem>>, %arg4: memref<1x128xf32, #tpu.memory_space<vmem>>, %arg5: memref<384x64xbf16, #tpu.memory_space<vmem>>, %arg6: memref<1x64xf32, #tpu.memory_space<vmem>>, %arg7: memref<64x32xbf16, #tpu.memory_space<vmem>>, %arg8: memref<256x32xbf16, #tpu.memory_space<vmem>>, %arg9: memref<1x32xf32, #tpu.memory_space<vmem>>, %arg10: memref<32x32xbf16, #tpu.memory_space<vmem>>, %arg11: memref<256x32xbf16, #tpu.memory_space<vmem>>, %arg12: memref<1x32xf32, #tpu.memory_space<vmem>>, %arg13: memref<32x64xbf16, #tpu.memory_space<vmem>>, %arg14: memref<256x64xbf16, #tpu.memory_space<vmem>>, %arg15: memref<1x64xf32, #tpu.memory_space<vmem>>, %arg16: memref<64x128xbf16, #tpu.memory_space<vmem>>, %arg17: memref<256x128xbf16, #tpu.memory_space<vmem>>, %arg18: memref<1x128xf32, #tpu.memory_space<vmem>>, %arg19: memref<384x256xbf16, #tpu.memory_space<vmem>>, %arg20: memref<1x256xf32, #tpu.memory_space<vmem>>, %arg21: memref<512x256xbf16, #tpu.memory_space<vmem>>, %arg22: memref<1x256xf32, #tpu.memory_space<vmem>>, %arg23: memref<128x256xf32, #tpu.memory_space<vmem>>) attributes {dimension_semantics = [#tpu.dimension_semantics<parallel>], iteration_bounds = array<i64: 2>, scalar_prefetch = 0 : i64, scratch_operands = 0 : i64, tpu.core_type = #tpu.core_type<tc>, window_params = [{transform_indices = @transform_0, window_bounds = array<i64: 128, 256>}, {transform_indices = @transform_1, window_bounds = array<i64: 128, 256>}, {pipeline_mode = #tpu.pipeline_mode<synchronous>, transform_indices = @transform_2, window_bounds = array<i64: 512, 128>}, {pipeline_mode = #tpu.pipeline_mode<synchronous>, transform_indices = @transform_3, window_bounds = array<i64: 1, 128>}, {pipeline_mode = #tpu.pipeline_mode<synchronous>, transform_indices = @transform_4, window_bounds = array<i64: 384, 64>}, {pipeline_mode = #tpu.pipeline_mode<synchronous>, transform_indices = @transform_5, window_bounds = array<i64: 1, 64>}, {pipeline_mode = #tpu.pipeline_mode<synchronous>, transform_indices = @transform_6, window_bounds = array<i64: 64, 32>}, {pipeline_mode = #tpu.pipeline_mode<synchronous>, transform_indices = @transform_7, window_bounds = array<i64: 256, 32>}, {pipeline_mode = #tpu.pipeline_mode<synchronous>, transform_indices = @transform_8, window_bounds = array<i64: 1, 32>}, {pipeline_mode = #tpu.pipeline_mode<synchronous>, transform_indices = @transform_9, window_bounds = array<i64: 32, 32>}, {pipeline_mode = #tpu.pipeline_mode<synchronous>, transform_indices = @transform_10, window_bounds = array<i64: 256, 32>}, {pipeline_mode = #tpu.pipeline_mode<synchronous>, transform_indices = @transform_11, window_bounds = array<i64: 1, 32>}, {pipeline_mode = #tpu.pipeline_mode<synchronous>, transform_indices = @transform_12, window_bounds = array<i64: 32, 64>}, {pipeline_mode = #tpu.pipeline_mode<synchronous>, transform_indices = @transform_13, window_bounds = array<i64: 256, 64>}, {pipeline_mode = #tpu.pipeline_mode<synchronous>, transform_indices = @transform_14, window_bounds = array<i64: 1, 64>}, {pipeline_mode = #tpu.pipeline_mode<synchronous>, transform_indices = @transform_15, window_bounds = array<i64: 64, 128>}, {pipeline_mode = #tpu.pipeline_mode<synchronous>, transform_indices = @transform_16, window_bounds = array<i64: 256, 128>}, {pipeline_mode = #tpu.pipeline_mode<synchronous>, transform_indices = @transform_17, window_bounds = array<i64: 1, 128>}, {pipeline_mode = #tpu.pipeline_mode<synchronous>, transform_indices = @transform_18, window_bounds = array<i64: 384, 256>}, {pipeline_mode = #tpu.pipeline_mode<synchronous>, transform_indices = @transform_19, window_bounds = array<i64: 1, 256>}, {pipeline_mode = #tpu.pipeline_mode<synchronous>, transform_indices = @transform_20, window_bounds = array<i64: 512, 256>}, {pipeline_mode = #tpu.pipeline_mode<synchronous>, transform_indices = @transform_21, window_bounds = array<i64: 1, 256>}, {transform_indices = @transform_22, window_bounds = array<i64: 128, 256>}]} {
    %c0 = arith.constant 0 : index
    %c0_0 = arith.constant 0 : index
    %0 = vector.load %arg1[%c0, %c0_0] : memref<128x256xf32, #tpu.memory_space<vmem>>, vector<128x256xf32>
    %c0_1 = arith.constant 0 : index
    %c0_2 = arith.constant 0 : index
    %1 = vector.load %arg2[%c0_1, %c0_2] : memref<128x256xf32, #tpu.memory_space<vmem>>, vector<128x256xf32>
    %2 = arith.truncf %1 : vector<128x256xf32> to vector<128x256xbf16>
    %3 = arith.truncf %0 : vector<128x256xf32> to vector<128x256xbf16>
    %4 = tpu.concatenate %3, %2 in 1 : vector<128x256xbf16>, vector<128x256xbf16> -> vector<128x512xbf16>
    %c0_3 = arith.constant 0 : index
    %c0_4 = arith.constant 0 : index
    %5 = vector.load %arg3[%c0_3, %c0_4] : memref<512x128xbf16, #tpu.memory_space<vmem>>, vector<512x128xbf16>
    %cst = arith.constant dense<0.000000e+00> : vector<128x128xf32>
    %6 = tpu.matmul %4, %5, %cst {dimension_numbers = #tpu.dot_dimension_numbers<[1], [0], [0], [1], [0, 0, 1, 1], [], []>} : vector<128x512xbf16>, vector<512x128xbf16>, vector<128x128xf32> -> vector<128x128xf32>
    %c0_5 = arith.constant 0 : index
    %c0_6 = arith.constant 0 : index
    %7 = vector.load %arg4[%c0_5, %c0_6] : memref<1x128xf32, #tpu.memory_space<vmem>>, vector<1x128xf32>
    %8 = vector.broadcast %7 : vector<1x128xf32> to vector<128x128xf32>
    %9 = arith.addf %6, %8 : vector<128x128xf32>
    %cst_7 = arith.constant 0.000000e+00 : f32
    %10 = vector.broadcast %cst_7 : f32 to vector<128x128xf32>
    %11 = arith.maximumf %9, %10 : vector<128x128xf32>
    %12 = arith.truncf %11 : vector<128x128xf32> to vector<128x128xbf16>
    %13 = tpu.concatenate %12, %2 in 1 : vector<128x128xbf16>, vector<128x256xbf16> -> vector<128x384xbf16>
    %c0_8 = arith.constant 0 : index
    %c0_9 = arith.constant 0 : index
    %14 = vector.load %arg5[%c0_8, %c0_9] : memref<384x64xbf16, #tpu.memory_space<vmem>>, vector<384x64xbf16>
    %cst_10 = arith.constant dense<0.000000e+00> : vector<128x64xf32>
    %15 = tpu.matmul %13, %14, %cst_10 {dimension_numbers = #tpu.dot_dimension_numbers<[1], [0], [0], [1], [0, 0, 1, 1], [], []>} : vector<128x384xbf16>, vector<384x64xbf16>, vector<128x64xf32> -> vector<128x64xf32>
    %c0_11 = arith.constant 0 : index
    %c0_12 = arith.constant 0 : index
    %16 = vector.load %arg6[%c0_11, %c0_12] : memref<1x64xf32, #tpu.memory_space<vmem>>, vector<1x64xf32>
    %17 = vector.broadcast %16 : vector<1x64xf32> to vector<128x64xf32>
    %18 = arith.addf %15, %17 : vector<128x64xf32>
    %cst_13 = arith.constant 0.000000e+00 : f32
    %19 = vector.broadcast %cst_13 : f32 to vector<128x64xf32>
    %20 = arith.maximumf %18, %19 : vector<128x64xf32>
    %21 = arith.truncf %20 : vector<128x64xf32> to vector<128x64xbf16>
    %c0_14 = arith.constant 0 : index
    %c0_15 = arith.constant 0 : index
    %22 = vector.load %arg7[%c0_14, %c0_15] : memref<64x32xbf16, #tpu.memory_space<vmem>>, vector<64x32xbf16>
    %cst_16 = arith.constant dense<0.000000e+00> : vector<128x32xf32>
    %23 = tpu.matmul %21, %22, %cst_16 {dimension_numbers = #tpu.dot_dimension_numbers<[1], [0], [0], [1], [0, 0, 1, 1], [], []>} : vector<128x64xbf16>, vector<64x32xbf16>, vector<128x32xf32> -> vector<128x32xf32>
    %c0_17 = arith.constant 0 : index
    %c0_18 = arith.constant 0 : index
    %24 = vector.load %arg8[%c0_17, %c0_18] : memref<256x32xbf16, #tpu.memory_space<vmem>>, vector<256x32xbf16>
    %cst_19 = arith.constant dense<0.000000e+00> : vector<128x32xf32>
    %25 = tpu.matmul %2, %24, %cst_19 {dimension_numbers = #tpu.dot_dimension_numbers<[1], [0], [0], [1], [0, 0, 1, 1], [], []>} : vector<128x256xbf16>, vector<256x32xbf16>, vector<128x32xf32> -> vector<128x32xf32>
    %26 = arith.addf %23, %25 : vector<128x32xf32>
    %c0_20 = arith.constant 0 : index
    %c0_21 = arith.constant 0 : index
    %27 = vector.load %arg9[%c0_20, %c0_21] : memref<1x32xf32, #tpu.memory_space<vmem>>, vector<1x32xf32>
    %28 = vector.broadcast %27 : vector<1x32xf32> to vector<128x32xf32>
    %29 = arith.addf %26, %28 : vector<128x32xf32>
    %cst_22 = arith.constant 0.000000e+00 : f32
    %30 = vector.broadcast %cst_22 : f32 to vector<128x32xf32>
    %31 = arith.maximumf %29, %30 : vector<128x32xf32>
    %32 = arith.truncf %31 : vector<128x32xf32> to vector<128x32xbf16>
    %c0_23 = arith.constant 0 : index
    %c0_24 = arith.constant 0 : index
    %33 = vector.load %arg10[%c0_23, %c0_24] : memref<32x32xbf16, #tpu.memory_space<vmem>>, vector<32x32xbf16>
    %cst_25 = arith.constant dense<0.000000e+00> : vector<128x32xf32>
    %34 = tpu.matmul %32, %33, %cst_25 {dimension_numbers = #tpu.dot_dimension_numbers<[1], [0], [0], [1], [0, 0, 1, 1], [], []>} : vector<128x32xbf16>, vector<32x32xbf16>, vector<128x32xf32> -> vector<128x32xf32>
    %c0_26 = arith.constant 0 : index
    %c0_27 = arith.constant 0 : index
    %35 = vector.load %arg11[%c0_26, %c0_27] : memref<256x32xbf16, #tpu.memory_space<vmem>>, vector<256x32xbf16>
    %cst_28 = arith.constant dense<0.000000e+00> : vector<128x32xf32>
    %36 = tpu.matmul %2, %35, %cst_28 {dimension_numbers = #tpu.dot_dimension_numbers<[1], [0], [0], [1], [0, 0, 1, 1], [], []>} : vector<128x256xbf16>, vector<256x32xbf16>, vector<128x32xf32> -> vector<128x32xf32>
    %37 = arith.addf %34, %36 : vector<128x32xf32>
    %c0_29 = arith.constant 0 : index
    %c0_30 = arith.constant 0 : index
    %38 = vector.load %arg12[%c0_29, %c0_30] : memref<1x32xf32, #tpu.memory_space<vmem>>, vector<1x32xf32>
    %39 = vector.broadcast %38 : vector<1x32xf32> to vector<128x32xf32>
    %40 = arith.addf %37, %39 : vector<128x32xf32>
    %cst_31 = arith.constant 0.000000e+00 : f32
    %41 = vector.broadcast %cst_31 : f32 to vector<128x32xf32>
    %42 = arith.maximumf %40, %41 : vector<128x32xf32>
    %43 = arith.addf %42, %31 : vector<128x32xf32>
    %44 = arith.truncf %43 : vector<128x32xf32> to vector<128x32xbf16>
    %c0_32 = arith.constant 0 : index
    %c0_33 = arith.constant 0 : index
    %45 = vector.load %arg13[%c0_32, %c0_33] : memref<32x64xbf16, #tpu.memory_space<vmem>>, vector<32x64xbf16>
    %cst_34 = arith.constant dense<0.000000e+00> : vector<128x64xf32>
    %46 = tpu.matmul %44, %45, %cst_34 {dimension_numbers = #tpu.dot_dimension_numbers<[1], [0], [0], [1], [0, 0, 1, 1], [], []>} : vector<128x32xbf16>, vector<32x64xbf16>, vector<128x64xf32> -> vector<128x64xf32>
    %c0_35 = arith.constant 0 : index
    %c0_36 = arith.constant 0 : index
    %47 = vector.load %arg14[%c0_35, %c0_36] : memref<256x64xbf16, #tpu.memory_space<vmem>>, vector<256x64xbf16>
    %cst_37 = arith.constant dense<0.000000e+00> : vector<128x64xf32>
    %48 = tpu.matmul %2, %47, %cst_37 {dimension_numbers = #tpu.dot_dimension_numbers<[1], [0], [0], [1], [0, 0, 1, 1], [], []>} : vector<128x256xbf16>, vector<256x64xbf16>, vector<128x64xf32> -> vector<128x64xf32>
    %49 = arith.addf %46, %48 : vector<128x64xf32>
    %c0_38 = arith.constant 0 : index
    %c0_39 = arith.constant 0 : index
    %50 = vector.load %arg15[%c0_38, %c0_39] : memref<1x64xf32, #tpu.memory_space<vmem>>, vector<1x64xf32>
    %51 = vector.broadcast %50 : vector<1x64xf32> to vector<128x64xf32>
    %52 = arith.addf %49, %51 : vector<128x64xf32>
    %cst_40 = arith.constant 0.000000e+00 : f32
    %53 = vector.broadcast %cst_40 : f32 to vector<128x64xf32>
    %54 = arith.maximumf %52, %53 : vector<128x64xf32>
    %55 = arith.addf %54, %20 : vector<128x64xf32>
    %56 = arith.truncf %55 : vector<128x64xf32> to vector<128x64xbf16>
    %c0_41 = arith.constant 0 : index
    %c0_42 = arith.constant 0 : index
    %57 = vector.load %arg16[%c0_41, %c0_42] : memref<64x128xbf16, #tpu.memory_space<vmem>>, vector<64x128xbf16>
    %cst_43 = arith.constant dense<0.000000e+00> : vector<128x128xf32>
    %58 = tpu.matmul %56, %57, %cst_43 {dimension_numbers = #tpu.dot_dimension_numbers<[1], [0], [0], [1], [0, 0, 1, 1], [], []>} : vector<128x64xbf16>, vector<64x128xbf16>, vector<128x128xf32> -> vector<128x128xf32>
    %c0_44 = arith.constant 0 : index
    %c0_45 = arith.constant 0 : index
    %59 = vector.load %arg17[%c0_44, %c0_45] : memref<256x128xbf16, #tpu.memory_space<vmem>>, vector<256x128xbf16>
    %cst_46 = arith.constant dense<0.000000e+00> : vector<128x128xf32>
    %60 = tpu.matmul %2, %59, %cst_46 {dimension_numbers = #tpu.dot_dimension_numbers<[1], [0], [0], [1], [0, 0, 1, 1], [], []>} : vector<128x256xbf16>, vector<256x128xbf16>, vector<128x128xf32> -> vector<128x128xf32>
    %61 = arith.addf %58, %60 : vector<128x128xf32>
    %c0_47 = arith.constant 0 : index
    %c0_48 = arith.constant 0 : index
    %62 = vector.load %arg18[%c0_47, %c0_48] : memref<1x128xf32, #tpu.memory_space<vmem>>, vector<1x128xf32>
    %63 = vector.broadcast %62 : vector<1x128xf32> to vector<128x128xf32>
    %64 = arith.addf %61, %63 : vector<128x128xf32>
    %cst_49 = arith.constant 0.000000e+00 : f32
    %65 = vector.broadcast %cst_49 : f32 to vector<128x128xf32>
    %66 = arith.maximumf %64, %65 : vector<128x128xf32>
    %67 = arith.addf %66, %11 : vector<128x128xf32>
    %68 = arith.truncf %67 : vector<128x128xf32> to vector<128x128xbf16>
    %69 = tpu.concatenate %68, %2 in 1 : vector<128x128xbf16>, vector<128x256xbf16> -> vector<128x384xbf16>
    %c0_50 = arith.constant 0 : index
    %c0_51 = arith.constant 0 : index
    %70 = vector.load %arg19[%c0_50, %c0_51] : memref<384x256xbf16, #tpu.memory_space<vmem>>, vector<384x256xbf16>
    %cst_52 = arith.constant dense<0.000000e+00> : vector<128x256xf32>
    %71 = tpu.matmul %69, %70, %cst_52 {dimension_numbers = #tpu.dot_dimension_numbers<[1], [0], [0], [1], [0, 0, 1, 1], [], []>} : vector<128x384xbf16>, vector<384x256xbf16>, vector<128x256xf32> -> vector<128x256xf32>
    %c0_53 = arith.constant 0 : index
    %c0_54 = arith.constant 0 : index
    %72 = vector.load %arg20[%c0_53, %c0_54] : memref<1x256xf32, #tpu.memory_space<vmem>>, vector<1x256xf32>
    %73 = vector.broadcast %72 : vector<1x256xf32> to vector<128x256xf32>
    %74 = arith.addf %71, %73 : vector<128x256xf32>
    %cst_55 = arith.constant 0.000000e+00 : f32
    %75 = vector.broadcast %cst_55 : f32 to vector<128x256xf32>
    %76 = arith.maximumf %74, %75 : vector<128x256xf32>
    %77 = arith.addf %76, %0 : vector<128x256xf32>
    %78 = arith.truncf %77 : vector<128x256xf32> to vector<128x256xbf16>
    %79 = tpu.concatenate %78, %2 in 1 : vector<128x256xbf16>, vector<128x256xbf16> -> vector<128x512xbf16>
    %c0_56 = arith.constant 0 : index
    %c0_57 = arith.constant 0 : index
    %80 = vector.load %arg21[%c0_56, %c0_57] : memref<512x256xbf16, #tpu.memory_space<vmem>>, vector<512x256xbf16>
    %cst_58 = arith.constant dense<0.000000e+00> : vector<128x256xf32>
    %81 = tpu.matmul %79, %80, %cst_58 {dimension_numbers = #tpu.dot_dimension_numbers<[1], [0], [0], [1], [0, 0, 1, 1], [], []>} : vector<128x512xbf16>, vector<512x256xbf16>, vector<128x256xf32> -> vector<128x256xf32>
    %c0_59 = arith.constant 0 : index
    %c0_60 = arith.constant 0 : index
    %82 = vector.load %arg22[%c0_59, %c0_60] : memref<1x256xf32, #tpu.memory_space<vmem>>, vector<1x256xf32>
    %83 = vector.broadcast %82 : vector<1x256xf32> to vector<128x256xf32>
    %84 = arith.addf %81, %83 : vector<128x256xf32>
    %c0_61 = arith.constant 0 : index
    %c0_62 = arith.constant 0 : index
    %85 = vector.load %arg23[%c0_61, %c0_62] : memref<128x256xf32, #tpu.memory_space<vmem>>, vector<128x256xf32>
    tpu.vector_store %arg23[%c0_61, %c0_62], %84 {strides = array<i32>} : memref<128x256xf32, #tpu.memory_space<vmem>>, vector<128x256xf32>,
    return
  }
  func.func @transform_0(%arg0: i32) -> (i32, i32) {
    %c0_i32 = arith.constant 0 : i32
    %c0_i32_0 = arith.constant 0 : i32
    return %arg0, %c0_i32 : i32, i32
  }
  func.func @transform_1(%arg0: i32) -> (i32, i32) {
    %c0_i32 = arith.constant 0 : i32
    %c0_i32_0 = arith.constant 0 : i32
    return %arg0, %c0_i32 : i32, i32
  }
  func.func @transform_2(%arg0: i32) -> (i32, i32) {
    %c0_i32 = arith.constant 0 : i32
    %c0_i32_0 = arith.constant 0 : i32
    %c0_i32_1 = arith.constant 0 : i32
    return %c0_i32, %c0_i32_0 : i32, i32
  }
  func.func @transform_3(%arg0: i32) -> (i32, i32) {
    %c0_i32 = arith.constant 0 : i32
    %c0_i32_0 = arith.constant 0 : i32
    %c0_i32_1 = arith.constant 0 : i32
    return %c0_i32, %c0_i32_0 : i32, i32
  }
  func.func @transform_4(%arg0: i32) -> (i32, i32) {
    %c0_i32 = arith.constant 0 : i32
    %c0_i32_0 = arith.constant 0 : i32
    %c0_i32_1 = arith.constant 0 : i32
    return %c0_i32, %c0_i32_0 : i32, i32
  }
  func.func @transform_5(%arg0: i32) -> (i32, i32) {
    %c0_i32 = arith.constant 0 : i32
    %c0_i32_0 = arith.constant 0 : i32
    %c0_i32_1 = arith.constant 0 : i32
    return %c0_i32, %c0_i32_0 : i32, i32
  }
  func.func @transform_6(%arg0: i32) -> (i32, i32) {
    %c0_i32 = arith.constant 0 : i32
    %c0_i32_0 = arith.constant 0 : i32
    %c0_i32_1 = arith.constant 0 : i32
    return %c0_i32, %c0_i32_0 : i32, i32
  }
  func.func @transform_7(%arg0: i32) -> (i32, i32) {
    %c0_i32 = arith.constant 0 : i32
    %c0_i32_0 = arith.constant 0 : i32
    %c0_i32_1 = arith.constant 0 : i32
    return %c0_i32, %c0_i32_0 : i32, i32
  }
  func.func @transform_8(%arg0: i32) -> (i32, i32) {
    %c0_i32 = arith.constant 0 : i32
    %c0_i32_0 = arith.constant 0 : i32
    %c0_i32_1 = arith.constant 0 : i32
    return %c0_i32, %c0_i32_0 : i32, i32
  }
  func.func @transform_9(%arg0: i32) -> (i32, i32) {
    %c0_i32 = arith.constant 0 : i32
    %c0_i32_0 = arith.constant 0 : i32
    %c0_i32_1 = arith.constant 0 : i32
    return %c0_i32, %c0_i32_0 : i32, i32
  }
  func.func @transform_10(%arg0: i32) -> (i32, i32) {
    %c0_i32 = arith.constant 0 : i32
    %c0_i32_0 = arith.constant 0 : i32
    %c0_i32_1 = arith.constant 0 : i32
    return %c0_i32, %c0_i32_0 : i32, i32
  }
  func.func @transform_11(%arg0: i32) -> (i32, i32) {
    %c0_i32 = arith.constant 0 : i32
    %c0_i32_0 = arith.constant 0 : i32
    %c0_i32_1 = arith.constant 0 : i32
    return %c0_i32, %c0_i32_0 : i32, i32
  }
  func.func @transform_12(%arg0: i32) -> (i32, i32) {
    %c0_i32 = arith.constant 0 : i32
    %c0_i32_0 = arith.constant 0 : i32
    %c0_i32_1 = arith.constant 0 : i32
    return %c0_i32, %c0_i32_0 : i32, i32
  }
  func.func @transform_13(%arg0: i32) -> (i32, i32) {
    %c0_i32 = arith.constant 0 : i32
    %c0_i32_0 = arith.constant 0 : i32
    %c0_i32_1 = arith.constant 0 : i32
    return %c0_i32, %c0_i32_0 : i32, i32
  }
  func.func @transform_14(%arg0: i32) -> (i32, i32) {
    %c0_i32 = arith.constant 0 : i32
    %c0_i32_0 = arith.constant 0 : i32
    %c0_i32_1 = arith.constant 0 : i32
    return %c0_i32, %c0_i32_0 : i32, i32
  }
  func.func @transform_15(%arg0: i32) -> (i32, i32) {
    %c0_i32 = arith.constant 0 : i32
    %c0_i32_0 = arith.constant 0 : i32
    %c0_i32_1 = arith.constant 0 : i32
    return %c0_i32, %c0_i32_0 : i32, i32
  }
  func.func @transform_16(%arg0: i32) -> (i32, i32) {
    %c0_i32 = arith.constant 0 : i32
    %c0_i32_0 = arith.constant 0 : i32
    %c0_i32_1 = arith.constant 0 : i32
    return %c0_i32, %c0_i32_0 : i32, i32
  }
  func.func @transform_17(%arg0: i32) -> (i32, i32) {
    %c0_i32 = arith.constant 0 : i32
    %c0_i32_0 = arith.constant 0 : i32
    %c0_i32_1 = arith.constant 0 : i32
    return %c0_i32, %c0_i32_0 : i32, i32
  }
  func.func @transform_18(%arg0: i32) -> (i32, i32) {
    %c0_i32 = arith.constant 0 : i32
    %c0_i32_0 = arith.constant 0 : i32
    %c0_i32_1 = arith.constant 0 : i32
    return %c0_i32, %c0_i32_0 : i32, i32
  }
  func.func @transform_19(%arg0: i32) -> (i32, i32) {
    %c0_i32 = arith.constant 0 : i32
    %c0_i32_0 = arith.constant 0 : i32
    %c0_i32_1 = arith.constant 0 : i32
    return %c0_i32, %c0_i32_0 : i32, i32
  }
  func.func @transform_20(%arg0: i32) -> (i32, i32) {
    %c0_i32 = arith.constant 0 : i32
    %c0_i32_0 = arith.constant 0 : i32
    %c0_i32_1 = arith.constant 0 : i32
    return %c0_i32, %c0_i32_0 : i32, i32
  }
  func.func @transform_21(%arg0: i32) -> (i32, i32) {
    %c0_i32 = arith.constant 0 : i32
    %c0_i32_0 = arith.constant 0 : i32
    %c0_i32_1 = arith.constant 0 : i32
    return %c0_i32, %c0_i32_0 : i32, i32
  }
  func.func @transform_22(%arg0: i32) -> (i32, i32) {
    %c0_i32 = arith.constant 0 : i32
    %c0_i32_0 = arith.constant 0 : i32
    return %arg0, %c0_i32 : i32, i32
  }
}

</mosaic_0001>

<bundles_post_ra>
// kernel: tpu_custom_call.1
= control target key start
LH: loop header
LB: loop body
LE: loop exit
PB: predicated region body
PF: predicated region fallthrough
CT: control target
= control target key end

     0   :  { %s8916_s0 = inlined_call_operand.vmem [shape: f32[256,256], index: 0, kind: input, shape index: {}]   ;;  %s8917_s1 = inlined_call_operand.hbm [shape: f32[256,256], index: 1, kind: input, shape index: {}]   ;;  %s8918_s2 = inlined_call_operand.vmem [shape: bf16[512,128], index: 2, kind: input, shape index: {}]   ;;  %s8919_s3 = inlined_call_operand.hbm [shape: f32[1,128], index: 3, kind: input, shape index: {}]   ;;  %s8920_s4 = inlined_call_operand.vmem [shape: bf16[384,64], index: 4, kind: input, shape index: {}]   ;;  %s8921_s5 = inlined_call_operand.hbm [shape: f32[1,64], index: 5, kind: input, shape index: {}]   ;;  %s8922_s6 = inlined_call_operand.vmem [shape: bf16[64,32], index: 6, kind: input, shape index: {}]   ;;  %s8923_s7 = inlined_call_operand.vmem [shape: bf16[256,32], index: 7, kind: input, shape index: {}]   ;;  %s8924_s8 = inlined_call_operand.hbm [shape: f32[1,32], index: 8, kind: input, shape index: {}]   ;;  %s8925_s9 = inlined_call_operand.hbm [shape: bf16[32,32], index: 9, kind: input, shape index: {}]   ;;  %s8926_s10 = inlined_call_operand.vmem [shape: bf16[256,32], index: 10, kind: input, shape index: {}]   ;;  %s8927_s11 = inlined_call_operand.hbm [shape: f32[1,32], index: 11, kind: input, shape index: {}]   ;;  %s8928_s12 = inlined_call_operand.hbm [shape: bf16[32,64], index: 12, kind: input, shape index: {}]   ;;  %s8929_s13 = inlined_call_operand.vmem [shape: bf16[256,64], index: 13, kind: input, shape index: {}]   ;;  %s8930_s14 = inlined_call_operand.hbm [shape: f32[1,64], index: 14, kind: input, shape index: {}]   ;;  %s8931_s15 = inlined_call_operand.hbm [shape: bf16[64,128], index: 15, kind: input, shape index: {}]   ;;  %s8932_s16 = inlined_call_operand.hbm [shape: bf16[256,128], index: 16, kind: input, shape index: {}]   ;;  %s8933_s17 = inlined_call_operand.vmem [shape: f32[1,128], index: 17, kind: input, shape index: {}]   ;;  %s8934_s18 = inlined_call_operand.hbm [shape: bf16[384,256], index: 18, kind: input, shape index: {}]   ;;  %s8935_s19 = inlined_call_operand.vmem [shape: f32[1,256], index: 19, kind: input, shape index: {}]   ;;  %s8936_s20 = inlined_call_operand.hbm [shape: bf16[512,256], index: 20, kind: input, shape index: {}]   ;;  %s8937_s21 = inlined_call_operand.vmem [shape: f32[1,256], index: 21, kind: input, shape index: {}]   ;;  %s8938_s22 = inlined_call_operand.hbm [shape: f32[256,256], index: 22, kind: output, shape index: {}]  }
   0x1   :  { %9045 = sst [smem:[#allocation69_spill]] %s8916_s0 }
   0x2   :  { %9046 = sst [smem:[#allocation70_spill]] %s8917_s1 }
   0x3   :  { %9047 = sst [smem:[#allocation71_spill]] %s8918_s2 }
   0x4   :  { %9048 = sst [smem:[#allocation72_spill]] %s8919_s3 }
   0x5   :  { %9049 = sst [smem:[#allocation73_spill]] %s8920_s4 }
   0x6   :  { %9050 = sst [smem:[#allocation74_spill]] %s8921_s5 }
   0x7   :  { %9051 = sst [smem:[#allocation75_spill]] %s8922_s6 }
   0x8   :  { %9052 = sst [smem:[#allocation76_spill]] %s8924_s8 }
   0x9   :  { %9053 = sst [smem:[#allocation77_spill]] %s8925_s9 }
   0xa   :  { %9054 = sst [smem:[#allocation78_spill]] %s8927_s11 }
   0xb   :  { %9055 = sst [smem:[#allocation79_spill]] %s8928_s12 }
   0xc   :  { %9056 = sst [smem:[#allocation80_spill]] %s8930_s14 }
   0xd   :  { %9057 = sst [smem:[#allocation81_spill]] %s8931_s15 }
   0xe   :  { %9058 = sst [smem:[#allocation82_spill]] %s8932_s16 }
   0xf   :  { %9059 = sst [smem:[#allocation83_spill]] %s8935_s19 }
  0x10   :  { %9060 = sst [smem:[#allocation84_spill]] %s8937_s21 }
  0x11   :  { %9061 = sst [smem:[#allocation85_spill]] %s8938_s22 }
  0x12   :  { %27 = vsyncpa [#allocation3], 0 }
  0x13   :  { %29 = vsyncpa [#allocation3 + $0x1], 0 }
  0x14   :  { %30 = vsyncpa [#allocation6], 0 }
  0x15   :  { %31 = vsyncpa [#allocation9], 0 }
  0x16   :  { %32 = vsyncpa [#allocation12], 0 }
  0x17   :  { %33 = vsyncpa [#allocation15], 0 }
  0x18   :  { %34 = vsyncpa [#allocation18], 0 }
  0x19   :  { %35 = vsyncpa [#allocation21], 0 }
  0x1a   :  { %36 = vsyncpa [#allocation4], 0 }
  0x1b   :  { %38 = vsyncpa [#allocation4 + $0x1], 0  ;;  %s7069_s3 = smov 0   ;;  %s7071_s28 = smov 0  }
  0x1c   :  { %s7073_s29 = smov 0   ;;  %s7075_s30 = smov 0  }
  0x1d LB: > { %s6932_s4 = smov [#allocation5]   ;;  %s7090_s23 = sadd.s32 4294967295, %s6930_s30   ;;  %s6930_s30 = sphi %s7075_s30, %s9234_s30   ;;  %s6926_s29 = sphi %s7073_s29, %s9233_s29   ;;  %s6922_s28 = sphi %s7071_s28, %s9232_s28   ;;  %s6918_s3 = sphi %s7069_s3, %s9231_s3  }
  0x1e   : > { %s563_s0 = sshll.u32 %s6932_s4, 4  ;;  %p5059_p0 = scmp.ge.s32.totalorder %s6930_s30, 1  ;;  %s564_s0 = int_to_ptr.vmem [resolvable:$true] %s563_s0 }
  0x1f   : > { %p8948_p1 = scmp.eq.s32.totalorder %s7090_s23, 0  ;;  %p547_p2 = scmp.lt.s32.totalorder %s6930_s30, 3 }
  0x20   : > { %s6933_s5 = smov [#allocation8]   ;;  %s6934_s6 = smov [#allocation11]  }
  0x21   : > { %p7095_p3 = pnand %p5059_p0, %p547_p2  ;;  %s594_s24 = sshll.u32 %s6933_s5, 4  ;;  %s7102_s24 = int_to_ptr.vmem [resolvable:$true] %s594_s24 }
  0x22   : > { %s621_s25 = sshll.u32 %s6934_s6, 4  ;;  %s6935_s2 = smov [#allocation14]   ;;  %s7110_s25 = int_to_ptr.vmem [resolvable:$true] %s621_s25 }
  0x23   : > { %s9062_s1 = scalar_select %p7095_p3, 1, 0 }
  0x24   : > { %p6078_p5 = pneg %p7095_p3  ;;  %s7112_s27 = sshll.u32 %s6935_s2, 4  ;;  %s649_s27 = int_to_ptr.vmem [resolvable:$true] %s7112_s27 }
  0x25   : > { %s6539_s5 = scalar_lea.vmem %s564_s0, 16  ;;  %s6546_s6 = scalar_lea.vmem %s564_s0, 32 }
  0x26   : > { %p7106_p6 = pnand %p6078_p5, %p8948_p1  ;;  %p6540_p8 = scmp.ne.s32.totalorder %s564_s0, %s6539_s5 }
  0x27   : > { %p6547_p11 = scmp.lt.s32.totalorder %s564_s0, %s564_s0  ;;  %p6548_p12 = scmp.lt.s32.totalorder %s6546_s6, %s6539_s5 }
  0x28   : > { %p7116_p7 = pneg %p7106_p6 }
  0x29   : > { %p6549_p13 = por %p6548_p12, %p6547_p11 }
  0x2a   : > { %p6542_p9 = pnand %p6540_p8, %p7116_p7 }
  0x2c   : > { %p6543_p10 = pneg %p6542_p9 }
  0x2e   : > { %p6550_p0 = pnand %p6549_p13, %p6543_p10 }
  0x30   : > { %6553 = shalt.err (!%p6550_p0)
}
  0x31   : > { %s9065_s21 = sld [smem:[#allocation72_spill]]  ;;  %s6565_s19 = scalar_lea.vmem %s7102_s24, 16 }
  0x32   : > { %p6566_p2 = scmp.ne.s32.totalorder %s7102_s24, %s6565_s19  ;;  %s6572_s5 = scalar_lea.vmem %s7102_s24, 32 }
  0x33   : > { %p6573_p9 = scmp.lt.s32.totalorder %s7102_s24, %s7102_s24  ;;  %p6574_p10 = scmp.lt.s32.totalorder %s6572_s5, %s6565_s19 }
  0x34   : > { %p6568_p5 = pnand %p6566_p2, %p7116_p7 }
  0x35   : > { %p6575_p11 = por %p6574_p10, %p6573_p9 }
  0x36   : > { %p6569_p8 = pneg %p6568_p5 }
  0x37   : > { %6081 = dma.hbm_to_vmem [thread:$0]  (!%p7106_p6), %s9065_s21, 16, %s564_s0, [#allocation6]  }
  0x38   : > { %p6576_p12 = pnand %p6575_p11, %p6569_p8 }
  0x3a   : > { %6579 = shalt.err (!%p6576_p12)
}
  0x3b   : > { %s9066_s8 = sld [smem:[#allocation76_spill]]  ;;  %s6591_s21 = scalar_lea.vmem %s7110_s25, 16 }
  0x3c   : > { %p6592_p13 = scmp.ne.s32.totalorder %s7110_s25, %s6591_s21  ;;  %s6598_s19 = scalar_lea.vmem %s7110_s25, 32 }
  0x3d   : > { %p6599_p5 = scmp.lt.s32.totalorder %s7110_s25, %s7110_s25  ;;  %p6600_p8 = scmp.lt.s32.totalorder %s6598_s19, %s6591_s21 }
  0x3e   : > { %p6594_p0 = pnand %p6592_p13, %p7116_p7 }
  0x3f   : > { %p6601_p9 = por %p6600_p8, %p6599_p5 }
  0x40   : > { %p6595_p2 = pneg %p6594_p0 }
  0x41   : > { %6087 = dma.hbm_to_vmem [thread:$0]  (!%p7106_p6), %s9066_s8, 16, %s7102_s24, [#allocation9]  }
  0x42   : > { %p6602_p10 = pnand %p6601_p9, %p6595_p2 }
  0x44   : > { %6605 = shalt.err (!%p6602_p10)
}
  0x45   : > { %s9067_s11 = sld [smem:[#allocation78_spill]]  ;;  %s6617_s24 = scalar_lea.vmem %s649_s27, 16 }
  0x46   : > { %p6618_p11 = scmp.ne.s32.totalorder %s649_s27, %s6617_s24  ;;  %s6624_s5 = scalar_lea.vmem %s649_s27, 32 }
  0x47   : > { %p6625_p0 = scmp.lt.s32.totalorder %s649_s27, %s649_s27  ;;  %p6626_p5 = scmp.lt.s32.totalorder %s6624_s5, %s6617_s24 }
  0x48   : > { %p6620_p12 = pnand %p6618_p11, %p7116_p7 }
  0x49   : > { %p6627_p2 = por %p6626_p5, %p6625_p0 }
  0x4a   : > { %p6621_p13 = pneg %p6620_p12 }
  0x4b   : > { %6093 = dma.hbm_to_vmem [thread:$0]  (!%p7106_p6), %s9067_s11, 16, %s7110_s25, [#allocation12]  }
  0x4c   : > { %p6628_p8 = pnand %p6627_p2, %p6621_p13 }
  0x4e   : > { %6631 = shalt.err (!%p6628_p8)
}
  0x4f   : > { %s9068_s14 = sld [smem:[#allocation80_spill]]  ;;  %s6936_s25 = smov [#allocation17]  }
  0x50   : > { %s671_s21 = sshll.u32 %s6936_s25, 4  ;;  %s6937_s19 = smov [#allocation7]   ;;  %s672_s21 = int_to_ptr.vmem [resolvable:$true] %s671_s21 }
  0x51   : > { %s577_s0 = sshll.u32 %s6937_s19, 4  ;;  %s6643_s2 = scalar_lea.vmem %s672_s21, 2048  ;;  %s578_s0 = int_to_ptr.vmem [resolvable:$true] %s577_s0 }
  0x52   : > { %p6644_p9 = scmp.ne.s32.totalorder %s672_s21, %s6643_s2  ;;  %p6651_p12 = scmp.lt.s32.totalorder %s672_s21, %s672_s21 }
  0x53   : > { %p6652_p13 = scmp.lt.s32.totalorder %s6643_s2, %s6643_s2 }
  0x54   : > { %p6646_p10 = pnand %p6644_p9, %p7116_p7 }
  0x55   : > { %6099 = dma.hbm_to_vmem [thread:$0]  (!%p7106_p6), %s9068_s14, 16, %s649_s27, [#allocation15]  }
  0x56   : > { %p6647_p11 = pneg %p6646_p10  ;;  %p6653_p0 = por %p6652_p13, %p6651_p12 }
  0x58   : > { %p6654_p5 = pnand %p6653_p0, %p6647_p11 }
  0x5a   : > { %6657 = shalt.err (!%p6654_p5)
}
  0x5b   : > { %s8944_s24 = smov 64   ;;  %s8946_s27 = smov 4  }
  0x5c   : > { %s9069_s16 = sld [smem:[#allocation82_spill]]  ;;  %s6669_s6 = scalar_lea.vmem %s578_s0, 16 }
  0x5d   : > { %p6670_p2 = scmp.ne.s32.totalorder %s578_s0, %s6669_s6  ;;  %s6676_s25 = scalar_lea.vmem %s578_s0, 32 }
  0x5e   : > { %p6677_p10 = scmp.lt.s32.totalorder %s578_s0, %s578_s0  ;;  %p6678_p11 = scmp.lt.s32.totalorder %s6676_s25, %s6669_s6 }
  0x5f   : > { %p6672_p8 = pnand %p6670_p2, %p7116_p7 }
  0x60   : > { %p6679_p12 = por %p6678_p11, %p6677_p10 }
  0x61   : > { %p6673_p9 = pneg %p6672_p8 }
  0x62   : > { %6105 = dma.hbm_to_vmem [thread:$0]  (!%p7106_p6), %s9069_s16, 2048, %s672_s21, [#allocation18], %s8944_s24, %s8944_s24, %s8946_s27  }
  0x63   : > { %p6680_p13 = pnand %p6679_p12, %p6673_p9 }
  0x65   : > { %6683 = shalt.err (!%p6680_p13)
}
  0x66   : > { %s9070_s8 = sld [smem:[#allocation74_spill]]  ;;  %s6940_s5 = smov [#allocation10]  }
  0x67   : > { %s604_s21 = sshll.u32 %s6940_s5, 4  ;;  %s6941_s22 = smov [#allocation13]   ;;  %s605_s21 = int_to_ptr.vmem [resolvable:$true] %s604_s21 }
  0x68   : > { %s631_s24 = sshll.u32 %s6941_s22, 4  ;;  %s6695_s27 = scalar_lea.vmem %s605_s21, 256  ;;  %s632_s24 = int_to_ptr.vmem [resolvable:$true] %s631_s24 }
  0x69   : > { %p6696_p0 = scmp.ne.s32.totalorder %s605_s21, %s6695_s27  ;;  %p6703_p8 = scmp.lt.s32.totalorder %s605_s21, %s605_s21 }
  0x6a   : > { %p6704_p9 = scmp.lt.s32.totalorder %s6695_s27, %s6695_s27 }
  0x6b   : > { %p6698_p5 = pnand %p6696_p0, %p7116_p7 }
  0x6c   : > { %6084 = dma.hbm_to_vmem [thread:$0]  (!%p7106_p6), %s9070_s8, 16, %s578_s0, [#allocation6]  }
  0x6d   : > { %p6699_p2 = pneg %p6698_p5  ;;  %p6705_p10 = por %p6704_p9, %p6703_p8 }
  0x6f   : > { %p6706_p11 = pnand %p6705_p10, %p6699_p2 }
  0x71   : > { %6709 = shalt.err (!%p6706_p11)
}
  0x72   : > { %s9071_s6 = smov 4   ;;  %s9072_s8 = smov 64  }
  0x73   : > { %s9073_s9 = sld [smem:[#allocation77_spill]]  ;;  %s6721_s19 = scalar_lea.vmem %s632_s24, 256 }
  0x74   : > { %p6722_p12 = scmp.ne.s32.totalorder %s632_s24, %s6721_s19  ;;  %p6729_p5 = scmp.lt.s32.totalorder %s632_s24, %s632_s24 }
  0x75   : > { %p6730_p4 = scmp.lt.s32.totalorder %s6721_s19, %s6721_s19 }
  0x76   : > { %p6724_p13 = pnand %p6722_p12, %p7116_p7 }
  0x77   : > { %p6731_p8 = por %p6730_p4, %p6729_p5 }
  0x78   : > { %p6725_p0 = pneg %p6724_p13 }
  0x79   : > { %6090 = dma.hbm_to_vmem [thread:$0]  (!%p7106_p6), %s9073_s9, 256, %s605_s21, [#allocation9], %s9072_s8, %s9072_s8, %s9071_s6  }
  0x7a   : > { %p6732_p2 = pnand %p6731_p8, %p6725_p0 }
  0x7c   : > { %6735 = shalt.err (!%p6732_p2)
}
  0x7d   : > { %s9074_s12 = sld [smem:[#allocation79_spill]]  ;;  %s6942_s5 = smov [#allocation16]  }
  0x7e   : > { %s658_s21 = sshll.u32 %s6942_s5, 4  ;;  %s6943_s22 = smov [#allocation19]   ;;  %s659_s21 = int_to_ptr.vmem [resolvable:$true] %s658_s21 }
  0x7f   : > { %s687_s0 = sshll.u32 %s6943_s22, 4  ;;  %s6747_s25 = scalar_lea.vmem %s659_s21, 512  ;;  %s688_s0 = int_to_ptr.vmem [resolvable:$true] %s687_s0 }
  0x80   : > { %p6748_p4 = scmp.ne.s32.totalorder %s659_s21, %s6747_s25  ;;  %p6755_p11 = scmp.lt.s32.totalorder %s659_s21, %s659_s21 }
  0x81   : > { %p6756_p12 = scmp.lt.s32.totalorder %s6747_s25, %s6747_s25 }
  0x82   : > { %p6750_p9 = pnand %p6748_p4, %p7116_p7 }
  0x83   : > { %6096 = dma.hbm_to_vmem [thread:$0]  (!%p7106_p6), %s9074_s12, 256, %s632_s24, [#allocation12], %s9072_s8, %s9072_s8, %s9071_s6  }
  0x84   : > { %p6751_p10 = pneg %p6750_p9  ;;  %p6757_p13 = por %p6756_p12, %p6755_p11 }
  0x86   : > { %p6758_p0 = pnand %p6757_p13, %p6751_p10 }
  0x88   : > { %6761 = shalt.err (!%p6758_p0)
}
  0x89   : > { %s9075_s15 = sld [smem:[#allocation81_spill]]  ;;  %s6773_s27 = scalar_lea.vmem %s688_s0, 6144 }
  0x8a   : > { %p6774_p5 = scmp.ne.s32.totalorder %s688_s0, %s6773_s27  ;;  %p6781_p4 = scmp.lt.s32.totalorder %s688_s0, %s688_s0 }
  0x8b   : > { %p6782_p9 = scmp.lt.s32.totalorder %s6773_s27, %s6773_s27 }
  0x8c   : > { %p6776_p8 = pnand %p6774_p5, %p7116_p7 }
  0x8d   : > { %p6783_p11 = por %p6782_p9, %p6781_p4 }
  0x8e   : > { %p6777_p2 = pneg %p6776_p8 }
  0x8f   : > { %6102 = dma.hbm_to_vmem [thread:$0]  (!%p7106_p6), %s9075_s15, 512, %s659_s21, [#allocation15], %s9072_s8, %s9072_s8, %s9071_s6  }
  0x90   : > { %p6784_p10 = pnand %p6783_p11, %p6777_p2 }
  0x92   : > { %6787 = shalt.err (!%p6784_p10)
}
  0x93   : > { %s6944_s2 = smov 128   ;;  %s6945_s5 = smov 8  }
  0x94   : > { %6108 = dma.hbm_to_vmem [thread:$0]  (!%p7106_p6), %s8934_s18, 6144, %s688_s0, [#allocation18], %s6944_s2, %s6944_s2, %s6945_s5  }
  0x95   : > { %s6946_s6 = smov [#allocation20]  }
  0x96   : > { %s703_s8 = sshll.u32 %s6946_s6, 4  ;;  %s704_s8 = int_to_ptr.vmem [resolvable:$true] %s703_s8 }
  0x97   : > { %s6799_s21 = scalar_lea.vmem %s704_s8, 8192  ;;  %p6807_p5 = scmp.lt.s32.totalorder %s704_s8, %s704_s8 }
  0x98   : > { %p6800_p12 = scmp.ne.s32.totalorder %s704_s8, %s6799_s21  ;;  %p6808_p8 = scmp.lt.s32.totalorder %s6799_s21, %s6799_s21 }
  0x9a   : > { %p6802_p13 = pnand %p6800_p12, %p7116_p7  ;;  %p6809_p2 = por %p6808_p8, %p6807_p5 }
  0x9c   : > { %p6803_p0 = pneg %p6802_p13 }
  0x9e   : > { %p6810_p4 = pnand %p6809_p2, %p6803_p0 }
  0xa0   : > { %6813 = shalt.err (!%p6810_p4)
}
  0xa1   : > { %6111 = dma.hbm_to_vmem [thread:$0]  (!%p7106_p6), %s8936_s20, 8192, %s704_s8, [#allocation21], %s6944_s2, %s6944_s2, %s6945_s5  }
  0xa2   : > { %s5058_s4 = sadd.s32 4294967294, %s6930_s30   ;;  %s7224_s26 = sadd.s32 1, %s6930_s30  }
  0xa3   : > { %s77_s0 = sadd.s32 1, %s6926_s29  ;;  %s74_s27 = ssub.s32 %s6930_s30, %s7224_s26 }
  0xa4   : > { %p84_p7 = scmp.ne.s32.totalorder %s6926_s29, %s6922_s28  ;;  %p75_p9 = scmp.eq.s32.totalorder %s74_s27, 0 }
  0xa5   : > { %p85_p11 = scmp.eq.s32.totalorder %s6930_s30, 0  ;;  %p90_p10 = scmp.ne.s32.totalorder %s6922_s28, %s6918_s3 }
  0xa6   : > { %p534_p12 = scmp.eq.s32.totalorder %s7090_s23, 1  ;;  %p540_p5 = scmp.eq.s32.totalorder %s5058_s4, 1 }
  0xa7   : > { %s7236_s22 = scalar_select %p75_p9, %s6926_s29, %s77_s0  }
  0xa8   : > { %p86_p13 = por %p85_p11, %p84_p7  ;;  %p7240_p0 = por %p8948_p1, %p90_p10 }
  0xa9   : > { %p7244_p6 = por %p534_p12, %p84_p7  ;;  %p6131_p8 = scmp.lt.s32.totalorder %s6930_s30, 2 }
  0xaa   : > { %s9076_s25 = scalar_select %p7240_p0, 1, 0 }
  0xab   : > { %s9077_s2 = scalar_select %p7244_p6, 1, 0 }
  0xac   : > { %s730_s5 = sand.u32 1, %s6926_s29   ;;  %p7250_p2 = por %p540_p5, %p90_p10 }
  0xad   : > { %s5072_s8 = sshll.u32 %s730_s5, 8  ;;  %s5382_s21 = sshll.u32 %s6930_s30, 12 }
  0xae   : > { %s9078_s6 = scalar_select %p7250_p2, 1, 0 }
  0xaf   : > { %s9079_s0 = sld [smem:[#allocation70_spill]]  ;;  %s734_s9 = scalar_lea.vmem [#allocation2], %s5072_s8 }
  0xb0   : > { %s742_s11 = sshll.u32 %s734_s9, 4  ;;  %p7260_p4 = pnand %p6131_p8, %p86_p13  ;;  %s7264_s11 = int_to_ptr.vmem [resolvable:$true] %s742_s11 }
  0xb1   : > { %s7266_s12 = scalar_lea.sflag [#allocation3], %s730_s5 }
  0xb2   : > { %p6816_p9 = pneg %p7260_p4 }
  0xb5   : > { %s7258_s27 = scalar_lea.hbm %s9079_s0, %s5382_s21  ;;  %s6819_s8 = scalar_lea.hbm %s9079_s0, 8192 }
  0xb6   : > { %s6814_s14 = scalar_lea.hbm %s7258_s27, 4096  ;;  %p6820_p12 = scmp.lt.s32.totalorder %s7258_s27, %s9079_s0 }
  0xb7   : > { %p6815_p7 = scmp.ne.s32.totalorder %s7258_s27, %s6814_s14  ;;  %p6821_p13 = scmp.lt.s32.totalorder %s6819_s8, %s6814_s14 }
  0xb9   : > { %p6817_p11 = pnand %p6816_p9, %p6815_p7  ;;  %p6822_p5 = por %p6821_p13, %p6820_p12 }
  0xbb   : > { %p6818_p10 = pneg %p6817_p11 }
  0xbd   : > { %p6823_p8 = pnand %p6822_p5, %p6818_p10 }
  0xbf   : > { %6826 = shalt.err (!%p6823_p8)
}
  0xc0   : > { %s6827_s5 = scalar_lea.vmem %s7264_s11, 4096  ;;  %s6947_s15 = smov [#allocation2]  }
  0xc1   : > { %p6828_p1 = scmp.ne.s32.totalorder %s7264_s11, %s6827_s5  ;;  %s6832_s16 = sshll.u32 %s6947_s15, 4  ;;  %s6833_s16 = int_to_ptr.vmem [resolvable:$false] %s6832_s16 }
  0xc2   : > { %s6834_s21 = scalar_lea.vmem %s6833_s16, 8192  ;;  %p6835_p11 = scmp.lt.s32.totalorder %s7264_s11, %s6833_s16 }
  0xc3   : > { %p6830_p2 = pnand %p6828_p1, %p6816_p9  ;;  %p6836_p6 = scmp.lt.s32.totalorder %s6834_s21, %s6827_s5 }
  0xc5   : > { %p6831_p7 = pneg %p6830_p2  ;;  %p6837_p0 = por %p6836_p6, %p6835_p11 }
  0xc7   : > { %p6838_p3 = pnand %p6837_p0, %p6831_p7 }
  0xc9   : > { %6841 = shalt.err (!%p6838_p3)
}
  0xca   : > { %s6948_s14 = smov 256   ;;  %s6949_s24 = smov 16  }
  0xcb   : > { %6115 = dma.hbm_to_vmem [thread:$0]  (!%p7260_p4), %s7258_s27, 4096, %s7264_s11, %s7266_s12, %s6948_s14, %s6948_s14, %s6949_s24  }
  0xcc   : > { %p9081_p1 = scmp.ne.s32.totalorder %s9062_s1, 0 }
  0xce   : > { %754 = sbr.rel (%p9081_p1) target bundleno = 2020 (0x7e4), region = 108 }
  0xd3   : > { %s7290_s15 = sand.u32 1, %s6922_s28   ;;  %p9082_p3 = scmp.ne.s32.totalorder %s9076_s25, 0 }
  0xd4   : > { %s8952_s16 = sshll.u32 %s7290_s15, 8  ;;  %s757_s8 = scalar_lea.sflag [#allocation3], %s7290_s15 }
  0xd5   : > { %s7296_s9 = scalar_lea.vmem [#allocation2], %s8952_s16 }
  0xd6   : > { %6885 = dma.done.wait (%p9082_p3), %s757_s8, 4096  }
  0xd7   : > { %6887 = vsyncadd (%p9082_p3), %s757_s8, 4294963200  ;;  %p9083_p0 = scmp.eq.s32.totalorder %s7090_s23, 0 }
  0xd9   : > { %6889 = dma.done.wait (%p9083_p0), [#allocation6], 32   ;;  %p9084_p6 = pmov %p9083_p0 }
  0xda   : > { %p9085_p2 = pmov %p9083_p0 }
  0xdb   : > { %6891 = vsyncadd (%p9084_p6), [#allocation6], 4294967264 }
  0xdc   : > { %6893 = dma.done.wait (%p9085_p2), [#allocation9], 272   ;;  %p9086_p4 = pmov %p9083_p0 }
  0xdd   : > { %p9087_p9 = pmov %p9083_p0 }
  0xde   : > { %6895 = vsyncadd (%p9086_p4), [#allocation9], 4294967024 }
  0xdf   : > { %6897 = dma.done.wait (%p9087_p9), [#allocation12], 272   ;;  %p9088_p10 = pmov %p9083_p0 }
  0xe0   : > { %p9089_p12 = pmov %p9083_p0 }
  0xe1   : > { %6899 = vsyncadd (%p9088_p10), [#allocation12], 4294967024 }
  0xe2   : > { %6901 = dma.done.wait (%p9089_p12), [#allocation15], 528   ;;  %p9090_p13 = pmov %p9083_p0 }
  0xe3   : > { %p9091_p5 = pmov %p9083_p0 }
  0xe4   : > { %6903 = vsyncadd (%p9090_p13), [#allocation15], 4294966768 }
  0xe5   : > { %6905 = dma.done.wait (%p9091_p5), [#allocation18], 8192   ;;  %p9092_p8 = pmov %p9083_p0 }
  0xe6   : > { %p9093_p7 = pmov %p9083_p0 }
  0xe7   : > { %6907 = vsyncadd (%p9092_p8), [#allocation18], 4294959104 }
  0xe8   : > { %6909 = dma.done.wait (%p9093_p7), [#allocation21], 8192   ;;  %p9094_p11 = pmov %p9083_p0 }
  0xe9   : > { %s9095_s1 = sld [smem:[#allocation71_spill]]  ;;  %s5090_s8 = sshll.u32 %s7090_s23, 4  ;;  %v914_v34 = vld [vmem:[%s7296_s9 + $0x8] sm:$0xff]  ;;  %v916_v36 = vld [vmem:[%s7296_s9 + $0x18] sm:$0xff]  ;;  %v913_v41 = vld [vmem:[%s7296_s9] sm:$0xff]  ;;  %vm2132_vm0 = vcmask 523264  }
  0xea   : > { %6911 = vsyncadd (%p9094_p11), [#allocation21], 4294959104  ;;  %p872_p1 = scmp.lt.s32.totalorder %s5090_s8, 31  ;;  %s9096_s12 = sld [smem:[#allocation69_spill]]  ;;  %v7434_v39 = vpack.c.bf16 %v916_v36, %v914_v34  ;;  %v915_v42 = vld [vmem:[%s7296_s9 + $0x10] sm:$0xff]  ;;  %v918_v46 = vld [vmem:[%s7296_s9 + $0x28] sm:$0xff] }
  0xeb   : > { %v7439_v44 = vpack.c.bf16 %v915_v42, %v913_v41  ;;  %v920_v47 = vld [vmem:[%s7296_s9 + $0x38] sm:$0xff]  ;;  %v917_v52 = vld [vmem:[%s7296_s9 + $0x20] sm:$0xff]  ;;  %v919_v53 = vld [vmem:[%s7296_s9 + $0x30] sm:$0xff]  ;;  %s9097_s14 = sld [smem:[#allocation73_spill]]  ;;  %vm2542_vm1 = vcmask 261120   ;;  %s5385_s4 = sshll.u32 %s7090_s23, 12 }
  0xec   : > { %s9236_s8 = smov (!%p872_p1, %s5090_s8), 31  ;;  %1369 = vmatprep.mubr.bf16.mxu1 %v7434_v39  ;;  %v7445_v49 = vpack.c.bf16 %v920_v47, %v918_v46  ;;  %v922_v56 = vld [vmem:[%s7296_s9 + $0x48] sm:$0xff]  ;;  %v924_v57 = vld [vmem:[%s7296_s9 + $0x58] sm:$0xff]  ;;  %v7457_v59 = vpack.c.bf16 %v919_v53, %v917_v52  ;;  %v935_v52 = vld [vmem:[%s7296_s9 + $0xb0] sm:$0xff]  ;;  %s9104_s11 = sld [smem:[#allocation75_spill]] }
  0xed   : > { %s5383_s25 = sshll.u32 %s9236_s8, 4  ;;  %v7459_v61 = vpack.c.bf16 %v924_v57, %v922_v56  ;;  %v934_v34 = vld [vmem:[%s7296_s9 + $0xa8] sm:$0xff]  ;;  %s9224_s24 = sld [smem:[#allocation84_spill]] }
  0xee   : > { %v938_v57 = vld [vmem:[%s7296_s9 + $0xc8] sm:$0xff]  ;;  %p9227_p0 = scmp.ne.s32.totalorder %s9077_s2, 0  ;;  %s6951_s21 = smov [#allocation22]  }
  0xef   : > { %v6196_v0 = vld [vmem:[%s9095_s1 + $0x78] sm:$0xff]   ;;  %v6200_v4 = vld [vmem:[%s9095_s1 + $0x70] sm:$0xff]   ;;  %v6204_v8 = vld [vmem:[%s9095_s1 + $0x68] sm:$0xff]  }
  0xf0   : > { %v6197_v1 = vld [vmem:[%s9095_s1 + $0xf8] sm:$0xff]   ;;  %5386 = vmatprep.subr.bf16.mxu0 %v6196_v0  ;;  %v6201_v5 = vld [vmem:[%s9095_s1 + $0xf0] sm:$0xff]   ;;  %v6205_v9 = vld [vmem:[%s9095_s1 + $0xe8] sm:$0xff]   ;;  %s7420_s8 = scalar_lea.vmem %s9096_s12, %s5383_s25  ;;  %s9223_s25 = sld [smem:[#allocation83_spill]] }
  0xf1   : > { %v6198_v2 = vld [vmem:[%s9095_s1 + $0x38] sm:$0xff]   ;;  %5450 = vmatprep.subr.bf16.mxu1 %v6197_v1  ;;  %v6202_v6 = vld [vmem:[%s9095_s1 + $0x30] sm:$0xff]   ;;  %v6206_v10 = vld [vmem:[%s9095_s1 + $0x28] sm:$0xff]   ;;  %s9225_s12 = sshll.u32 %s7290_s15, 8 }
  0xf2   : > { %v6199_v3 = vld [vmem:[%s9095_s1 + $0xb8] sm:$0xff]   ;;  %5387 = vmatpush3.bf16.msra.mxu0 %v6198_v2  ;;  %v6203_v7 = vld [vmem:[%s9095_s1 + $0xb0] sm:$0xff]   ;;  %v6207_v11 = vld [vmem:[%s9095_s1 + $0xa8] sm:$0xff]   ;;  %s8792_s27 = scalar_lea.vmem [#allocation22], %s9225_s12 }
  0xf3   : > { %5451 = vmatpush3.bf16.msra.mxu1 %v6199_v3  ;;  %5388 = vmatprep.subr.bf16.mxu0 %v6200_v4  ;;  %v6208_v12 = vld [vmem:[%s9095_s1 + $0x60] sm:$0xff]   ;;  %v6212_v16 = vld [vmem:[%s9095_s1 + $0x58] sm:$0xff]   ;;  %v6216_v20 = vld [vmem:[%s9095_s1 + $0x50] sm:$0xff]   ;;  %s4868_s19 = sshll.u32 %s8792_s27, 4  ;;  %s8871_s19 = int_to_ptr.vmem [resolvable:$true] %s4868_s19 }
  0xf4   : > { %5452 = vmatprep.subr.bf16.mxu1 %v6201_v5  ;;  %v6209_v13 = vld [vmem:[%s9095_s1 + $0xe0] sm:$0xff]   ;;  %v6213_v17 = vld [vmem:[%s9095_s1 + $0xd8] sm:$0xff]   ;;  %v6217_v21 = vld [vmem:[%s9095_s1 + $0xd0] sm:$0xff]  }
  0xf5   : > { %v6210_v14 = vld [vmem:[%s9095_s1 + $0x20] sm:$0xff]   ;;  %v6214_v18 = vld [vmem:[%s9095_s1 + $0x18] sm:$0xff]   ;;  %v6218_v22 = vld [vmem:[%s9095_s1 + $0x10] sm:$0xff]  }
  0xf6   : > { %5389 = vmatpush3.bf16.msra.mxu0 %v6202_v6  ;;  %v6211_v15 = vld [vmem:[%s9095_s1 + $0xa0] sm:$0xff]   ;;  %v6215_v19 = vld [vmem:[%s9095_s1 + $0x98] sm:$0xff]   ;;  %v6219_v23 = vld [vmem:[%s9095_s1 + $0x90] sm:$0xff]  }
  0xf7   : > { %5453 = vmatpush3.bf16.msra.mxu1 %v6203_v7  ;;  %5390 = vmatprep.subr.bf16.mxu0 %v6204_v8  ;;  %v6220_v24 = vld [vmem:[%s9095_s1 + $0x48] sm:$0xff]   ;;  %v6224_v28 = vld [vmem:[%s9095_s1 + $0x40] sm:$0xff]   ;;  %v884_v33 = vld [vmem:[%s7420_s8 + $0x18] sm:$0xff] }
  0xf8   : > { %5454 = vmatprep.subr.bf16.mxu1 %v6205_v9  ;;  %v6221_v25 = vld [vmem:[%s9095_s1 + $0xc8] sm:$0xff]   ;;  %v6225_v29 = vld [vmem:[%s9095_s1 + $0xc0] sm:$0xff]   ;;  %v883_v38 = vld [vmem:[%s7420_s8 + $0x10] sm:$0xff] }
  0xf9   : > { %v6222_v26 = vld [vmem:[%s9095_s1 + $0x8] sm:$0xff]   ;;  %v6226_v30 = vld [vmem:[%s9095_s1] sm:$0xff]   ;;  %v888_v45 = vld [vmem:[%s7420_s8 + $0x38] sm:$0xff] }
  0xfa   : > { %5391 = vmatpush3.bf16.msra.mxu0 %v6206_v10  ;;  %v6223_v27 = vld [vmem:[%s9095_s1 + $0x88] sm:$0xff]   ;;  %v6227_v31 = vld [vmem:[%s9095_s1 + $0x80] sm:$0xff]   ;;  %v887_v51 = vld [vmem:[%s7420_s8 + $0x30] sm:$0xff] }
  0xfb   : > { %5455 = vmatpush3.bf16.msra.mxu1 %v6207_v11  ;;  %5392 = vmatprep.subr.bf16.mxu0 %v6208_v12  ;;  %v882_v32 = vld [vmem:[%s7420_s8 + $0x8] sm:$0xff]  ;;  %v881_v37 = vld [vmem:[%s7420_s8] sm:$0xff]  ;;  %v892_v55 = vld [vmem:[%s7420_s8 + $0x58] sm:$0xff] }
  0xfc   : > { %5456 = vmatprep.subr.bf16.mxu1 %v6209_v13  ;;  %v962_v35 = vpack.c.bf16 %v884_v33, %v882_v32  ;;  %v961_v40 = vpack.c.bf16 %v883_v38, %v881_v37  ;;  %v886_v43 = vld [vmem:[%s7420_s8 + $0x28] sm:$0xff]  ;;  %v885_v50 = vld [vmem:[%s7420_s8 + $0x20] sm:$0xff]  ;;  %v891_v63 = vld [vmem:[%s7420_s8 + $0x50] sm:$0xff] }
  0xfd   : > { %v964_v48 = vpack.c.bf16 %v888_v45, %v886_v43  ;;  %v890_v54 = vld [vmem:[%s7420_s8 + $0x48] sm:$0xff]  ;;  %v963_v58 = vpack.c.bf16 %v887_v51, %v885_v50  ;;  %v889_v62 = vld [vmem:[%s7420_s8 + $0x40] sm:$0xff]  ;;  %v923_v1 = vld [vmem:[%s7296_s9 + $0x50] sm:$0xff] }
  0xfe   : > { %5393 = vmatpush3.bf16.msra.mxu0 %v6210_v14  ;;  %1272 = vmatprep.mubr.bf16.mxu0 %v962_v35  ;;  %v966_v60 = vpack.c.bf16 %v892_v55, %v890_v54  ;;  %v921_v0 = vld [vmem:[%s7296_s9 + $0x40] sm:$0xff]  ;;  %v894_v2 = vld [vmem:[%s7420_s8 + $0x68] sm:$0xff]  ;;  %v896_v3 = vld [vmem:[%s7420_s8 + $0x78] sm:$0xff]  ;;  %v965_v6 = vpack.c.bf16 %v891_v63, %v889_v62 }
  0xff   : > { %5457 = vmatpush3.bf16.msra.mxu1 %v6211_v15  ;;  %5394 = vmatprep.subr.bf16.mxu0 %v6212_v16  ;;  %v926_v4 = vld [vmem:[%s7296_s9 + $0x68] sm:$0xff]  ;;  %v928_v5 = vld [vmem:[%s7296_s9 + $0x78] sm:$0xff]  ;;  %v7471_v7 = vpack.c.bf16 %v923_v1, %v921_v0  ;;  %v968_v8 = vpack.c.bf16 %v896_v3, %v894_v2  ;;  %v893_v10 = vld [vmem:[%s7420_s8 + $0x60] sm:$0xff] }
 0x100   : > { %5458 = vmatprep.subr.bf16.mxu1 %v6213_v17  ;;  %v7473_v9 = vpack.c.bf16 %v928_v5, %v926_v4  ;;  %v895_v11 = vld [vmem:[%s7420_s8 + $0x70] sm:$0xff]  ;;  %v925_v12 = vld [vmem:[%s7296_s9 + $0x60] sm:$0xff]  ;;  %v898_v14 = vld [vmem:[%s7420_s8 + $0x88] sm:$0xff] }
 0x101   : > { %v927_v13 = vld [vmem:[%s7296_s9 + $0x70] sm:$0xff]  ;;  %v900_v15 = vld [vmem:[%s7420_s8 + $0x98] sm:$0xff]  ;;  %v930_v16 = vld [vmem:[%s7296_s9 + $0x88] sm:$0xff] }
 0x102   : > { %5395 = vmatpush3.bf16.msra.mxu0 %v6214_v18  ;;  %v932_v17 = vld [vmem:[%s7296_s9 + $0x98] sm:$0xff]  ;;  %v902_v32 = vld [vmem:[%s7420_s8 + $0xa8] sm:$0xff]  ;;  %v6235_v36 = vld [vmem:[%s9097_s14 + $0xb0] sm:$0xff]  }
 0x103   : > { %5459 = vmatpush3.bf16.msra.mxu1 %v6215_v19  ;;  %5396 = vmatprep.subr.bf16.mxu0 %v6216_v20  ;;  %v6228_v18 = vld [vmem:[%s9097_s14 + $0x78] sm:$0xff]   ;;  %v967_v20 = vpack.c.bf16 %v895_v11, %v893_v10  ;;  %v6234_v37 = vld [vmem:[%s9097_s14 + $0x28] sm:$0xff]   ;;  %v6236_v38 = vld [vmem:[%s9097_s14 + $0x60] sm:$0xff]  }
 0x104   : > { %5460 = vmatprep.subr.bf16.mxu1 %v6217_v21  ;;  %v6229_v19 = vld [vmem:[%s9097_s14 + $0x38] sm:$0xff]   ;;  %v6230_v21 = vld [vmem:[%s9097_s14 + $0x70] sm:$0xff]   ;;  %v6238_v41 = vld [vmem:[%s9097_s14 + $0xa8] sm:$0xff]  }
 0x105   : > { %v904_v33 = vld [vmem:[%s7420_s8 + $0xb8] sm:$0xff]  ;;  %v6237_v46 = vld [vmem:[%s9097_s14 + $0x20] sm:$0xff]   ;;  %v906_v53 = vld [vmem:[%s7420_s8 + $0xc8] sm:$0xff] }
 0x106   : > { %5397 = vmatpush3.bf16.msra.mxu0 %v6218_v22  ;;  %v7494_v22 = vpack.c.bf16 %v927_v13, %v925_v12  ;;  %v936_v35 = vld [vmem:[%s7296_s9 + $0xb8] sm:$0xff]  ;;  %v972_v43 = vpack.c.bf16 %v904_v33, %v902_v32  ;;  %v901_v47 = vld [vmem:[%s7420_s8 + $0xa0] sm:$0xff]  ;;  %v6243_v0 = vld [vmem:[%s9097_s14 + $0x10] sm:$0xff]  }
 0x107   : > { %5461 = vmatpush3.bf16.msra.mxu1 %v6219_v23  ;;  %5398 = vmatprep.subr.bf16.mxu0 %v6220_v24  ;;  %v970_v23 = vpack.c.bf16 %v900_v15, %v898_v14  ;;  %v6231_v24 = vld [vmem:[%s9097_s14 + $0x30] sm:$0xff]   ;;  %v7531_v45 = vpack.c.bf16 %v936_v35, %v934_v34  ;;  %v6239_v50 = vld [vmem:[%s9097_s14 + $0x58] sm:$0xff]   ;;  %v933_v51 = vld [vmem:[%s7296_s9 + $0xa0] sm:$0xff] }
 0x108   : > { %5462 = vmatprep.subr.bf16.mxu1 %v6221_v25  ;;  %v7499_v25 = vpack.c.bf16 %v932_v17, %v930_v16  ;;  %v908_v54 = vld [vmem:[%s7420_s8 + $0xd8] sm:$0xff]  ;;  %v6241_v56 = vld [vmem:[%s9097_s14 + $0xa0] sm:$0xff]   ;;  %v7564_v1 = vpack.c.bf16 %v935_v52, %v933_v51  ;;  %v907_v5 = vld [vmem:[%s7420_s8 + $0xd0] sm:$0xff] }
 0x109   : > { %9098 = vst [vmem:[#allocation31_spill] sm:$0xff] %v7531_v45  ;;  %v6240_v55 = vld [vmem:[%s9097_s14 + $0x18] sm:$0xff]   ;;  %v974_v2 = vpack.c.bf16 %v908_v54, %v906_v53  ;;  %v905_v4 = vld [vmem:[%s7420_s8 + $0xc0] sm:$0xff]  ;;  %v910_v10 = vld [vmem:[%s7420_s8 + $0xe8] sm:$0xff] }
 0x10a   : > { %5399 = vmatpush3.bf16.msra.mxu0 %v6222_v26  ;;  %v6232_v26 = vld [vmem:[%s9097_s14 + $0xb8] sm:$0xff]   ;;  %9099 = vst [vmem:[#allocation32_spill] sm:$0xff] %v7564_v1  ;;  %v942_v12 = vld [vmem:[%s7296_s9 + $0xe8] sm:$0xff]  ;;  %v973_v14 = vpack.c.bf16 %v907_v5, %v905_v4  ;;  %v6251_v32 = vld [vmem:[%s9097_s14 + $0x80] sm:$0xff]  }
 0x10b   : > { %5463 = vmatpush3.bf16.msra.mxu1 %v6223_v27  ;;  %5400 = vmatprep.subr.bf16.mxu0 %v6224_v28  ;;  %v897_v27 = vld [vmem:[%s7420_s8 + $0x80] sm:$0xff]  ;;  %v899_v28 = vld [vmem:[%s7420_s8 + $0x90] sm:$0xff]  ;;  %v6244_v62 = vld [vmem:[%s9097_s14 + $0x98] sm:$0xff]  }
 0x10c   : > { %5464 = vmatprep.subr.bf16.mxu1 %v6225_v29  ;;  %v6233_v29 = vld [vmem:[%s9097_s14 + $0x68] sm:$0xff]   ;;  %v912_v11 = vld [vmem:[%s7420_s8 + $0xf8] sm:$0xff]  ;;  %v7664_v53 = vld [vmem:[#allocation5] ss:$0 sm:$0xff] }
 0x10d   : > { %v944_v13 = vld [vmem:[%s7296_s9 + $0xf8] sm:$0xff]  ;;  %v976_v16 = vpack.c.bf16 %v912_v11, %v910_v10 }
 0x10e   : > { %5401 = vmatpush3.bf16.msra.mxu0 %v6226_v30  ;;  %v929_v30 = vld [vmem:[%s7296_s9 + $0x80] sm:$0xff]  ;;  %v7580_v17 = vpack.c.bf16 %v944_v13, %v942_v12  ;;  %v7625_v33 = vld [vmem:[%s9104_s11 + $0x18] sm:$0xff]  }
 0x10f   : > { %5465 = vmatpush3.bf16.msra.mxu1 %v6227_v31  ;;  %5514 = vmatprep.subr.bf16.mxu0 %v6228_v18  ;;  %v931_v31 = vld [vmem:[%s7296_s9 + $0x90] sm:$0xff]  ;;  %v909_v18 = vld [vmem:[%s7420_s8 + $0xe0] sm:$0xff]  ;;  %v6254_v34 = vld [vmem:[%s8923_s7 + $0x78] sm:$0xff]  }
 0x110   : > { %5894 = vmatprep.subr.bf16.mxu1 %v6232_v26  ;;  %v7529_v42 = vpack.c.bf16 %v931_v31, %v929_v30  ;;  %9102 = vst [vmem:[#allocation35_spill] sm:$0xff] %v7580_v17  ;;  %v6250_v30 = vld [vmem:[%s9097_s14 + $0x88] sm:$0xff]   ;;  %v6249_v31 = vld [vmem:[%s9097_s14] sm:$0xff]   ;;  %v6255_v35 = vld [vmem:[%s8923_s7 + $0x38] sm:$0xff]  }
 0x111   : > { %1273 = vmatmul.mubr.bf16.vlgmr.msra.gmra.mxu0 %v961_v40  ;;  %v969_v40 = vpack.c.bf16 %v899_v28, %v897_v27  ;;  %v6246_v27 = vld [vmem:[%s9097_s14 + $0x8] sm:$0xff]   ;;  %v6247_v28 = vld [vmem:[%s9097_s14 + $0x90] sm:$0xff]  }
 0x112   : > { %1370 = vmatmul.mubr.bf16.vlgmr.msra.gmra.mxu1 %v7439_v44  ;;  %1280 = vmatprep.mubr.bf16.mxu0 %v964_v48  ;;  %v903_v48 = vld [vmem:[%s7420_s8 + $0xb0] sm:$0xff] }
 0x113   : > { %1377 = vmatprep.mubr.bf16.mxu1 %v7445_v49  ;;  %5515 = vmatpush3.bf16.msra.mxu0 %v6229_v19  ;;  %v971_v63 = vpack.c.bf16 %v903_v48, %v901_v47  ;;  %v911_v19 = vld [vmem:[%s7420_s8 + $0xf0] sm:$0xff]  ;;  %v6264_v47 = vld [vmem:[%s8923_s7 + $0x18] sm:$0xff]  }
 0x114   : > { %5516 = vmatprep.subr.bf16.mxu0 %v6230_v21  ;;  %5895 = vmatpush3.bf16.msra.mxu1 %v6232_v26  ;;  %v943_v21 = vld [vmem:[%s7296_s9 + $0xf0] sm:$0xff]  ;;  %v6245_v26 = vld [vmem:[%s9097_s14 + $0x48] sm:$0xff]  }
 0x115   : > { %5896 = vmatprep.subr.bf16.mxu1 %v6235_v36  ;;  %v6265_v48 = vld [vmem:[%s8923_s7 + $0x50] sm:$0xff]  }
 0x117   : > { %5517 = vmatpush3.bf16.msra.mxu0 %v6231_v24 }
 0x118   : > { %5518 = vmatprep.subr.bf16.mxu0 %v6233_v29  ;;  %5897 = vmatpush3.bf16.msra.mxu1 %v6235_v36  ;;  %v6248_v29 = vld [vmem:[%s9097_s14 + $0x40] sm:$0xff]   ;;  %v6256_v36 = vld [vmem:[%s8923_s7 + $0x70] sm:$0xff]  }
 0x119   : > { %1281 = vmatmul.mubr.bf16.gmra.mxu0 %v963_v58  ;;  %5898 = vmatprep.subr.bf16.mxu1 %v6238_v41  ;;  %v940_v58 = vld [vmem:[%s7296_s9 + $0xd8] sm:$0xff] }
 0x11a   : > { %1378 = vmatmul.mubr.bf16.gmra.mxu1 %v7457_v59  ;;  %1288 = vmatprep.mubr.bf16.mxu0 %v966_v60  ;;  %v6242_v60 = vld [vmem:[%s9097_s14 + $0x50] sm:$0xff]   ;;  %v7566_v3 = vpack.c.bf16 %v940_v58, %v938_v57 }
 0x11b   : > { %1385 = vmatprep.mubr.bf16.mxu1 %v7459_v61  ;;  %5519 = vmatpush3.bf16.msra.mxu0 %v6234_v37  ;;  %v6257_v37 = vld [vmem:[%s8923_s7 + $0x30] sm:$0xff]  }
 0x11c   : > { %5520 = vmatprep.subr.bf16.mxu0 %v6236_v38  ;;  %5899 = vmatpush3.bf16.msra.mxu1 %v6238_v41  ;;  %9100 = vst [vmem:[#allocation33_spill] sm:$0xff] %v7566_v3  ;;  %v6258_v38 = vld [vmem:[%s8923_s7 + $0x68] sm:$0xff]   ;;  %v6260_v41 = vld [vmem:[%s8923_s7 + $0x60] sm:$0xff]  }
 0x11d   : > { %5900 = vmatprep.subr.bf16.mxu1 %v6241_v56 }
 0x11f   : > { %5521 = vmatpush3.bf16.msra.mxu0 %v6237_v46  ;;  %v6263_v46 = vld [vmem:[%s8923_s7 + $0x58] sm:$0xff]  }
 0x120   : > { %5522 = vmatprep.subr.bf16.mxu0 %v6239_v50  ;;  %5901 = vmatpush3.bf16.msra.mxu1 %v6241_v56  ;;  %v6266_v50 = vld [vmem:[%s8923_s7 + $0x10] sm:$0xff]  }
 0x121   : > { %1289 = vmatmul.mubr.bf16.gmra.mxu0 %v965_v6  ;;  %v937_v6 = vld [vmem:[%s7296_s9 + $0xc0] sm:$0xff]  ;;  %5902 = vmatprep.subr.bf16.mxu1 %v6244_v62 }
 0x122   : > { %1386 = vmatmul.mubr.bf16.gmra.mxu1 %v7471_v7  ;;  %1296 = vmatprep.mubr.bf16.mxu0 %v968_v8  ;;  %v939_v8 = vld [vmem:[%s7296_s9 + $0xd0] sm:$0xff] }
 0x123   : > { %1393 = vmatprep.mubr.bf16.mxu1 %v7473_v9  ;;  %5523 = vmatpush3.bf16.msra.mxu0 %v6240_v55  ;;  %v7578_v15 = vpack.c.bf16 %v939_v8, %v937_v6 }
 0x124   : > { %5524 = vmatprep.subr.bf16.mxu0 %v6242_v60  ;;  %5903 = vmatpush3.bf16.msra.mxu1 %v6244_v62 }
 0x125   : > { %9101 = vst [vmem:[#allocation34_spill] sm:$0xff] %v7578_v15  ;;  %5904 = vmatprep.subr.bf16.mxu1 %v6247_v28 }
 0x127   : > { %5525 = vmatpush3.bf16.msra.mxu0 %v6243_v0 }
 0x128   : > { %5526 = vmatprep.subr.bf16.mxu0 %v6245_v26  ;;  %5905 = vmatpush3.bf16.msra.mxu1 %v6247_v28 }
 0x129   : > { %1297 = vmatmul.mubr.bf16.gmra.mxu0 %v967_v20  ;;  %v941_v20 = vld [vmem:[%s7296_s9 + $0xe0] sm:$0xff]  ;;  %5906 = vmatprep.subr.bf16.mxu1 %v6250_v30  ;;  %s9226_s9 = sld [smem:[#allocation85_spill]] }
 0x12a   : > { %1394 = vmatmul.mubr.bf16.gmra.mxu1 %v7494_v22  ;;  %1304 = vmatprep.mubr.bf16.mxu0 %v970_v23  ;;  %v975_v23 = vpack.c.bf16 %v911_v19, %v909_v18  ;;  %v7588_v24 = vpack.c.bf16 %v943_v21, %v941_v20 }
 0x12b   : > { %1401 = vmatprep.mubr.bf16.mxu1 %v7499_v25  ;;  %5527 = vmatpush3.bf16.msra.mxu0 %v6246_v27 }
 0x12c   : > { %9103 = vst [vmem:[#allocation36_spill] sm:$0xff] %v7588_v24  ;;  %5528 = vmatprep.subr.bf16.mxu0 %v6248_v29  ;;  %5907 = vmatpush3.bf16.msra.mxu1 %v6250_v30  ;;  %v6253_v30 = vld [vmem:[%s9104_s11 + $0x10] sm:$0xff]  }
 0x12d   : > { %5908 = vmatprep.subr.bf16.mxu1 %v6251_v32 }
 0x12f   : > { %5529 = vmatpush3.bf16.msra.mxu0 %v6249_v31 }
 0x130   : > { %5909 = vmatpush3.bf16.msra.mxu1 %v6251_v32  ;;  %5926 = vmatprep.subr.bf16.mxu0 %v7625_v33 }
 0x131   : > { %1305 = vmatmul.mubr.bf16.gmra.mxu0 %v969_v40  ;;  %5594 = vmatprep.subr.bf16.mxu1 %v6254_v34  ;;  %v6259_v40 = vld [vmem:[%s8923_s7 + $0x28] sm:$0xff]  }
 0x132   : > { %1402 = vmatmul.mubr.bf16.gmra.mxu1 %v7529_v42  ;;  %1312 = vmatprep.mubr.bf16.mxu0 %v972_v43  ;;  %v6261_v43 = vld [vmem:[%s8923_s7 + $0x20] sm:$0xff]  }
 0x133   : > { %1409 = vmatprep.mubr.bf16.mxu1 %v7531_v45 }
 0x139   : > { %1313 = vmatmul.mubr.bf16.gmra.mxu0 %v971_v63 }
 0x13a   : > { %1410 = vmatmul.mubr.bf16.gmra.mxu1 %v7564_v1  ;;  %1320 = vmatprep.mubr.bf16.mxu0 %v974_v2 }
 0x13b   : > { %1417 = vmatprep.mubr.bf16.mxu1 %v7566_v3 }
 0x141   : > { %1321 = vmatmul.mubr.bf16.gmra.mxu0 %v973_v14 }
 0x142   : > { %1418 = vmatmul.mubr.bf16.gmra.mxu1 %v7578_v15  ;;  %1328 = vmatprep.mubr.bf16.mxu0 %v976_v16 }
 0x143   : > { %1425 = vmatprep.mubr.bf16.mxu1 %v7580_v17 }
 0x149   : > { %1329 = vmatmul.mubr.bf16.gmra.mxu0 %v975_v23 }
 0x14a   : > { %1426 = vmatmul.mubr.bf16.gmra.mxu1 %v7588_v24  ;;  %1689 = vmatprep.mubr.bf16.mxu0 %v7439_v44 }
 0x14b   : > { %5910 = vmatprep.mubr.bf16.mxu1 %v7434_v39 }
 0x152   : > { %5911 = vmatmul.mubr.bf16.vlgmr.msra.gmra.mxu1 %v7445_v49 }
 0x153   : > { %5914 = vmatprep.mubr.bf16.mxu1 %v7459_v61  ;;  %5595 = vmatpush3.bf16.msra.mxu1 %v6255_v35 }
 0x154   : > { %5596 = vmatprep.subr.bf16.mxu1 %v6256_v36 }
 0x157   : > { %5597 = vmatpush3.bf16.msra.mxu1 %v6257_v37 }
 0x158   : > { %5598 = vmatprep.subr.bf16.mxu1 %v6258_v38 }
 0x15a   : > { %5915 = vmatmul.mubr.bf16.gmra.mxu1 %v7473_v9 }
 0x15b   : > { %5918 = vmatprep.mubr.bf16.mxu1 %v7499_v25  ;;  %5599 = vmatpush3.bf16.msra.mxu1 %v6259_v40 }
 0x15c   : > { %5600 = vmatprep.subr.bf16.mxu1 %v6260_v41 }
 0x15f   : > { %5601 = vmatpush3.bf16.msra.mxu1 %v6261_v43  ;;  %v6262_v43 = vld [vmem:[%s9104_s11 + $0x8] sm:$0xff]  }
 0x160   : > { %5602 = vmatprep.subr.bf16.mxu1 %v6263_v46 }
 0x162   : > { %5919 = vmatmul.mubr.bf16.gmra.mxu1 %v7531_v45 }
 0x163   : > { %5922 = vmatprep.mubr.bf16.mxu1 %v7566_v3  ;;  %5603 = vmatpush3.bf16.msra.mxu1 %v6264_v47 }
 0x164   : > { %5604 = vmatprep.subr.bf16.mxu1 %v6265_v48 }
 0x167   : > { %5605 = vmatpush3.bf16.msra.mxu1 %v6266_v50 }
 0x16a   : > { %5923 = vmatmul.mubr.bf16.gmra.mxu1 %v7580_v17 }
 0x16b   : > { %2043 = vmatprep.mubr.bf16.mxu1 %v7434_v39 }
 0x1d1   : > { %v5402_v51 = vpop.f32.mrf.mxu0 }
 0x1d2   : > { %v5466_v52 = vpop.f32.mrf.mxu1 }
 0x1d3   : > { %v5403_v54 = vpop.f32.mrf.mxu0 }
 0x1d4   : > { %v5404_v55 = vadd.f32 %v5403_v54, %v5402_v51  ;;  %v5467_v56 = vpop.f32.mrf.mxu1 }
 0x1d5   : > { %v5405_v57 = vpop.f32.mrf.mxu0  ;;  %v5468_v63 = vadd.f32 %v5467_v56, %v5466_v52 }
 0x1d6   : > { %v1275_v58 = vadd.f32 %v5404_v55, %v7664_v53  ;;  %v5469_v60 = vpop.f32.mrf.mxu1 }
 0x1d7   : > { %v5406_v62 = vpop.f32.mrf.mxu0 }
 0x1d8   : > { %v5407_v0 = vadd.f32 %v5406_v62, %v5405_v57  ;;  %v5470_v2 = vpop.f32.mrf.mxu1  ;;  %v7667_v5 = vadd.f32 %v5468_v63, %v1275_v58 }
 0x1d9   : > { %v5408_v4 = vpop.f32.mrf.mxu0  ;;  %v5471_v8 = vadd.f32 %v5470_v2, %v5469_v60 }
 0x1da   : > { %9105 = vst [vmem:[#allocation37_spill] sm:$0xff] %v7667_v5  ;;  %v1278_v6 = vadd.f32 %v5407_v0, %v7664_v53  ;;  %v5472_v10 = vpop.f32.mrf.mxu1  ;;  %v8968_v18 = vmax.f32 %v7667_v5, 0.0  ;;  %v6303_v5 = vld [vmem:[#allocation13] sm:$0xff]  }
 0x1db   : > { %v5409_v11 = vpop.f32.mrf.mxu0 }
 0x1dc   : > { %v7670_v12 = vadd.f32 %v5471_v8, %v1278_v6  ;;  %v5410_v13 = vadd.f32 %v5409_v11, %v5408_v4  ;;  %v5473_v14 = vpop.f32.mrf.mxu1 }
 0x1dd   : > { %v5411_v16 = vpop.f32.mrf.mxu0  ;;  %v5474_v27 = vadd.f32 %v5473_v14, %v5472_v10 }
 0x1de   : > { %9106 = vst [vmem:[#allocation38_spill] sm:$0xff] %v7670_v12  ;;  %v8967_v19 = vmax.f32 %v7670_v12, 0.0  ;;  %v1283_v20 = vadd.f32 %v5410_v13, %v7664_v53  ;;  %v5475_v21 = vpop.f32.mrf.mxu1 }
 0x1df   : > { %v5412_v23 = vpop.f32.mrf.mxu0 }
 0x1e0   : > { %v1450_v26 = vpack.c.bf16 %v8967_v19, %v8968_v18  ;;  %v5413_v28 = vadd.f32 %v5412_v23, %v5411_v16  ;;  %v5476_v29 = vpop.f32.mrf.mxu1  ;;  %v7682_v32 = vadd.f32 %v5474_v27, %v1283_v20 }
 0x1e1   : > { %v5414_v31 = vpop.f32.mrf.mxu0  ;;  %v5477_v35 = vadd.f32 %v5476_v29, %v5475_v21 }
 0x1e2   : > { %9107 = vst [vmem:[#allocation39_spill] sm:$0xff] %v7682_v32  ;;  %v1286_v34 = vadd.f32 %v5413_v28, %v7664_v53  ;;  %v5478_v36 = vpop.f32.mrf.mxu1  ;;  %1690 = vmatmul.mubr.bf16.vlgmr.msra.gmra.mxu0 %v1450_v26  ;;  %v8965_v47 = vmax.f32 %v7682_v32, 0.0  ;;  %v6290_v32 = vld [vmem:[#allocation13 + $0x8] sm:$0xff]  }
 0x1e3   : > { %v5415_v37 = vpop.f32.mrf.mxu0  ;;  %1697 = vmatprep.mubr.bf16.mxu0 %v7457_v59  ;;  %5927 = vmatpush3.bf16.msra.mxu0 %v7625_v33 }
 0x1e4   : > { %v7687_v38 = vadd.f32 %v5477_v35, %v1286_v34  ;;  %v5416_v40 = vadd.f32 %v5415_v37, %v5414_v31  ;;  %v5479_v41 = vpop.f32.mrf.mxu1  ;;  %5928 = vmatprep.subr.bf16.mxu0 %v6253_v30 }
 0x1e5   : > { %v5417_v46 = vpop.f32.mrf.mxu0  ;;  %v5480_v33 = vadd.f32 %v5479_v41, %v5478_v36 }
 0x1e6   : > { %9108 = vst [vmem:[#allocation40_spill] sm:$0xff] %v7687_v38  ;;  %v8966_v48 = vmax.f32 %v7687_v38, 0.0  ;;  %v1291_v50 = vadd.f32 %v5416_v40, %v7664_v53  ;;  %v5481_v51 = vpop.f32.mrf.mxu1  ;;  %v6291_v38 = vld [vmem:[%s8929_s13 + $0x78] sm:$0xff]  }
 0x1e7   : > { %v5418_v52 = vpop.f32.mrf.mxu0  ;;  %5929 = vmatpush3.bf16.msra.mxu0 %v6253_v30 }
 0x1e8   : > { %v5419_v54 = vadd.f32 %v5418_v52, %v5417_v46  ;;  %v5482_v55 = vpop.f32.mrf.mxu1  ;;  %v1451_v56 = vpack.c.bf16 %v8966_v48, %v8965_v47  ;;  %5930 = vmatprep.subr.bf16.mxu0 %v6262_v43  ;;  %v7699_v58 = vadd.f32 %v5480_v33, %v1291_v50 }
 0x1e9   : > { %v5420_v57 = vpop.f32.mrf.mxu0  ;;  %v5483_v62 = vadd.f32 %v5482_v55, %v5481_v51 }
 0x1ea   : > { %9109 = vst [vmem:[#allocation41_spill] sm:$0xff] %v7699_v58  ;;  %v1294_v60 = vadd.f32 %v5419_v54, %v7664_v53  ;;  %v5484_v63 = vpop.f32.mrf.mxu1  ;;  %1698 = vmatmul.mubr.bf16.gmra.mxu0 %v1451_v56  ;;  %v8964_v10 = vmax.f32 %v7699_v58, 0.0 }
 0x1eb   : > { %v5421_v0 = vpop.f32.mrf.mxu0  ;;  %1705 = vmatprep.mubr.bf16.mxu0 %v7471_v7  ;;  %5931 = vmatpush3.bf16.msra.mxu0 %v6262_v43 }
 0x1ec   : > { %v7703_v2 = vadd.f32 %v5483_v62, %v1294_v60  ;;  %v5422_v4 = vadd.f32 %v5421_v0, %v5420_v57  ;;  %v5485_v6 = vpop.f32.mrf.mxu1 }
 0x1ed   : > { %v5423_v8 = vpop.f32.mrf.mxu0  ;;  %v5486_v20 = vadd.f32 %v5485_v6, %v5484_v63 }
 0x1ee   : > { %9110 = vst [vmem:[#allocation42_spill] sm:$0xff] %v7703_v2  ;;  %v8963_v11 = vmax.f32 %v7703_v2, 0.0  ;;  %v1299_v13 = vadd.f32 %v5422_v4, %v7664_v53  ;;  %v5487_v14 = vpop.f32.mrf.mxu1 }
 0x1ef   : > { %v5424_v16 = vpop.f32.mrf.mxu0 }
 0x1f0   : > { %v5425_v21 = vadd.f32 %v5424_v16, %v5423_v8  ;;  %v5488_v23 = vpop.f32.mrf.mxu1  ;;  %v1452_v26 = vpack.c.bf16 %v8963_v11, %v8964_v10  ;;  %v7712_v28 = vadd.f32 %v5486_v20, %v1299_v13 }
 0x1f1   : > { %v5426_v27 = vpop.f32.mrf.mxu0  ;;  %v5489_v30 = vadd.f32 %v5488_v23, %v5487_v14 }
 0x1f2   : > { %9111 = vst [vmem:[#allocation43_spill] sm:$0xff] %v7712_v28  ;;  %v1302_v29 = vadd.f32 %v5425_v21, %v7664_v53  ;;  %v5490_v31 = vpop.f32.mrf.mxu1  ;;  %1706 = vmatmul.mubr.bf16.gmra.mxu0 %v1452_v26  ;;  %v8961_v41 = vmax.f32 %v7712_v28, 0.0 }
 0x1f3   : > { %v5427_v34 = vpop.f32.mrf.mxu0  ;;  %1713 = vmatprep.mubr.bf16.mxu0 %v7494_v22 }
 0x1f4   : > { %v7716_v35 = vadd.f32 %v5489_v30, %v1302_v29  ;;  %v5428_v36 = vadd.f32 %v5427_v34, %v5426_v27  ;;  %v5491_v37 = vpop.f32.mrf.mxu1 }
 0x1f5   : > { %v5429_v40 = vpop.f32.mrf.mxu0  ;;  %v5492_v52 = vadd.f32 %v5491_v37, %v5490_v31 }
 0x1f6   : > { %9112 = vst [vmem:[#allocation44_spill] sm:$0xff] %v7716_v35  ;;  %v8962_v43 = vmax.f32 %v7716_v35, 0.0  ;;  %v1307_v46 = vadd.f32 %v5428_v36, %v7664_v53  ;;  %v5493_v50 = vpop.f32.mrf.mxu1 }
 0x1f7   : > { %v5430_v51 = vpop.f32.mrf.mxu0 }
 0x1f8   : > { %v5431_v33 = vadd.f32 %v5430_v51, %v5429_v40  ;;  %v5494_v54 = vpop.f32.mrf.mxu1  ;;  %v1453_v55 = vpack.c.bf16 %v8962_v43, %v8961_v41  ;;  %v7725_v57 = vadd.f32 %v5492_v52, %v1307_v46 }
 0x1f9   : > { %v5432_v56 = vpop.f32.mrf.mxu0  ;;  %v5495_v62 = vadd.f32 %v5494_v54, %v5493_v50 }
 0x1fa   : > { %9113 = vst [vmem:[#allocation45_spill] sm:$0xff] %v7725_v57  ;;  %v1310_v60 = vadd.f32 %v5431_v33, %v7664_v53  ;;  %v5496_v63 = vpop.f32.mrf.mxu1  ;;  %1714 = vmatmul.mubr.bf16.gmra.mxu0 %v1453_v55  ;;  %v8960_v14 = vmax.f32 %v7725_v57, 0.0 }
 0x1fb   : > { %v5433_v0 = vpop.f32.mrf.mxu0  ;;  %1721 = vmatprep.mubr.bf16.mxu0 %v7529_v42 }
 0x1fc   : > { %v7729_v4 = vadd.f32 %v5495_v62, %v1310_v60  ;;  %v5434_v6 = vadd.f32 %v5433_v0, %v5432_v56  ;;  %v5497_v8 = vpop.f32.mrf.mxu1 }
 0x1fd   : > { %v5435_v13 = vpop.f32.mrf.mxu0  ;;  %v5498_v26 = vadd.f32 %v5497_v8, %v5496_v63 }
 0x1fe   : > { %9114 = vst [vmem:[#allocation46_spill] sm:$0xff] %v7729_v4  ;;  %v8959_v16 = vmax.f32 %v7729_v4, 0.0  ;;  %v1315_v20 = vadd.f32 %v5434_v6, %v7664_v53  ;;  %v5499_v21 = vpop.f32.mrf.mxu1 }
 0x1ff   : > { %v5436_v23 = vpop.f32.mrf.mxu0 }
 0x200   : > { %v5437_v27 = vadd.f32 %v5436_v23, %v5435_v13  ;;  %v5500_v29 = vpop.f32.mrf.mxu1  ;;  %v1454_v30 = vpack.c.bf16 %v8959_v16, %v8960_v14  ;;  %v7738_v34 = vadd.f32 %v5498_v26, %v1315_v20 }
 0x201   : > { %v5438_v31 = vpop.f32.mrf.mxu0  ;;  %v5501_v37 = vadd.f32 %v5500_v29, %v5499_v21 }
 0x202   : > { %9115 = vst [vmem:[#allocation47_spill] sm:$0xff] %v7738_v34  ;;  %v1318_v36 = vadd.f32 %v5437_v27, %v7664_v53  ;;  %v5502_v40 = vpop.f32.mrf.mxu1  ;;  %1722 = vmatmul.mubr.bf16.gmra.mxu0 %v1454_v30  ;;  %v8957_v54 = vmax.f32 %v7738_v34, 0.0 }
 0x203   : > { %v5439_v46 = vpop.f32.mrf.mxu0  ;;  %1729 = vmatprep.mubr.bf16.mxu0 %v7564_v1 }
 0x204   : > { %v7742_v50 = vadd.f32 %v5501_v37, %v1318_v36  ;;  %v5440_v51 = vadd.f32 %v5439_v46, %v5438_v31  ;;  %v5503_v52 = vpop.f32.mrf.mxu1 }
 0x205   : > { %v5441_v33 = vpop.f32.mrf.mxu0  ;;  %v5504_v63 = vadd.f32 %v5503_v52, %v5502_v40 }
 0x206   : > { %9116 = vst [vmem:[#allocation48_spill] sm:$0xff] %v7742_v50  ;;  %v8958_v55 = vmax.f32 %v7742_v50, 0.0  ;;  %v1323_v56 = vadd.f32 %v5440_v51, %v7664_v53  ;;  %v5505_v60 = vpop.f32.mrf.mxu1 }
 0x207   : > { %v5442_v62 = vpop.f32.mrf.mxu0 }
 0x208   : > { %v5443_v0 = vadd.f32 %v5442_v62, %v5441_v33  ;;  %v5506_v6 = vpop.f32.mrf.mxu1  ;;  %v1455_v8 = vpack.c.bf16 %v8958_v55, %v8957_v54  ;;  %v7751_v20 = vadd.f32 %v5504_v63, %v1323_v56  ;;  %v7903_v54 = vld [vmem:[#allocation7] ss:$0 sm:$0xff] }
 0x209   : > { %v5444_v13 = vpop.f32.mrf.mxu0  ;;  %v5507_v23 = vadd.f32 %v5506_v6, %v5505_v60 }
 0x20a   : > { %9117 = vst [vmem:[#allocation49_spill] sm:$0xff] %v7751_v20  ;;  %v1326_v21 = vadd.f32 %v5443_v0, %v7664_v53  ;;  %v5508_v26 = vpop.f32.mrf.mxu1  ;;  %1730 = vmatmul.mubr.bf16.gmra.mxu0 %v1455_v8  ;;  %v8956_v37 = vmax.f32 %v7751_v20, 0.0 }
 0x20b   : > { %v5445_v27 = vpop.f32.mrf.mxu0  ;;  %1737 = vmatprep.mubr.bf16.mxu0 %v7578_v15 }
 0x20c   : > { %v7755_v29 = vadd.f32 %v5507_v23, %v1326_v21  ;;  %v5446_v30 = vadd.f32 %v5445_v27, %v5444_v13  ;;  %v5509_v31 = vpop.f32.mrf.mxu1  ;;  %v6269_v27 = vld [vmem:[%s8923_s7 + $0x40] sm:$0xff]  }
 0x20d   : > { %v5447_v36 = vpop.f32.mrf.mxu0  ;;  %v5510_v33 = vadd.f32 %v5509_v31, %v5508_v26  ;;  %v6268_v26 = vld [vmem:[%s8923_s7 + $0x8] sm:$0xff]   ;;  %v6271_v31 = vld [vmem:[%s9104_s11] sm:$0xff]  }
 0x20e   : > { %9118 = vst [vmem:[#allocation50_spill] sm:$0xff] %v7755_v29  ;;  %v8955_v40 = vmax.f32 %v7755_v29, 0.0  ;;  %v1331_v46 = vadd.f32 %v5446_v30, %v7664_v53  ;;  %v5511_v51 = vpop.f32.mrf.mxu1  ;;  %v6270_v30 = vld [vmem:[%s8923_s7] sm:$0xff]   ;;  %5932 = vmatprep.subr.bf16.mxu0 %v6271_v31 }
 0x20f   : > { %v5448_v52 = vpop.f32.mrf.mxu0  ;;  %5933 = vmatpush3.bf16.msra.mxu0 %v6271_v31  ;;  %v7896_v31 = vld [vmem:[%s8926_s10] sm:$0xff]  }
 0x210   : > { %v5449_v56 = vadd.f32 %v5448_v52, %v5447_v36  ;;  %v5512_v60 = vpop.f32.mrf.mxu1  ;;  %v1456_v62 = vpack.c.bf16 %v8955_v40, %v8956_v37  ;;  %v7764_v63 = vadd.f32 %v5510_v33, %v1331_v46  ;;  %v6272_v36 = vld [vmem:[%s8926_s10 + $0x78] sm:$0xff]   ;;  %v7824_v52 = vld [vmem:[%s8926_s10 + $0x30] sm:$0xff]   ;;  %v7830_v33 = vld [vmem:[%s8926_s10 + $0x68] sm:$0xff]  }
 0x211   : > { %v5513_v6 = vadd.f32 %v5512_v60, %v5511_v51  ;;  %v7813_v46 = vld [vmem:[%s8926_s10 + $0x38] sm:$0xff]   ;;  %v7818_v51 = vld [vmem:[%s8926_s10 + $0x70] sm:$0xff]   ;;  %5670 = vmatprep.subr.bf16.mxu0 %v6272_v36  ;;  %v7842_v60 = vld [vmem:[%s8926_s10 + $0x60] sm:$0xff]  }
 0x212   : > { %9119 = vst [vmem:[#allocation51_spill] sm:$0xff] %v7764_v63  ;;  %v1334_v0 = vadd.f32 %v5449_v56, %v7664_v53  ;;  %1738 = vmatmul.mubr.bf16.gmra.mxu0 %v1456_v62  ;;  %v8953_v13 = vmax.f32 %v7764_v63, 0.0  ;;  %v6267_v53 = vld [vmem:[%s8923_s7 + $0x48] sm:$0xff]   ;;  %v7848_v62 = vld [vmem:[%s8926_s10 + $0x20] sm:$0xff]  }
 0x213   : > { %1745 = vmatprep.mubr.bf16.mxu0 %v7588_v24  ;;  %5606 = vmatprep.subr.bf16.mxu1 %v6267_v53  ;;  %v7836_v56 = vld [vmem:[%s8926_s10 + $0x28] sm:$0xff]   ;;  %v7872_v53 = vld [vmem:[%s8926_s10 + $0x10] sm:$0xff]  }
 0x214   : > { %v7768_v8 = vadd.f32 %v5513_v6, %v1334_v0  ;;  %5607 = vmatpush3.bf16.msra.mxu1 %v6268_v26  ;;  %v7854_v0 = vld [vmem:[%s8926_s10 + $0x58] sm:$0xff]   ;;  %v7878_v26 = vld [vmem:[%s8926_s10 + $0x48] sm:$0xff]  }
 0x215   : > { %5608 = vmatprep.subr.bf16.mxu1 %v6269_v27  ;;  %v7860_v6 = vld [vmem:[%s8926_s10 + $0x18] sm:$0xff]   ;;  %v7884_v27 = vld [vmem:[%s8926_s10 + $0x8] sm:$0xff]  }
 0x216   : > { %9120 = vst [vmem:[#allocation52_spill] sm:$0xff] %v7768_v8  ;;  %v8954_v21 = vmax.f32 %v7768_v8, 0.0 }
 0x218   : > { %v1457_v23 = vpack.c.bf16 %v8954_v21, %v8953_v13  ;;  %5609 = vmatpush3.bf16.msra.mxu1 %v6270_v30  ;;  %v7890_v30 = vld [vmem:[%s8926_s10 + $0x40] sm:$0xff]   ;;  %v5912_v13 = vpop.f32.mrf.mxu1 }
 0x219   : > { %6014 = vmatprep.subr.bf16.mxu1 %v6272_v36  ;;  %v6288_v36 = vld [vmem:[#allocation10 + $0x8] sm:$0xff]  }
 0x21a   : > { %1746 = vmatmul.mubr.bf16.gmra.mxu0 %v1457_v23  ;;  %v7866_v23 = vld [vmem:[%s8926_s10 + $0x50] sm:$0xff]   ;;  %v1788_v40 = vpop.f32.mrf.mxu1 }
 0x21b   : > { %2044 = vmatmul.mubr.bf16.vlgmr.msra.gmra.mxu1 %v7439_v44 }
 0x21c   : > { %2051 = vmatprep.mubr.bf16.mxu1 %v7445_v49  ;;  %6022 = vmatpush3.bf16.msra.mxu1 %v7813_v46  ;;  %v5913_v14 = vpop.f32.mrf.mxu1 }
 0x21d   : > { %6015 = vmatprep.subr.bf16.mxu1 %v7818_v51 }
 0x21e   : > { %v1791_v47 = vpop.f32.mrf.mxu1 }
 0x220   : > { %6023 = vmatpush3.bf16.msra.mxu1 %v7824_v52  ;;  %v5916_v29 = vpop.f32.mrf.mxu1 }
 0x221   : > { %6016 = vmatprep.subr.bf16.mxu1 %v7830_v33 }
 0x223   : > { %2052 = vmatmul.mubr.bf16.gmra.mxu1 %v7457_v59 }
 0x224   : > { %2059 = vmatprep.mubr.bf16.mxu1 %v7459_v61  ;;  %6024 = vmatpush3.bf16.msra.mxu1 %v7836_v56 }
 0x225   : > { %6017 = vmatprep.subr.bf16.mxu1 %v7842_v60 }
 0x228   : > { %6025 = vmatpush3.bf16.msra.mxu1 %v7848_v62 }
 0x229   : > { %6018 = vmatprep.subr.bf16.mxu1 %v7854_v0 }
 0x22b   : > { %2060 = vmatmul.mubr.bf16.gmra.mxu1 %v7471_v7 }
 0x22c   : > { %2067 = vmatprep.mubr.bf16.mxu1 %v7473_v9  ;;  %6026 = vmatpush3.bf16.msra.mxu1 %v7860_v6 }
 0x22d   : > { %6019 = vmatprep.subr.bf16.mxu1 %v7866_v23 }
 0x230   : > { %6027 = vmatpush3.bf16.msra.mxu1 %v7872_v53 }
 0x231   : > { %6020 = vmatprep.subr.bf16.mxu1 %v7878_v26 }
 0x233   : > { %2068 = vmatmul.mubr.bf16.gmra.mxu1 %v7494_v22 }
 0x234   : > { %2075 = vmatprep.mubr.bf16.mxu1 %v7499_v25  ;;  %6028 = vmatpush3.bf16.msra.mxu1 %v7884_v27 }
 0x235   : > { %6021 = vmatprep.subr.bf16.mxu1 %v7890_v30 }
 0x238   : > { %6029 = vmatpush3.bf16.msra.mxu1 %v7896_v31 }
 0x239   : > { %5950 = vmatprep.subr.bf16.mxu1 %v6288_v36 }
 0x23b   : > { %2076 = vmatmul.mubr.bf16.gmra.mxu1 %v7529_v42 }
 0x23c   : > { %2083 = vmatprep.mubr.bf16.mxu1 %v7531_v45 }
 0x243   : > { %2084 = vmatmul.mubr.bf16.gmra.mxu1 %v7564_v1 }
 0x244   : > { %2091 = vmatprep.mubr.bf16.mxu1 %v7566_v3 }
 0x24b   : > { %2092 = vmatmul.mubr.bf16.gmra.mxu1 %v7578_v15 }
 0x24c   : > { %2099 = vmatprep.mubr.bf16.mxu1 %v7580_v17 }
 0x253   : > { %2100 = vmatmul.mubr.bf16.gmra.mxu1 %v7588_v24 }
 0x254   : > { %2513 = vmatprep.mubr.bf16.mxu1 %v7566_v3 }
 0x25b   : > { %2514 = vmatmul.mubr.bf16.vlgmr.msra.gmra.mxu1 %v7578_v15 }
 0x25c   : > { %5951 = vmatpush3.bf16.msra.mxu1 %v6288_v36  ;;  %2521 = vmatprep.mubr.bf16.mxu1 %v7580_v17 }
 0x263   : > { %2522 = vmatmul.mubr.bf16.gmra.mxu1 %v7588_v24 }
 0x2a2   : > { %v5530_v21 = vpop.f32.mrf.mxu0 }
 0x2a4   : > { %v5531_v37 = vpop.f32.mrf.mxu0 }
 0x2a5   : > { %v5532_v55 = vadd.f32 %v5531_v37, %v5530_v21 }
 0x2a6   : > { %v5533_v16 = vpop.f32.mrf.mxu0 }
 0x2a7   : > { %v1692_v41 = vadd.f32 %v5532_v55, %v7903_v54 }
 0x2a8   : > { %v5534_v43 = vpop.f32.mrf.mxu0 }
 0x2a9   : > { %v5535_v11 = vadd.f32 %v5534_v43, %v5533_v16  ;;  %v7906_v36 = vadd.f32 %v1788_v40, %v1692_v41 }
 0x2aa   : > { %v5536_v10 = vpop.f32.mrf.mxu0 }
 0x2ab   : > { %9121 = vst [vmem:[#allocation53_spill] sm:$0xff] %v7906_v36  ;;  %v1695_v48 = vadd.f32 %v5535_v11, %v7903_v54  ;;  %v8977_v37 = vmax.f32 %v7906_v36, 0.0 }
 0x2ac   : > { %v5537_v19 = vpop.f32.mrf.mxu0 }
 0x2ad   : > { %v5538_v18 = vadd.f32 %v5537_v19, %v5536_v10  ;;  %v7909_v63 = vadd.f32 %v1791_v47, %v1695_v48  ;;  %v1804_v19 = vpop.f32.mrf.mxu1 }
 0x2ae   : > { %v5539_v8 = vpop.f32.mrf.mxu0 }
 0x2af   : > { %9122 = vst [vmem:[#allocation54_spill] sm:$0xff] %v7909_v63  ;;  %v1700_v21 = vadd.f32 %v5538_v18, %v7903_v54  ;;  %v8976_v55 = vmax.f32 %v7909_v63, 0.0  ;;  %v5917_v34 = vpop.f32.mrf.mxu1 }
 0x2b0   : > { %v5540_v20 = vpop.f32.mrf.mxu0 }
 0x2b1   : > { %v1867_v41 = vpack.c.bf16 %v8976_v55, %v8977_v37  ;;  %v5541_v11 = vadd.f32 %v5540_v20, %v5539_v8  ;;  %v7918_v47 = vadd.f32 %v5912_v13, %v1700_v21 }
 0x2b2   : > { %v5542_v43 = vpop.f32.mrf.mxu0 }
 0x2b3   : > { %9123 = vst [vmem:[#allocation55_spill] sm:$0xff] %v7918_v47  ;;  %v1703_v48 = vadd.f32 %v5541_v11, %v7903_v54  ;;  %5934 = vmatprep.mubr.msk.bf16.mxu0 %vm2132_vm0, %v1867_v41  ;;  %v8990_v50 = vmax.f32 %v7918_v47, 0.0  ;;  %v1807_v11 = vpop.f32.mrf.mxu1  ;;  %v8092_v47 = vld [vmem:[#allocation8] ss:$0 sm:$0xff] }
 0x2b4   : > { %v5543_v10 = vpop.f32.mrf.mxu0 }
 0x2b5   : > { %v7922_v18 = vadd.f32 %v5913_v14, %v1703_v48  ;;  %v5544_v16 = vadd.f32 %v5543_v10, %v5542_v43  ;;  %v5920_v37 = vpop.f32.mrf.mxu1 }
 0x2b6   : > { %v5545_v40 = vpop.f32.mrf.mxu0 }
 0x2b7   : > { %9124 = vst [vmem:[#allocation56_spill] sm:$0xff] %v7922_v18  ;;  %v8991_v4 = vmax.f32 %v7922_v18, 0.0  ;;  %v1708_v20 = vadd.f32 %v5544_v16, %v7903_v54 }
 0x2b8   : > { %v5546_v8 = vpop.f32.mrf.mxu0 }
 0x2b9   : > { %v1868_v13 = vpack.c.bf16 %v8991_v4, %v8990_v50  ;;  %v5547_v21 = vadd.f32 %v5546_v8, %v5545_v40  ;;  %v7931_v14 = vadd.f32 %v1804_v19, %v1708_v20 }
 0x2ba   : > { %v5548_v41 = vpop.f32.mrf.mxu0 }
 0x2bb   : > { %9125 = vst [vmem:[#allocation57_spill] sm:$0xff] %v7931_v14  ;;  %5935 = vmatmul.mubr.msk.bf16.vlgmr.msra.gmra.mxu0 %vm2132_vm0, %v1868_v13  ;;  %v1711_v43 = vadd.f32 %v5547_v21, %v7903_v54  ;;  %v8988_v40 = vmax.f32 %v7931_v14, 0.0  ;;  %v1820_v21 = vpop.f32.mrf.mxu1 }
 0x2bc   : > { %v5549_v48 = vpop.f32.mrf.mxu0  ;;  %5671 = vmatpush3.bf16.msra.mxu0 %v7813_v46 }
 0x2bd   : > { %v5550_v10 = vadd.f32 %v5549_v48, %v5548_v41  ;;  %v7936_v16 = vadd.f32 %v1807_v11, %v1711_v43  ;;  %5672 = vmatprep.subr.bf16.mxu0 %v7818_v51 }
 0x2be   : > { %v5551_v55 = vpop.f32.mrf.mxu0 }
 0x2bf   : > { %9126 = vst [vmem:[#allocation58_spill] sm:$0xff] %v7936_v16  ;;  %v1716_v8 = vadd.f32 %v5550_v10, %v7903_v54  ;;  %v8987_v19 = vmax.f32 %v7936_v16, 0.0 }
 0x2c0   : > { %v5552_v20 = vpop.f32.mrf.mxu0  ;;  %5673 = vmatpush3.bf16.msra.mxu0 %v7824_v52 }
 0x2c1   : > { %v1869_v46 = vpack.c.bf16 %v8987_v19, %v8988_v40  ;;  %v5553_v13 = vadd.f32 %v5552_v20, %v5551_v55  ;;  %5674 = vmatprep.subr.bf16.mxu0 %v7830_v33  ;;  %v7948_v41 = vadd.f32 %v5916_v29, %v1716_v8  ;;  %v5921_v55 = vpop.f32.mrf.mxu1 }
 0x2c2   : > { %v5554_v51 = vpop.f32.mrf.mxu0 }
 0x2c3   : > { %9127 = vst [vmem:[#allocation59_spill] sm:$0xff] %v7948_v41  ;;  %v1719_v11 = vadd.f32 %v5553_v13, %v7903_v54  ;;  %5938 = vmatprep.mubr.msk.bf16.mxu0 %vm2132_vm0, %v1869_v46  ;;  %v8986_v33 = vmax.f32 %v7948_v41, 0.0 }
 0x2c4   : > { %v5555_v43 = vpop.f32.mrf.mxu0  ;;  %5675 = vmatpush3.bf16.msra.mxu0 %v7836_v56 }
 0x2c5   : > { %v7953_v52 = vadd.f32 %v5917_v34, %v1719_v11  ;;  %v5556_v48 = vadd.f32 %v5555_v43, %v5554_v51  ;;  %5676 = vmatprep.subr.bf16.mxu0 %v7842_v60  ;;  %v1823_v60 = vpop.f32.mrf.mxu1 }
 0x2c6   : > { %v5557_v10 = vpop.f32.mrf.mxu0 }
 0x2c7   : > { %9128 = vst [vmem:[#allocation60_spill] sm:$0xff] %v7953_v52  ;;  %v8989_v20 = vmax.f32 %v7953_v52, 0.0  ;;  %v1724_v29 = vadd.f32 %v5556_v48, %v7903_v54 }
 0x2c8   : > { %v5558_v8 = vpop.f32.mrf.mxu0  ;;  %5677 = vmatpush3.bf16.msra.mxu0 %v7848_v62 }
 0x2c9   : > { %v5559_v46 = vadd.f32 %v5558_v8, %v5557_v10  ;;  %v1870_v34 = vpack.c.bf16 %v8989_v20, %v8986_v33  ;;  %5678 = vmatprep.subr.bf16.mxu0 %v7854_v0  ;;  %v7965_v13 = vadd.f32 %v1820_v21, %v1724_v29  ;;  %v5924_v10 = vpop.f32.mrf.mxu1 }
 0x2ca   : > { %v5560_v56 = vpop.f32.mrf.mxu0 }
 0x2cb   : > { %9129 = vst [vmem:[#allocation61_spill] sm:$0xff] %v7965_v13  ;;  %5939 = vmatmul.mubr.msk.bf16.gmra.mxu0 %vm2132_vm0, %v1870_v34  ;;  %v1727_v51 = vadd.f32 %v5559_v46, %v7903_v54  ;;  %v8984_v0 = vmax.f32 %v7965_v13, 0.0  ;;  %v1836_v34 = vpop.f32.mrf.mxu1 }
 0x2cc   : > { %v5561_v11 = vpop.f32.mrf.mxu0  ;;  %5679 = vmatpush3.bf16.msra.mxu0 %v7860_v6 }
 0x2cd   : > { %v5562_v62 = vadd.f32 %v5561_v11, %v5560_v56  ;;  %v7970_v43 = vadd.f32 %v1823_v60, %v1727_v51  ;;  %5680 = vmatprep.subr.bf16.mxu0 %v7866_v23 }
 0x2ce   : > { %v5563_v48 = vpop.f32.mrf.mxu0 }
 0x2cf   : > { %9130 = vst [vmem:[#allocation62_spill] sm:$0xff] %v7970_v43  ;;  %v1732_v8 = vadd.f32 %v5562_v62, %v7903_v54  ;;  %v8978_v21 = vmax.f32 %v7970_v43, 0.0 }
 0x2d0   : > { %v5564_v29 = vpop.f32.mrf.mxu0  ;;  %5681 = vmatpush3.bf16.msra.mxu0 %v7872_v53 }
 0x2d1   : > { %v1871_v6 = vpack.c.bf16 %v8978_v21, %v8984_v0  ;;  %v5565_v46 = vadd.f32 %v5564_v29, %v5563_v48  ;;  %5682 = vmatprep.subr.bf16.mxu0 %v7878_v26  ;;  %v7982_v56 = vadd.f32 %v5920_v37, %v1732_v8  ;;  %v5925_v48 = vpop.f32.mrf.mxu1 }
 0x2d2   : > { %v5566_v23 = vpop.f32.mrf.mxu0 }
 0x2d3   : > { %9131 = vst [vmem:[#allocation63_spill] sm:$0xff] %v7982_v56  ;;  %v1735_v60 = vadd.f32 %v5565_v46, %v7903_v54  ;;  %5942 = vmatprep.mubr.msk.bf16.mxu0 %vm2132_vm0, %v1871_v6  ;;  %v8979_v26 = vmax.f32 %v7982_v56, 0.0  ;;  %v1839_v46 = vpop.f32.mrf.mxu1 }
 0x2d4   : > { %v5567_v51 = vpop.f32.mrf.mxu0  ;;  %5683 = vmatpush3.bf16.msra.mxu0 %v7884_v27 }
 0x2d5   : > { %v7987_v53 = vadd.f32 %v5921_v55, %v1735_v60  ;;  %v5568_v11 = vadd.f32 %v5567_v51, %v5566_v23  ;;  %5684 = vmatprep.subr.bf16.mxu0 %v7890_v30 }
 0x2d6   : > { %v5569_v62 = vpop.f32.mrf.mxu0 }
 0x2d7   : > { %9132 = vst [vmem:[#allocation64_spill] sm:$0xff] %v7987_v53  ;;  %v8985_v29 = vmax.f32 %v7987_v53, 0.0  ;;  %v1740_v37 = vadd.f32 %v5568_v11, %v7903_v54 }
 0x2d8   : > { %v5570_v8 = vpop.f32.mrf.mxu0  ;;  %5685 = vmatpush3.bf16.msra.mxu0 %v7896_v31 }
 0x2d9   : > { %v5571_v6 = vadd.f32 %v5570_v8, %v5569_v62  ;;  %v1872_v27 = vpack.c.bf16 %v8985_v29, %v8979_v26  ;;  %v7998_v30 = vadd.f32 %v1836_v34, %v1740_v37  ;;  %5970 = vmatprep.subr.bf16.mxu0 %v6290_v32 }
 0x2da   : > { %v5572_v55 = vpop.f32.mrf.mxu0 }
 0x2db   : > { %9133 = vst [vmem:[#allocation65_spill] sm:$0xff] %v7998_v30  ;;  %5943 = vmatmul.mubr.msk.bf16.gmra.mxu0 %vm2132_vm0, %v1872_v27  ;;  %v1743_v23 = vadd.f32 %v5571_v6, %v7903_v54  ;;  %v8982_v31 = vmax.f32 %v7998_v30, 0.0 }
 0x2dc   : > { %v5573_v60 = vpop.f32.mrf.mxu0 }
 0x2dd   : > { %v5574_v51 = vadd.f32 %v5573_v60, %v5572_v55  ;;  %v8002_v11 = vadd.f32 %v1839_v46, %v1743_v23 }
 0x2de   : > { %v5575_v21 = vpop.f32.mrf.mxu0 }
 0x2df   : > { %9134 = vst [vmem:[#allocation66_spill] sm:$0xff] %v8002_v11  ;;  %v1748_v62 = vadd.f32 %v5574_v51, %v7903_v54  ;;  %v8981_v8 = vmax.f32 %v8002_v11, 0.0 }
 0x2e0   : > { %v5576_v26 = vpop.f32.mrf.mxu0 }
 0x2e1   : > { %v1873_v34 = vpack.c.bf16 %v8981_v8, %v8982_v31  ;;  %v5577_v37 = vadd.f32 %v5576_v26, %v5575_v21  ;;  %v8011_v27 = vadd.f32 %v5924_v10, %v1748_v62  ;;  %v5610_v10 = vpop.f32.mrf.mxu1  ;;  %v6289_v31 = vld [vmem:[#allocation10] sm:$0xff]  }
 0x2e2   : > { %5952 = vmatprep.subr.bf16.mxu1 %v6289_v31 }
 0x2e3   : > { %9135 = vst [vmem:[#allocation67_spill] sm:$0xff] %v8011_v27  ;;  %v1751_v6 = vadd.f32 %v5577_v37, %v7903_v54  ;;  %5946 = vmatprep.mubr.msk.bf16.mxu0 %vm2132_vm0, %v1873_v34  ;;  %v8980_v46 = vmax.f32 %v8011_v27, 0.0  ;;  %v5611_v21 = vpop.f32.mrf.mxu1  ;;  %5953 = vmatpush3.bf16.msra.mxu1 %v6289_v31 }
 0x2e4   : > { %5744 = vmatprep.subr.bf16.mxu1 %v6291_v38  ;;  %v5612_v41 = vadd.f32 %v5611_v21, %v5610_v10 }
 0x2e5   : > { %v8015_v55 = vadd.f32 %v5925_v48, %v1751_v6  ;;  %v8025_v54 = vpop.f32.mrf.mxu1 }
 0x2e7   : > { %9136 = vst [vmem:[#allocation68_spill] sm:$0xff] %v8015_v55  ;;  %v8983_v23 = vmax.f32 %v8015_v55, 0.0  ;;  %v5614_v26 = vpop.f32.mrf.mxu1 }
 0x2e9   : > { %v1874_v60 = vpack.c.bf16 %v8983_v23, %v8980_v46  ;;  %v5616_v48 = vpop.f32.mrf.mxu1 }
 0x2eb   : > { %5947 = vmatmul.mubr.msk.bf16.gmra.mxu0 %vm2132_vm0, %v1874_v60  ;;  %v5617_v51 = vpop.f32.mrf.mxu1 }
 0x2ec   : > { %2465 = vmatprep.mubr.bf16.mxu0 %v7434_v39  ;;  %v5618_v13 = vadd.f32 %v5617_v51, %v5616_v48  ;;  %v6294_v51 = vld [vmem:[%s8929_s13 + $0x30] sm:$0xff]  }
 0x2ed   : > { %v5619_v62 = vpop.f32.mrf.mxu1 }
 0x2ef   : > { %v5620_v34 = vpop.f32.mrf.mxu1 }
 0x2f1   : > { %v8031_v37 = vpop.f32.mrf.mxu1 }
 0x2f3   : > { %2466 = vmatmul.mubr.bf16.vlgmr.msra.gmra.mxu0 %v7439_v44  ;;  %v8033_v6 = vpop.f32.mrf.mxu1 }
 0x2f4   : > { %2473 = vmatprep.mubr.bf16.mxu0 %v7445_v49  ;;  %5971 = vmatpush3.bf16.msra.mxu0 %v6290_v32  ;;  %v5621_v32 = vadd.f32 %v5620_v34, %v5619_v62  ;;  %v5624_v48 = vadd.f32 %v8033_v6, %v8031_v37  ;;  %v6295_v34 = vld [vmem:[%s8929_s13 + $0x68] sm:$0xff]  }
 0x2f5   : > { %v8035_v60 = vpop.f32.mrf.mxu1  ;;  %5972 = vmatprep.subr.bf16.mxu0 %v6303_v5 }
 0x2f7   : > { %v8037_v46 = vpop.f32.mrf.mxu1 }
 0x2f8   : > { %5973 = vmatpush3.bf16.msra.mxu0 %v6303_v5  ;;  %v5615_v5 = vadd.f32 %v5614_v26, %v8025_v54  ;;  %v5627_v37 = vadd.f32 %v8037_v46, %v8035_v60 }
 0x2f9   : > { %v8041_v8 = vpop.f32.mrf.mxu1 }
 0x2fb   : > { %2474 = vmatmul.mubr.bf16.gmra.mxu0 %v7457_v59  ;;  %v8043_v23 = vpop.f32.mrf.mxu1 }
 0x2fc   : > { %2481 = vmatprep.mubr.bf16.mxu0 %v7459_v61  ;;  %v5630_v54 = vadd.f32 %v8043_v23, %v8041_v8 }
 0x2fd   : > { %v8045_v0 = vpop.f32.mrf.mxu1 }
 0x2ff   : > { %v8047_v29 = vpop.f32.mrf.mxu1 }
 0x300   : > { %v5633_v8 = vadd.f32 %v8047_v29, %v8045_v0 }
 0x301   : > { %v8051_v33 = vpop.f32.mrf.mxu1 }
 0x303   : > { %2482 = vmatmul.mubr.bf16.gmra.mxu0 %v7471_v7  ;;  %v8053_v19 = vpop.f32.mrf.mxu1 }
 0x304   : > { %2489 = vmatprep.mubr.bf16.mxu0 %v7473_v9 }
 0x305   : > { %v8057_v40 = vpop.f32.mrf.mxu1 }
 0x307   : > { %v8059_v20 = vpop.f32.mrf.mxu1 }
 0x309   : > { %v8062_v31 = vpop.f32.mrf.mxu1 }
 0x30b   : > { %2490 = vmatmul.mubr.bf16.gmra.mxu0 %v7494_v22  ;;  %v8064_v50 = vpop.f32.mrf.mxu1 }
 0x30c   : > { %2497 = vmatprep.mubr.bf16.mxu0 %v7499_v25 }
 0x30d   : > { %v8066_v4 = vpop.f32.mrf.mxu1 }
 0x30f   : > { %v8068_v57 = vpop.f32.mrf.mxu1 }
 0x311   : > { %v8070_v28 = vpop.f32.mrf.mxu1 }
 0x313   : > { %2498 = vmatmul.mubr.bf16.gmra.mxu0 %v7529_v42  ;;  %v8072_v35 = vpop.f32.mrf.mxu1 }
 0x314   : > { %2505 = vmatprep.mubr.bf16.mxu0 %v7531_v45 }
 0x315   : > { %v8074_v2 = vpop.f32.mrf.mxu1 }
 0x317   : > { %v8076_v58 = vpop.f32.mrf.mxu1 }
 0x319   : > { %v8081_v12 = vpop.f32.mrf.mxu1 }
 0x31b   : > { %2506 = vmatmul.mubr.bf16.gmra.mxu0 %v7564_v1  ;;  %v8083_v27 = vpop.f32.mrf.mxu1 }
 0x31d   : > { %v8085_v11 = vpop.f32.mrf.mxu1 }
 0x31f   : > { %v8087_v30 = vpop.f32.mrf.mxu1 }
 0x321   : > { %v5722_v55 = vpop.f32.mrf.mxu1 }
 0x323   : > { %v5723_v56 = vpop.f32.mrf.mxu1 }
 0x324   : > { %v8089_v43 = vadd.f32 %v5723_v56, %v5722_v55 }
 0x37b   : > { %v5936_v53 = vpop.f32.mrf.mxu0 }
 0x37c   : > { %v2200_v14 = vadd.f32 %v5936_v53, %v5618_v13 }
 0x37d   : > { %v2191_v38 = vpop.f32.mrf.mxu0 }
 0x37e   : > { %v2192_v16 = vadd.f32 %v5612_v41, %v2191_v38  ;;  %v8101_v10 = vadd.f32 %v8092_v47, %v2200_v14 }
 0x37f   : > { %v5937_v52 = vpop.f32.mrf.mxu0 }
 0x380   : > { %v2203_v63 = vadd.f32 %v5937_v52, %v5621_v32  ;;  %v8095_v18 = vadd.f32 %v8092_v47, %v2192_v16  ;;  %v9029_v21 = vmax.f32 %v8101_v10, 0.0  ;;  %v6293_v16 = vld [vmem:[%s8929_s13 + $0x70] sm:$0xff]  }
 0x381   : > { %v2194_v36 = vpop.f32.mrf.mxu0 }
 0x382   : > { %v8098_v56 = vadd.f32 %v8092_v47, %v2203_v63  ;;  %v2195_v55 = vadd.f32 %v5615_v5, %v2194_v36  ;;  %v9031_v53 = vmax.f32 %v8095_v18, 0.0  ;;  %v6292_v36 = vld [vmem:[%s8929_s13 + $0x38] sm:$0xff]   ;;  %v6296_v5 = vld [vmem:[%s8929_s13 + $0x28] sm:$0xff]  }
 0x384   : > { %v8104_v41 = vadd.f32 %v8092_v47, %v2195_v55  ;;  %v9032_v13 = vmax.f32 %v8098_v56, 0.0 }
 0x386   : > { %v9030_v52 = vmax.f32 %v8104_v41, 0.0  ;;  %v2294_v14 = vpack.c.bf16 %v9032_v13, %v9029_v21 }
 0x388   : > { %v2293_v63 = vpack.c.bf16 %v9030_v52, %v9031_v53  ;;  %v8295_v52 = vld [vmem:[#allocation11] ss:$0 sm:$0xff] }
 0x38a   : > { %5954 = vmatprep.mubr.msk.bf16.mxu1 %vm2542_vm1, %v2293_v63  ;;  %v6297_v63 = vld [vmem:[%s8929_s13 + $0x60] sm:$0xff]  }
 0x38b   : > { %v5940_v26 = vpop.f32.mrf.mxu0  ;;  %5955 = vmatmul.mubr.msk.bf16.vlgmr.msra.gmra.mxu1 %vm2542_vm1, %v2294_v14  ;;  %v6298_v14 = vld [vmem:[%s8929_s13 + $0x20] sm:$0xff]  }
 0x38c   : > { %5745 = vmatpush3.bf16.msra.mxu1 %v6292_v36  ;;  %v2216_v38 = vadd.f32 %v5940_v26, %v5630_v54  ;;  %v6299_v54 = vld [vmem:[%s8929_s13 + $0x58] sm:$0xff]  }
 0x38d   : > { %v2207_v62 = vpop.f32.mrf.mxu0  ;;  %5746 = vmatprep.subr.bf16.mxu1 %v6293_v16 }
 0x38e   : > { %v2208_v23 = vadd.f32 %v5624_v48, %v2207_v62  ;;  %v8153_v46 = vadd.f32 %v8092_v47, %v2216_v38  ;;  %v5642_v38 = vadd.f32 %v8064_v50, %v8062_v31  ;;  %v5645_v50 = vadd.f32 %v8068_v57, %v8066_v4 }
 0x38f   : > { %v5941_v32 = vpop.f32.mrf.mxu0 }
 0x390   : > { %v2219_v6 = vadd.f32 %v5941_v32, %v5633_v8  ;;  %5747 = vmatpush3.bf16.msra.mxu1 %v6294_v51  ;;  %v8147_v0 = vadd.f32 %v8092_v47, %v2208_v23  ;;  %v9025_v51 = vmax.f32 %v8153_v46, 0.0  ;;  %v6301_v23 = vld [vmem:[%s8929_s13 + $0x50] sm:$0xff]  }
 0x391   : > { %v2210_v55 = vpop.f32.mrf.mxu0  ;;  %5748 = vmatprep.subr.bf16.mxu1 %v6295_v34  ;;  %v6300_v34 = vld [vmem:[%s8929_s13 + $0x18] sm:$0xff]  }
 0x392   : > { %v8150_v29 = vadd.f32 %v8092_v47, %v2219_v6  ;;  %v2211_v36 = vadd.f32 %v5627_v37, %v2210_v55  ;;  %v9027_v26 = vmax.f32 %v8147_v0, 0.0  ;;  %v5636_v37 = vadd.f32 %v8053_v19, %v8051_v33  ;;  %v6302_v6 = vld [vmem:[%s8929_s13 + $0x10] sm:$0xff]   ;;  %v6304_v55 = vld [vmem:[%s8929_s13 + $0x48] sm:$0xff]  }
 0x393   : > { %v5639_v19 = vadd.f32 %v8059_v20, %v8057_v40 }
 0x394   : > { %v8156_v60 = vadd.f32 %v8092_v47, %v2211_v36  ;;  %5749 = vmatpush3.bf16.msra.mxu1 %v6296_v5  ;;  %v9028_v16 = vmax.f32 %v8150_v29, 0.0 }
 0x395   : > { %5750 = vmatprep.subr.bf16.mxu1 %v6297_v63 }
 0x396   : > { %v9026_v48 = vmax.f32 %v8156_v60, 0.0  ;;  %v2296_v8 = vpack.c.bf16 %v9028_v16, %v9025_v51 }
 0x398   : > { %v2295_v62 = vpack.c.bf16 %v9026_v48, %v9027_v26  ;;  %5751 = vmatpush3.bf16.msra.mxu1 %v6298_v14  ;;  %v6305_v14 = vld [vmem:[%s8929_s13 + $0x8] sm:$0xff]  }
 0x399   : > { %5752 = vmatprep.subr.bf16.mxu1 %v6299_v54 }
 0x39a   : > { %5958 = vmatprep.mubr.msk.bf16.mxu1 %vm2542_vm1, %v2295_v62  ;;  %v6306_v62 = vld [vmem:[%s8929_s13 + $0x40] sm:$0xff]  }
 0x39b   : > { %v5944_v32 = vpop.f32.mrf.mxu0  ;;  %5959 = vmatmul.mubr.msk.bf16.gmra.mxu1 %vm2542_vm1, %v2296_v8 }
 0x39c   : > { %5753 = vmatpush3.bf16.msra.mxu1 %v6300_v34  ;;  %v2232_v63 = vadd.f32 %v5944_v32, %v5642_v38 }
 0x39d   : > { %v2223_v5 = vpop.f32.mrf.mxu0  ;;  %5754 = vmatprep.subr.bf16.mxu1 %v6301_v23 }
 0x39e   : > { %v2224_v31 = vadd.f32 %v5636_v37, %v2223_v5  ;;  %v8211_v40 = vadd.f32 %v8092_v47, %v2232_v63  ;;  %v5654_v5 = vadd.f32 %v8083_v27, %v8081_v12  ;;  %v5657_v63 = vadd.f32 %v8087_v30, %v8085_v11 }
 0x39f   : > { %v5945_v36 = vpop.f32.mrf.mxu0 }
 0x3a0   : > { %v2235_v33 = vadd.f32 %v5945_v36, %v5645_v50  ;;  %5755 = vmatpush3.bf16.msra.mxu1 %v6302_v6  ;;  %v8205_v57 = vadd.f32 %v8092_v47, %v2224_v31  ;;  %v9021_v32 = vmax.f32 %v8211_v40, 0.0  ;;  %v5648_v50 = vadd.f32 %v8072_v35, %v8070_v28 }
 0x3a1   : > { %v2226_v54 = vpop.f32.mrf.mxu0  ;;  %5756 = vmatprep.subr.bf16.mxu1 %v6304_v55 }
 0x3a2   : > { %v8208_v4 = vadd.f32 %v8092_v47, %v2235_v33  ;;  %v2227_v34 = vadd.f32 %v5639_v19, %v2226_v54  ;;  %v9023_v23 = vmax.f32 %v8205_v57, 0.0 }
 0x3a4   : > { %v8214_v20 = vadd.f32 %v8092_v47, %v2227_v34  ;;  %5757 = vmatpush3.bf16.msra.mxu1 %v6305_v14  ;;  %v9024_v8 = vmax.f32 %v8208_v4, 0.0  ;;  %v5651_v14 = vadd.f32 %v8076_v58, %v8074_v2 }
 0x3a5   : > { %5758 = vmatprep.subr.bf16.mxu1 %v6306_v62 }
 0x3a6   : > { %v9022_v38 = vmax.f32 %v8214_v20, 0.0  ;;  %v2298_v6 = vpack.c.bf16 %v9024_v8, %v9021_v32 }
 0x3a8   : > { %v2297_v37 = vpack.c.bf16 %v9022_v38, %v9023_v23 }
 0x3aa   : > { %5962 = vmatprep.mubr.msk.bf16.mxu1 %vm2542_vm1, %v2297_v37 }
 0x3ab   : > { %v5948_v55 = vpop.f32.mrf.mxu0  ;;  %5963 = vmatmul.mubr.msk.bf16.gmra.mxu1 %vm2542_vm1, %v2298_v6 }
 0x3ac   : > { %v2248_v19 = vadd.f32 %v5948_v55, %v5654_v5  ;;  %v6308_v5 = vld [vmem:[#allocation16 + $0x18] sm:$0xff]   ;;  %v6309_v55 = vld [vmem:[#allocation16 + $0x10] sm:$0xff]  }
 0x3ad   : > { %v2239_v31 = vpop.f32.mrf.mxu0 }
 0x3ae   : > { %v2240_v36 = vadd.f32 %v5648_v50, %v2239_v31  ;;  %v8245_v28 = vadd.f32 %v8092_v47, %v2248_v19  ;;  %v6310_v50 = vld [vmem:[#allocation17 + $0x78] sm:$0xff]  }
 0x3af   : > { %v5949_v33 = vpop.f32.mrf.mxu0  ;;  %5818 = vmatprep.subr.bf16.mxu0 %v6310_v50 }
 0x3b0   : > { %v2251_v54 = vadd.f32 %v5949_v33, %v5657_v63  ;;  %v8239_v12 = vadd.f32 %v8092_v47, %v2240_v36  ;;  %v9017_v2 = vmax.f32 %v8245_v28, 0.0  ;;  %v6316_v63 = vld [vmem:[#allocation16 + $0x8] sm:$0xff]  }
 0x3b1   : > { %v2242_v62 = vpop.f32.mrf.mxu0 }
 0x3b2   : > { %v8242_v27 = vadd.f32 %v8092_v47, %v2251_v54  ;;  %v2243_v34 = vadd.f32 %v5651_v14, %v2242_v62  ;;  %v9019_v11 = vmax.f32 %v8239_v12, 0.0 }
 0x3b3   : > { %v5686_v31 = vpop.f32.mrf.mxu0 }
 0x3b4   : > { %v8248_v35 = vadd.f32 %v8092_v47, %v2243_v34  ;;  %v9020_v30 = vmax.f32 %v8242_v27, 0.0  ;;  %v6307_v47 = vld [vmem:[%s8929_s13] sm:$0xff]  }
 0x3b5   : > { %5759 = vmatpush3.bf16.msra.mxu1 %v6307_v47  ;;  %v5687_v36 = vpop.f32.mrf.mxu0  ;;  %v8283_v47 = vpop.f32.mrf.mxu1 }
 0x3b6   : > { %v9018_v58 = vmax.f32 %v8248_v35, 0.0  ;;  %v2300_v6 = vpack.c.bf16 %v9020_v30, %v9017_v2  ;;  %5990 = vmatprep.subr.bf16.mxu1 %v6308_v5  ;;  %v5688_v48 = vadd.f32 %v5687_v36, %v5686_v31 }
 0x3b7   : > { %v5689_v19 = vpop.f32.mrf.mxu0 }
 0x3b8   : > { %v2299_v37 = vpack.c.bf16 %v9018_v58, %v9019_v11  ;;  %v8285_v58 = vpop.f32.mrf.mxu1 }
 0x3b9   : > { %v5690_v33 = vpop.f32.mrf.mxu0 }
 0x3ba   : > { %5966 = vmatprep.mubr.msk.bf16.mxu1 %vm2542_vm1, %v2299_v37  ;;  %v8287_v50 = vpop.f32.mrf.mxu1 }
 0x3bb   : > { %5967 = vmatmul.mubr.msk.bf16.gmra.mxu1 %vm2542_vm1, %v2300_v6  ;;  %v5692_v14 = vpop.f32.mrf.mxu0 }
 0x3bc   : > { %2891 = vmatprep.mubr.bf16.mxu1 %v7434_v39 }
 0x3bd   : > { %v5693_v54 = vpop.f32.mrf.mxu0 }
 0x3be   : > { %v5694_v23 = vadd.f32 %v5693_v54, %v5692_v14 }
 0x3bf   : > { %v5695_v62 = vpop.f32.mrf.mxu0 }
 0x3c1   : > { %v5696_v34 = vpop.f32.mrf.mxu0 }
 0x3c2   : > { %v5697_v21 = vadd.f32 %v5696_v34, %v5695_v62  ;;  %v9137_v62 = vmax.f32 %v8098_v56, 0.0  ;;  %v6311_v34 = vld [vmem:[#allocation17 + $0x38] sm:$0xff]  }
 0x3c3   : > { %2892 = vmatmul.mubr.bf16.vlgmr.msra.gmra.mxu1 %v7439_v44  ;;  %v5698_v37 = vpop.f32.mrf.mxu0 }
 0x3c4   : > { %2899 = vmatprep.mubr.bf16.mxu1 %v7445_v49  ;;  %5991 = vmatpush3.bf16.msra.mxu1 %v6308_v5 }
 0x3c5   : > { %5992 = vmatprep.subr.bf16.mxu1 %v6309_v55  ;;  %v5699_v6 = vpop.f32.mrf.mxu0 }
 0x3c6   : > { %v5700_v56 = vadd.f32 %v5699_v6, %v5698_v37 }
 0x3c7   : > { %v5701_v2 = vpop.f32.mrf.mxu0 }
 0x3c8   : > { %5993 = vmatpush3.bf16.msra.mxu1 %v6309_v55  ;;  %v8289_v55 = vpop.f32.mrf.mxu1 }
 0x3c9   : > { %5994 = vmatprep.subr.bf16.mxu1 %v6316_v63  ;;  %v5702_v5 = vpop.f32.mrf.mxu0 }
 0x3cb   : > { %2900 = vmatmul.mubr.bf16.gmra.mxu1 %v7457_v59  ;;  %v5704_v11 = vpop.f32.mrf.mxu0 }
 0x3cc   : > { %2907 = vmatprep.mubr.bf16.mxu1 %v7459_v61  ;;  %5995 = vmatpush3.bf16.msra.mxu1 %v6316_v63  ;;  %v8291_v63 = vpop.f32.mrf.mxu1 }
 0x3cd   : > { %v5705_v30 = vpop.f32.mrf.mxu0 }
 0x3ce   : > { %v8293_v38 = vpop.f32.mrf.mxu1 }
 0x3cf   : > { %v5707_v32 = vpop.f32.mrf.mxu0 }
 0x3d1   : > { %v5708_v51 = vpop.f32.mrf.mxu0 }
 0x3d3   : > { %2908 = vmatmul.mubr.bf16.gmra.mxu1 %v7471_v7 }
 0x3d4   : > { %2915 = vmatprep.mubr.bf16.mxu1 %v7473_v9 }
 0x3db   : > { %2916 = vmatmul.mubr.bf16.gmra.mxu1 %v7494_v22 }
 0x3dc   : > { %2923 = vmatprep.mubr.bf16.mxu1 %v7499_v25 }
 0x3e3   : > { %2924 = vmatmul.mubr.bf16.gmra.mxu1 %v7529_v42 }
 0x3e4   : > { %2931 = vmatprep.mubr.bf16.mxu1 %v7531_v45 }
 0x3eb   : > { %2932 = vmatmul.mubr.bf16.gmra.mxu1 %v7564_v1 }
 0x3ec   : > { %2939 = vmatprep.mubr.bf16.mxu1 %v7566_v3 }
 0x3f3   : > { %2940 = vmatmul.mubr.bf16.gmra.mxu1 %v7578_v15 }
 0x3f4   : > { %2947 = vmatprep.mubr.bf16.mxu1 %v7580_v17  ;;  %v5691_v17 = vadd.f32 %v5690_v33, %v5689_v19 }
 0x3fb   : > { %2948 = vmatmul.mubr.bf16.gmra.mxu1 %v7588_v24  ;;  %v8297_v24 = vpop.f32.mrf.mxu0 }
 0x3fd   : > { %v8302_v31 = vpop.f32.mrf.mxu0 }
 0x3ff   : > { %v8307_v33 = vpop.f32.mrf.mxu0 }
 0x44b   : > { %v5956_v8 = vpop.f32.mrf.mxu1 }
 0x44c   : > { %v2610_v26 = vadd.f32 %v5956_v8, %v5694_v23 }
 0x44d   : > { %v2601_v16 = vpop.f32.mrf.mxu1 }
 0x44e   : > { %v2602_v53 = vadd.f32 %v5688_v48, %v2601_v16  ;;  %v2673_v1 = vadd.f32 %v8295_v52, %v2610_v26 }
 0x44f   : > { %v5957_v13 = vpop.f32.mrf.mxu1 }
 0x450   : > { %v2671_v15 = vadd.f32 %v8295_v52, %v2602_v53  ;;  %v2613_v3 = vadd.f32 %v5957_v13, %v5697_v21  ;;  %v2689_v16 = vmax.f32 %v2673_v1, 0.0  ;;  %v9138_v13 = vmax.f32 %v8095_v18, 0.0 }
 0x451   : > { %v2604_v45 = vpop.f32.mrf.mxu1  ;;  %v9139_v21 = vmax.f32 %v8104_v41, 0.0  ;;  %v5709_v18 = vadd.f32 %v5708_v51, %v5707_v32  ;;  %v6317_v32 = vld [vmem:[#allocation17 + $0x60] sm:$0xff]  }
 0x452   : > { %v2674_v14 = vadd.f32 %v8295_v52, %v2613_v3  ;;  %v2605_v54 = vadd.f32 %v5691_v17, %v2604_v45  ;;  %v2687_v8 = vmax.f32 %v2671_v15, 0.0  ;;  %v9140_v45 = vmax.f32 %v8101_v10, 0.0 }
 0x453   : > { %v5706_v15 = vadd.f32 %v5705_v30, %v5704_v11  ;;  %v6314_v30 = vld [vmem:[#allocation17 + $0x68] sm:$0xff]   ;;  %v5703_v11 = vadd.f32 %v5702_v5, %v5701_v2  ;;  %v6318_v5 = vld [vmem:[#allocation17 + $0x20] sm:$0xff]  }
 0x454   : > { %v2690_v23 = vmax.f32 %v2674_v14, 0.0  ;;  %v2672_v36 = vadd.f32 %v8295_v52, %v2605_v54  ;;  %v2703_v53 = vadd.f32 %v2687_v8, %v9138_v13  ;;  %v2705_v17 = vadd.f32 %v2689_v16, %v9140_v45  ;;  %v5714_v54 = vpop.f32.mrf.mxu0  ;;  %v6313_v8 = vld [vmem:[#allocation17 + $0x30] sm:$0xff]  }
 0x456   : > { %v2688_v48 = vmax.f32 %v2672_v36, 0.0  ;;  %v2706_v19 = vadd.f32 %v2690_v23, %v9137_v62  ;;  %v6312_v36 = vld [vmem:[#allocation17 + $0x70] sm:$0xff]   ;;  %v5716_v16 = vpop.f32.mrf.mxu0 }
 0x458   : > { %v2704_v3 = vadd.f32 %v2688_v48, %v9139_v21  ;;  %v2720_v14 = vpack.c.bf16 %v2706_v19, %v2705_v17  ;;  %v6315_v21 = vld [vmem:[#allocation17 + $0x28] sm:$0xff]   ;;  %v5717_v51 = vpop.f32.mrf.mxu0 }
 0x45a   : > { %v2719_v26 = vpack.c.bf16 %v2704_v3, %v2703_v53 }
 0x45b   : > { %v5960_v1 = vpop.f32.mrf.mxu1 }
 0x45c   : > { %5974 = vmatprep.mubr.msk.bf16.mxu0 %vm2542_vm1, %v2719_v26  ;;  %v2626_v23 = vadd.f32 %v5960_v1, %v5706_v15  ;;  %v9141_v26 = vmax.f32 %v8150_v29, 0.0  ;;  %v6319_v1 = vld [vmem:[#allocation17 + $0x58] sm:$0xff]  }
 0x45d   : > { %v2617_v62 = vpop.f32.mrf.mxu1  ;;  %5975 = vmatmul.mubr.msk.bf16.vlgmr.msra.gmra.mxu0 %vm2542_vm1, %v2720_v14  ;;  %v5719_v14 = vpop.f32.mrf.mxu0 }
 0x45e   : > { %v2618_v41 = vadd.f32 %v5700_v56, %v2617_v62  ;;  %5819 = vmatpush3.bf16.msra.mxu0 %v6311_v34  ;;  %v2677_v37 = vadd.f32 %v8295_v52, %v2626_v23  ;;  %v9143_v23 = vmax.f32 %v8156_v60, 0.0 }
 0x45f   : > { %v5961_v10 = vpop.f32.mrf.mxu1  ;;  %5820 = vmatprep.subr.bf16.mxu0 %v6312_v36  ;;  %v9142_v36 = vmax.f32 %v8147_v0, 0.0 }
 0x460   : > { %v2675_v48 = vadd.f32 %v8295_v52, %v2618_v41  ;;  %v2629_v19 = vadd.f32 %v5961_v10, %v5709_v18  ;;  %v2693_v15 = vmax.f32 %v2677_v37, 0.0  ;;  %v9144_v18 = vmax.f32 %v8153_v46, 0.0 }
 0x461   : > { %v2620_v6 = vpop.f32.mrf.mxu1  ;;  %v5712_v37 = vadd.f32 %v8302_v31, %v8297_v24 }
 0x462   : > { %v2678_v13 = vadd.f32 %v8295_v52, %v2629_v19  ;;  %v2621_v53 = vadd.f32 %v5703_v11, %v2620_v6  ;;  %5821 = vmatpush3.bf16.msra.mxu0 %v6313_v8  ;;  %v2691_v3 = vmax.f32 %v2675_v48, 0.0  ;;  %v2709_v41 = vadd.f32 %v2693_v15, %v9144_v18  ;;  %v5720_v48 = vpop.f32.mrf.mxu0  ;;  %v6321_v19 = vld [vmem:[#allocation17 + $0x50] sm:$0xff]  }
 0x463   : > { %5822 = vmatprep.subr.bf16.mxu0 %v6314_v30  ;;  %v5718_v8 = vadd.f32 %v5717_v51, %v5716_v16  ;;  %v6320_v30 = vld [vmem:[#allocation17 + $0x18] sm:$0xff]   ;;  %v5721_v46 = vadd.f32 %v5720_v48, %v5719_v14  ;;  %v6322_v16 = vld [vmem:[#allocation17 + $0x10] sm:$0xff]   ;;  %v9146_v14 = vmax.f32 %v8205_v57, 0.0  ;;  %v5733_v57 = vadd.f32 %v8293_v38, %v8291_v63 }
 0x464   : > { %v2694_v45 = vmax.f32 %v2678_v13, 0.0  ;;  %v2676_v17 = vadd.f32 %v8295_v52, %v2621_v53  ;;  %v2707_v56 = vadd.f32 %v2691_v3, %v9142_v36  ;;  %v6323_v53 = vld [vmem:[#allocation17 + $0x48] sm:$0xff]   ;;  %v9147_v36 = vmax.f32 %v8214_v20, 0.0 }
 0x466   : > { %v2692_v2 = vmax.f32 %v2676_v17, 0.0  ;;  %5823 = vmatpush3.bf16.msra.mxu0 %v6315_v21  ;;  %v2710_v34 = vadd.f32 %v2694_v45, %v9141_v26  ;;  %v5715_v21 = vadd.f32 %v5714_v54, %v8307_v33  ;;  %v6324_v17 = vld [vmem:[#allocation17 + $0x8] sm:$0xff]   ;;  %v9145_v33 = vmax.f32 %v8208_v4, 0.0 }
 0x467   : > { %5824 = vmatprep.subr.bf16.mxu0 %v6317_v32 }
 0x468   : > { %v2708_v62 = vadd.f32 %v2692_v2, %v9143_v23  ;;  %v2722_v11 = vpack.c.bf16 %v2710_v34, %v2709_v41  ;;  %v9148_v23 = vmax.f32 %v8211_v40, 0.0  ;;  %v5730_v41 = vadd.f32 %v8289_v55, %v8287_v50 }
 0x469   : > { %v5727_v40 = vadd.f32 %v8285_v58, %v8283_v47  ;;  %v9150_v58 = vmax.f32 %v8239_v12, 0.0  ;;  %v6325_v12 = vld [vmem:[#allocation16] sm:$0xff]  }
 0x46a   : > { %v2721_v10 = vpack.c.bf16 %v2708_v62, %v2707_v56  ;;  %5825 = vmatpush3.bf16.msra.mxu0 %v6318_v5  ;;  %5996 = vmatprep.subr.bf16.mxu1 %v6325_v12 }
 0x46b   : > { %v5964_v29 = vpop.f32.mrf.mxu1  ;;  %5826 = vmatprep.subr.bf16.mxu0 %v6319_v1  ;;  %5997 = vmatpush3.bf16.msra.mxu1 %v6325_v12 }
 0x46c   : > { %5978 = vmatprep.mubr.msk.bf16.mxu0 %vm2542_vm1, %v2721_v10  ;;  %v2642_v0 = vadd.f32 %v5964_v29, %v5718_v8 }
 0x46d   : > { %v2633_v60 = vpop.f32.mrf.mxu1  ;;  %5979 = vmatmul.mubr.msk.bf16.gmra.mxu0 %vm2542_vm1, %v2722_v11 }
 0x46e   : > { %v2634_v6 = vadd.f32 %v5712_v37, %v2633_v60  ;;  %5827 = vmatpush3.bf16.msra.mxu0 %v6320_v30  ;;  %v2681_v24 = vadd.f32 %v8295_v52, %v2642_v0 }
 0x46f   : > { %v5965_v13 = vpop.f32.mrf.mxu1  ;;  %5828 = vmatprep.subr.bf16.mxu0 %v6321_v19 }
 0x470   : > { %v2679_v51 = vadd.f32 %v8295_v52, %v2634_v6  ;;  %v2645_v32 = vadd.f32 %v5965_v13, %v5721_v46  ;;  %v2697_v26 = vmax.f32 %v2681_v24, 0.0  ;;  %v9155_v24 = vld [vmem:[#allocation33_spill] sm:$0xff] }
 0x471   : > { %v2636_v31 = vpop.f32.mrf.mxu1 }
 0x472   : > { %v2682_v3 = vadd.f32 %v8295_v52, %v2645_v32  ;;  %v2637_v45 = vadd.f32 %v5715_v21, %v2636_v31  ;;  %5829 = vmatpush3.bf16.msra.mxu0 %v6322_v16  ;;  %v2695_v15 = vmax.f32 %v2679_v51, 0.0  ;;  %v2713_v62 = vadd.f32 %v2697_v26, %v9148_v23  ;;  %v6328_v26 = vld [vmem:[#allocation19 + $0x70] ss:$8 sps:$4 sm:$0xff]  }
 0x473   : > { %5830 = vmatprep.subr.bf16.mxu0 %v6323_v53  ;;  %v9151_v16 = vmax.f32 %v8248_v35, 0.0  ;;  %v9152_v53 = vmax.f32 %v8245_v28, 0.0  ;;  %v9153_v28 = vld [vmem:[#allocation31_spill] sm:$0xff]  ;;  %v9154_v35 = vld [vmem:[#allocation32_spill] sm:$0xff]  ;;  %v6334_v23 = vld [vmem:[#allocation19 + $0x50] ss:$8 sps:$4 sm:$0xff]  }
 0x474   : > { %v2698_v2 = vmax.f32 %v2682_v3, 0.0  ;;  %v2680_v5 = vadd.f32 %v8295_v52, %v2637_v45  ;;  %v2711_v1 = vadd.f32 %v2695_v15, %v9146_v14  ;;  %v9156_v3 = vld [vmem:[#allocation34_spill] sm:$0xff]  ;;  %v6331_v14 = vld [vmem:[#allocation19 + $0x60] ss:$8 sps:$4 sm:$0xff]  }
 0x476   : > { %v2696_v34 = vmax.f32 %v2680_v5, 0.0  ;;  %5831 = vmatpush3.bf16.msra.mxu0 %v6324_v17  ;;  %v2714_v54 = vadd.f32 %v2698_v2, %v9145_v33  ;;  %v9157_v17 = vld [vmem:[#allocation35_spill] sm:$0xff]  ;;  %v9158_v2 = vld [vmem:[#allocation36_spill] sm:$0xff] }
 0x477   : > { %v6333_v33 = vld [vmem:[#allocation19 + $0x64] ss:$8 sps:$4 sm:$0xff]  }
 0x478   : > { %v2712_v56 = vadd.f32 %v2696_v34, %v9147_v36  ;;  %v2724_v8 = vpack.c.bf16 %v2714_v54, %v2713_v62  ;;  %v6330_v34 = vld [vmem:[#allocation19 + $0x74] ss:$8 sps:$4 sm:$0xff]   ;;  %v6339_v62 = vld [vmem:[#allocation19 + $0x44] ss:$8 sps:$4 sm:$0xff]  }
 0x479   : > { %v6354_v36 = vld [vmem:[#allocation19 + $0x174] ss:$8 sps:$4 sm:$0xff]  }
 0x47a   : > { %v2723_v18 = vpack.c.bf16 %v2712_v56, %v2711_v1  ;;  %v6336_v1 = vld [vmem:[#allocation19 + $0x54] ss:$8 sps:$4 sm:$0xff]   ;;  %4006 = vmatprep.subr.bf16.mxu1 %v6354_v36 }
 0x47b   : > { %v5968_v10 = vpop.f32.mrf.mxu1 }
 0x47c   : > { %5982 = vmatprep.mubr.msk.bf16.mxu0 %vm2542_vm1, %v2723_v18  ;;  %v2658_v30 = vadd.f32 %v5968_v10, %v5730_v41  ;;  %v6337_v41 = vld [vmem:[#allocation19 + $0x40] ss:$8 sps:$4 sm:$0xff]  }
 0x47d   : > { %v2649_v4 = vpop.f32.mrf.mxu1  ;;  %5983 = vmatmul.mubr.msk.bf16.gmra.mxu0 %vm2542_vm1, %v2724_v8  ;;  %v6342_v8 = vld [vmem:[#allocation19 + $0x34] ss:$8 sps:$4 sm:$0xff]  }
 0x47e   : > { %v2650_v20 = vadd.f32 %v8089_v43, %v2649_v4  ;;  %v2685_v55 = vadd.f32 %v8295_v52, %v2658_v30  ;;  %v9149_v43 = vmax.f32 %v8242_v27, 0.0  ;;  %v6327_v27 = vld [vmem:[#allocation17] sm:$0xff]   ;;  %v6340_v30 = vld [vmem:[#allocation19 + $0x30] ss:$8 sps:$4 sm:$0xff]  }
 0x47f   : > { %v5969_v11 = vpop.f32.mrf.mxu1  ;;  %v6345_v4 = vld [vmem:[#allocation19 + $0x24] ss:$8 sps:$4 sm:$0xff]  }
 0x480   : > { %v2683_v48 = vadd.f32 %v8295_v52, %v2650_v20  ;;  %v2661_v50 = vadd.f32 %v5969_v11, %v5733_v57  ;;  %v2701_v38 = vmax.f32 %v2685_v55, 0.0  ;;  %v6343_v20 = vld [vmem:[#allocation19 + $0x20] ss:$8 sps:$4 sm:$0xff]   ;;  %v6348_v11 = vld [vmem:[#allocation19 + $0x14] ss:$8 sps:$4 sm:$0xff]  }
 0x481   : > { %v2652_v29 = vpop.f32.mrf.mxu1 }
 0x482   : > { %v2686_v19 = vadd.f32 %v8295_v52, %v2661_v50  ;;  %v2653_v37 = vadd.f32 %v5727_v40, %v2652_v29  ;;  %v2699_v0 = vmax.f32 %v2683_v48, 0.0  ;;  %v2717_v21 = vadd.f32 %v2701_v38, %v9152_v53  ;;  %v6346_v48 = vld [vmem:[#allocation19 + $0x10] ss:$8 sps:$4 sm:$0xff]   ;;  %v6351_v50 = vld [vmem:[#allocation19 + $0x4] ss:$8 sps:$4 sm:$0xff]  }
 0x483   : > { %v8382_v31 = vpop.f32.mrf.mxu1  ;;  %v6349_v29 = vld [vmem:[#allocation19] ss:$8 sps:$4 sm:$0xff]  }
 0x484   : > { %v2702_v60 = vmax.f32 %v2686_v19, 0.0  ;;  %v2684_v46 = vadd.f32 %v8295_v52, %v2653_v37  ;;  %v2715_v47 = vadd.f32 %v2699_v0, %v9150_v58  ;;  %v6326_v52 = vld [vmem:[#allocation17 + $0x40] sm:$0xff]   ;;  %v6357_v19 = vld [vmem:[#allocation19 + $0xf4] ss:$8 sps:$4 sm:$0xff]   ;;  %v6355_v0 = vld [vmem:[#allocation19 + $0xf0] ss:$8 sps:$4 sm:$0xff]  }
 0x485   : > { %5832 = vmatprep.subr.bf16.mxu0 %v6326_v52  ;;  %v8385_v45 = vpop.f32.mrf.mxu1  ;;  %v6361_v38 = vld [vmem:[#allocation19 + $0xe0] ss:$8 sps:$4 sm:$0xff]   ;;  %v6375_v58 = vld [vmem:[#allocation19 + $0xc4] ss:$8 sps:$4 sm:$0xff]  }
 0x486   : > { %v2700_v63 = vmax.f32 %v2684_v46, 0.0  ;;  %v2718_v6 = vadd.f32 %v2702_v60, %v9149_v43  ;;  %5833 = vmatpush3.bf16.msra.mxu0 %v6327_v27  ;;  %v6363_v60 = vld [vmem:[#allocation19 + $0xe4] ss:$8 sps:$4 sm:$0xff]   ;;  %v5762_v12 = vadd.f32 %v8385_v45, %v8382_v31 }
 0x487   : > { %v8388_v15 = vpop.f32.mrf.mxu1  ;;  %3893 = vmatprep.subr.bf16.mxu0 %v6330_v34 }
 0x488   : > { %v2716_v13 = vadd.f32 %v2700_v63, %v9151_v16  ;;  %v2726_v32 = vpack.c.bf16 %v2718_v6, %v2717_v21  ;;  %v6369_v63 = vld [vmem:[#allocation19 + $0xd4] ss:$8 sps:$4 sm:$0xff]   ;;  %v6367_v6 = vld [vmem:[#allocation19 + $0xd0] ss:$8 sps:$4 sm:$0xff]   ;;  %v6373_v16 = vld [vmem:[#allocation19 + $0xc0] ss:$8 sps:$4 sm:$0xff]  }
 0x489   : > { %v8391_v5 = vpop.f32.mrf.mxu1 }
 0x48a   : > { %v2725_v51 = vpack.c.bf16 %v2716_v13, %v2715_v47 }
 0x48b   : > { %v5766_v54 = vpop.f32.mrf.mxu1 }
 0x48c   : > { %5986 = vmatprep.mubr.msk.bf16.mxu0 %vm2542_vm1, %v2725_v51 }
 0x48d   : > { %5987 = vmatmul.mubr.msk.bf16.gmra.mxu0 %vm2542_vm1, %v2726_v32  ;;  %v5767_v56 = vpop.f32.mrf.mxu1 }
 0x48e   : > { %3320 = vmatprep.mubr.bf16.mxu0 %v7434_v39  ;;  %v5768_v32 = vadd.f32 %v5767_v56, %v5766_v54 }
 0x48f   : > { %v5769_v18 = vpop.f32.mrf.mxu1 }
 0x491   : > { %v5770_v10 = vpop.f32.mrf.mxu1 }
 0x493   : > { %v8394_v57 = vpop.f32.mrf.mxu1 }
 0x495   : > { %3321 = vmatmul.mubr.bf16.vlgmr.msra.gmra.mxu0 %v7439_v44  ;;  %v8396_v40 = vpop.f32.mrf.mxu1 }
 0x496   : > { %3328 = vmatprep.mubr.bf16.mxu0 %v7445_v49  ;;  %3894 = vmatpush1.bf16.msra.mxu0 %v6328_v26 }
 0x497   : > { %3895 = vmatprep.subr.bf16.mxu0 %v6333_v33  ;;  %v8398_v55 = vpop.f32.mrf.mxu1  ;;  %v5771_v33 = vadd.f32 %v5770_v10, %v5769_v18 }
 0x499   : > { %v8400_v37 = vpop.f32.mrf.mxu1 }
 0x49a   : > { %3896 = vmatpush1.bf16.msra.mxu0 %v6331_v14  ;;  %v8412_v14 = vld [vmem:[#allocation14] ss:$0 sm:$0xff] }
 0x49b   : > { %3897 = vmatprep.subr.bf16.mxu0 %v6336_v1  ;;  %v5778_v46 = vpop.f32.mrf.mxu1 }
 0x49d   : > { %3329 = vmatmul.mubr.bf16.gmra.mxu0 %v7457_v59  ;;  %v5779_v43 = vpop.f32.mrf.mxu1 }
 0x49e   : > { %3336 = vmatprep.mubr.bf16.mxu0 %v7459_v61  ;;  %3898 = vmatpush1.bf16.msra.mxu0 %v6334_v23 }
 0x49f   : > { %3899 = vmatprep.subr.bf16.mxu0 %v6339_v62  ;;  %v5781_v47 = vpop.f32.mrf.mxu1  ;;  %v5765_v62 = vadd.f32 %v8391_v5, %v8388_v15  ;;  %v9161_v5 = vld [vmem:[#allocation53_spill] sm:$0xff] }
 0x4a1   : > { %v5782_v13 = vpop.f32.mrf.mxu1 }
 0x4a2   : > { %3900 = vmatpush1.bf16.msra.mxu0 %v6337_v41 }
 0x4a3   : > { %3901 = vmatprep.subr.bf16.mxu0 %v6342_v8  ;;  %v8402_v53 = vpop.f32.mrf.mxu1 }
 0x4a5   : > { %3337 = vmatmul.mubr.bf16.gmra.mxu0 %v7471_v7  ;;  %v8404_v21 = vpop.f32.mrf.mxu1 }
 0x4a6   : > { %3344 = vmatprep.mubr.bf16.mxu0 %v7473_v9  ;;  %3902 = vmatpush1.bf16.msra.mxu0 %v6340_v30 }
 0x4a7   : > { %3903 = vmatprep.subr.bf16.mxu0 %v6345_v4  ;;  %v8406_v51 = vpop.f32.mrf.mxu1 }
 0x4a9   : > { %v8408_v27 = vpop.f32.mrf.mxu1 }
 0x4aa   : > { %3904 = vmatpush1.bf16.msra.mxu0 %v6343_v20 }
 0x4ab   : > { %3905 = vmatprep.subr.bf16.mxu0 %v6348_v11  ;;  %v8414_v23 = vpop.f32.mrf.mxu1 }
 0x4ad   : > { %3345 = vmatmul.mubr.bf16.gmra.mxu0 %v7494_v22  ;;  %v5791_v30 = vpop.f32.mrf.mxu1 }
 0x4ae   : > { %3352 = vmatprep.mubr.bf16.mxu0 %v7499_v25  ;;  %3906 = vmatpush1.bf16.msra.mxu0 %v6346_v48  ;;  %v9159_v48 = vld [vmem:[#allocation56_spill] sm:$0xff] }
 0x4af   : > { %3907 = vmatprep.subr.bf16.mxu0 %v6351_v50  ;;  %v9160_v50 = vmax.f32 %v9159_v48, 0.0  ;;  %v8424_v15 = vpop.f32.mrf.mxu1 }
 0x4b2   : > { %3908 = vmatpush1.bf16.msra.mxu0 %v6349_v29 }
 0x4b3   : > { %3909 = vmatprep.subr.bf16.mxu0 %v6357_v19  ;;  %v9162_v19 = vmax.f32 %v9161_v5, 0.0 }
 0x4b5   : > { %3353 = vmatmul.mubr.bf16.gmra.mxu0 %v7529_v42 }
 0x4b6   : > { %3360 = vmatprep.mubr.bf16.mxu0 %v9153_v28  ;;  %3910 = vmatpush2.bf16.msra.mxu0 %v6355_v0 }
 0x4b7   : > { %3911 = vmatprep.subr.bf16.mxu0 %v6363_v60  ;;  %v9163_v60 = vld [vmem:[#allocation54_spill] sm:$0xff] }
 0x4ba   : > { %3912 = vmatpush2.bf16.msra.mxu0 %v6361_v38  ;;  %v9164_v38 = vmax.f32 %v9163_v60, 0.0 }
 0x4bb   : > { %3913 = vmatprep.subr.bf16.mxu0 %v6369_v63 }
 0x4bd   : > { %3361 = vmatmul.mubr.bf16.gmra.mxu0 %v9154_v35 }
 0x4be   : > { %3368 = vmatprep.mubr.bf16.mxu0 %v9155_v24  ;;  %3914 = vmatpush2.bf16.msra.mxu0 %v6367_v6  ;;  %v9165_v6 = vld [vmem:[#allocation55_spill] sm:$0xff] }
 0x4bf   : > { %3915 = vmatprep.subr.bf16.mxu0 %v6375_v58  ;;  %v9166_v58 = vmax.f32 %v9165_v6, 0.0  ;;  %v9169_v6 = vld [vmem:[#allocation57_spill] sm:$0xff] }
 0x4c2   : > { %3916 = vmatpush2.bf16.msra.mxu0 %v6373_v16 }
 0x4c5   : > { %3369 = vmatmul.mubr.bf16.gmra.mxu0 %v9156_v3 }
 0x4c6   : > { %3376 = vmatprep.mubr.bf16.mxu0 %v9157_v17 }
 0x4cd   : > { %3377 = vmatmul.mubr.bf16.gmra.mxu0 %v9158_v2 }
 0x4ce   : > { %3925 = vmatprep.mubr.bf16.mxu0 %v7439_v44 }
 0x51d   : > { %v5976_v52 = vpop.f32.mrf.mxu0 }
 0x51e   : > { %v3035_v26 = vadd.f32 %v5976_v52, %v5768_v32  ;;  %v5780_v32 = vadd.f32 %v5779_v43, %v5778_v46 }
 0x51f   : > { %v3026_v34 = vpop.f32.mrf.mxu0 }
 0x520   : > { %v3027_v1 = vadd.f32 %v5762_v12, %v3026_v34  ;;  %v3098_v41 = vadd.f32 %v8412_v14, %v3035_v26  ;;  %v6352_v12 = vld [vmem:[#allocation19 + $0x170] ss:$8 sps:$4 sm:$0xff]  }
 0x521   : > { %v5977_v36 = vpop.f32.mrf.mxu0 }
 0x522   : > { %v3096_v54 = vadd.f32 %v8412_v14, %v3027_v1  ;;  %v3038_v56 = vadd.f32 %v5977_v36, %v5771_v33  ;;  %v3114_v20 = vmax.f32 %v3098_v41, 0.0  ;;  %v5794_v33 = vpop.f32.mrf.mxu1  ;;  %v6360_v1 = vld [vmem:[#allocation19 + $0x164] ss:$8 sps:$4 sm:$0xff]   ;;  %v5774_v36 = vadd.f32 %v8396_v40, %v8394_v57 }
 0x523   : > { %v3029_v8 = vpop.f32.mrf.mxu0 }
 0x524   : > { %v3099_v31 = vadd.f32 %v8412_v14, %v3038_v56  ;;  %v3030_v45 = vadd.f32 %v5765_v62, %v3029_v8  ;;  %v3112_v18 = vmax.f32 %v3096_v54, 0.0  ;;  %v3130_v16 = vadd.f32 %v3114_v20, %v9166_v58  ;;  %v6358_v8 = vld [vmem:[#allocation19 + $0x160] ss:$8 sps:$4 sm:$0xff]   ;;  %v8436_v43 = vpop.f32.mrf.mxu1 }
 0x525   : > { %v5783_v56 = vadd.f32 %v5782_v13, %v5781_v47  ;;  %v6364_v13 = vld [vmem:[#allocation19 + $0x150] ss:$8 sps:$4 sm:$0xff]   ;;  %v9170_v58 = vmax.f32 %v9169_v6, 0.0 }
 0x526   : > { %v3115_v10 = vmax.f32 %v3099_v31, 0.0  ;;  %v3097_v4 = vadd.f32 %v8412_v14, %v3030_v45  ;;  %v3128_v0 = vadd.f32 %v3112_v18, %v9162_v19  ;;  %v6366_v31 = vld [vmem:[#allocation19 + $0x154] ss:$8 sps:$4 sm:$0xff]   ;;  %v5777_v45 = vadd.f32 %v8400_v37, %v8398_v55  ;;  %v5797_v20 = vpop.f32.mrf.mxu1  ;;  %v6370_v37 = vld [vmem:[#allocation19 + $0x140] ss:$8 sps:$4 sm:$0xff]  }
 0x527   : > { %v9167_v19 = vld [vmem:[#allocation60_spill] sm:$0xff] }
 0x528   : > { %v3113_v11 = vmax.f32 %v3097_v4, 0.0  ;;  %v3131_v29 = vadd.f32 %v3115_v10, %v9160_v50 }
 0x52a   : > { %v3129_v63 = vadd.f32 %v3113_v11, %v9164_v38  ;;  %v3145_v26 = vpack.c.bf16 %v3131_v29, %v3130_v16  ;;  %v6372_v11 = vld [vmem:[#allocation19 + $0x144] ss:$8 sps:$4 sm:$0xff]   ;;  %v5799_v38 = vpop.f32.mrf.mxu1 }
 0x52c   : > { %v3144_v52 = vpack.c.bf16 %v3129_v63, %v3128_v0  ;;  %v9168_v0 = vmax.f32 %v9167_v19, 0.0  ;;  %v6378_v63 = vld [vmem:[#allocation19 + $0x134] ss:$8 sps:$4 sm:$0xff]  }
 0x52d   : > { %v5980_v34 = vpop.f32.mrf.mxu0 }
 0x52e   : > { %5998 = vmatprep.mubr.msk.bf16.mxu1 %vm2132_vm0, %v3144_v52  ;;  %v3051_v62 = vadd.f32 %v5980_v34, %v5780_v32  ;;  %v9171_v32 = vld [vmem:[#allocation58_spill] sm:$0xff] }
 0x52f   : > { %v3042_v54 = vpop.f32.mrf.mxu0  ;;  %5999 = vmatmul.mubr.msk.bf16.vlgmr.msra.gmra.mxu1 %vm2132_vm0, %v3145_v26  ;;  %v9172_v52 = vmax.f32 %v9171_v32, 0.0  ;;  %v9173_v26 = vld [vmem:[#allocation59_spill] sm:$0xff] }
 0x530   : > { %v3043_v41 = vadd.f32 %v5774_v36, %v3042_v54  ;;  %4007 = vmatpush1.bf16.msra.mxu1 %v6352_v12  ;;  %v3102_v18 = vadd.f32 %v8412_v14, %v3051_v62  ;;  %v9174_v34 = vmax.f32 %v9173_v26, 0.0  ;;  %v5792_v36 = vadd.f32 %v5791_v30, %v8414_v23  ;;  %v6376_v54 = vld [vmem:[#allocation19 + $0x130] ss:$8 sps:$4 sm:$0xff]  }
 0x531   : > { %v5981_v46 = vpop.f32.mrf.mxu0  ;;  %4008 = vmatprep.subr.bf16.mxu1 %v6360_v1 }
 0x532   : > { %v3100_v57 = vadd.f32 %v8412_v14, %v3043_v41  ;;  %v3054_v40 = vadd.f32 %v5981_v46, %v5783_v56  ;;  %v3118_v5 = vmax.f32 %v3102_v18, 0.0  ;;  %v5786_v46 = vadd.f32 %v8404_v21, %v8402_v53 }
 0x533   : > { %v3045_v10 = vpop.f32.mrf.mxu0  ;;  %v5789_v18 = vadd.f32 %v8408_v27, %v8406_v51  ;;  %v9177_v27 = vld [vmem:[#allocation61_spill] sm:$0xff] }
 0x534   : > { %v3103_v4 = vadd.f32 %v8412_v14, %v3054_v40  ;;  %v3046_v47 = vadd.f32 %v5777_v45, %v3045_v10  ;;  %4009 = vmatpush1.bf16.msra.mxu1 %v6358_v8  ;;  %v3116_v48 = vmax.f32 %v3100_v57, 0.0  ;;  %v3134_v1 = vadd.f32 %v3118_v5, %v9174_v34  ;;  %v5800_v8 = vpop.f32.mrf.mxu1  ;;  %v9175_v5 = vld [vmem:[#allocation64_spill] sm:$0xff] }
 0x535   : > { %4010 = vmatprep.subr.bf16.mxu1 %v6366_v31  ;;  %v5795_v57 = vadd.f32 %v5794_v33, %v8424_v15  ;;  %v9178_v19 = vmax.f32 %v9177_v27, 0.0  ;;  %v6379_v27 = vld [vmem:[#allocation19 + $0xb0] ss:$8 sps:$4 sm:$0xff]  }
 0x536   : > { %v3119_v50 = vmax.f32 %v3103_v4, 0.0  ;;  %v3101_v29 = vadd.f32 %v8412_v14, %v3046_v47  ;;  %v3132_v16 = vadd.f32 %v3116_v48, %v9170_v58  ;;  %v5802_v30 = vpop.f32.mrf.mxu1  ;;  %v9181_v58 = vld [vmem:[#allocation63_spill] sm:$0xff] }
 0x538   : > { %v3117_v55 = vmax.f32 %v3101_v29, 0.0  ;;  %4011 = vmatpush1.bf16.msra.mxu1 %v6364_v13  ;;  %v3135_v60 = vadd.f32 %v3119_v50, %v9168_v0 }
 0x539   : > { %4012 = vmatprep.subr.bf16.mxu1 %v6372_v11  ;;  %v5803_v11 = vpop.f32.mrf.mxu1 }
 0x53a   : > { %v3133_v12 = vadd.f32 %v3117_v55, %v9172_v52  ;;  %v3147_v56 = vpack.c.bf16 %v3135_v60, %v3134_v1  ;;  %v9176_v55 = vmax.f32 %v9175_v5, 0.0  ;;  %v9179_v60 = vld [vmem:[#allocation62_spill] sm:$0xff]  ;;  %v5804_v52 = vadd.f32 %v5803_v11, %v5802_v30  ;;  %v9185_v11 = vld [vmem:[#allocation65_spill] sm:$0xff] }
 0x53b   : > { %v5805_v51 = vpop.f32.mrf.mxu1 }
 0x53c   : > { %v3146_v62 = vpack.c.bf16 %v3133_v12, %v3132_v16  ;;  %4013 = vmatpush1.bf16.msra.mxu1 %v6370_v37  ;;  %v9182_v16 = vmax.f32 %v9181_v58, 0.0  ;;  %v6393_v58 = vld [vmem:[#allocation19 + $0x94] ss:$8 sps:$4 sm:$0xff]  }
 0x53d   : > { %v5984_v41 = vpop.f32.mrf.mxu0  ;;  %4014 = vmatprep.subr.bf16.mxu1 %v6378_v63  ;;  %v9180_v63 = vmax.f32 %v9179_v60, 0.0  ;;  %v5806_v34 = vpop.f32.mrf.mxu1  ;;  %v6390_v60 = vld [vmem:[#allocation19 + $0x114] ss:$8 sps:$4 sm:$0xff]  }
 0x53e   : > { %6002 = vmatprep.mubr.msk.bf16.mxu1 %vm2132_vm0, %v3146_v62  ;;  %v3067_v31 = vadd.f32 %v5984_v41, %v5792_v36  ;;  %v5798_v36 = vadd.f32 %v5797_v20, %v8436_v43 }
 0x53f   : > { %v3058_v45 = vpop.f32.mrf.mxu0  ;;  %6003 = vmatmul.mubr.msk.bf16.gmra.mxu1 %vm2132_vm0, %v3147_v56  ;;  %v5807_v56 = vadd.f32 %v5806_v34, %v5805_v51  ;;  %v6384_v51 = vld [vmem:[#allocation19 + $0x124] ss:$8 sps:$4 sm:$0xff]   ;;  %v6950_v34 = vmov 0  }
 0x540   : > { %v3059_v40 = vadd.f32 %v5786_v46, %v3058_v45  ;;  %4015 = vmatpush1.bf16.msra.mxu1 %v6376_v54  ;;  %v3106_v53 = vadd.f32 %v8412_v14, %v3067_v31  ;;  %v5801_v31 = vadd.f32 %v5800_v8, %v5799_v38  ;;  %v9186_v38 = vmax.f32 %v9185_v11, 0.0 }
 0x541   : > { %v5985_v23 = vpop.f32.mrf.mxu0  ;;  %4016 = vmatprep.subr.bf16.mxu1 %v6384_v51 }
 0x542   : > { %v3104_v10 = vadd.f32 %v8412_v14, %v3059_v40  ;;  %v3070_v4 = vadd.f32 %v5985_v23, %v5795_v57  ;;  %v3122_v33 = vmax.f32 %v3106_v53, 0.0 }
 0x543   : > { %v3061_v21 = vpop.f32.mrf.mxu0 }
 0x544   : > { %v3107_v47 = vadd.f32 %v8412_v14, %v3070_v4  ;;  %v3062_v13 = vadd.f32 %v5789_v18, %v3061_v21  ;;  %v3120_v48 = vmax.f32 %v3104_v10, 0.0  ;;  %v3138_v32 = vadd.f32 %v3122_v33, %v9182_v16  ;;  %v9183_v21 = vld [vmem:[#allocation68_spill] sm:$0xff]  ;;  %v9189_v33 = vld [vmem:[#allocation67_spill] sm:$0xff] }
 0x545   : > { %v6396_v16 = vld [vmem:[#allocation19 + $0x104] ss:$8 sps:$4 sm:$0xff]  }
 0x546   : > { %v3123_v50 = vmax.f32 %v3107_v47, 0.0  ;;  %v3105_v15 = vadd.f32 %v8412_v14, %v3062_v13  ;;  %v3136_v0 = vadd.f32 %v3120_v48, %v9178_v19  ;;  %v9184_v47 = vmax.f32 %v9183_v21, 0.0  ;;  %v9187_v48 = vld [vmem:[#allocation66_spill] sm:$0xff]  ;;  %v6382_v19 = vld [vmem:[#allocation19 + $0x120] ss:$8 sps:$4 sm:$0xff]  }
 0x547   : > { %4017 = vmatpush1.bf16.msra.mxu1 %v6382_v19  ;;  %v6465_v19 = vld [vmem:[#allocation20 + $0xd4] ss:$8 sps:$4 sm:$0xff]  }
 0x548   : > { %v3121_v29 = vmax.f32 %v3105_v15, 0.0  ;;  %v3139_v37 = vadd.f32 %v3123_v50, %v9176_v55  ;;  %v9188_v50 = vmax.f32 %v9187_v48, 0.0  ;;  %4018 = vmatprep.subr.bf16.mxu1 %v6390_v60  ;;  %v6463_v60 = vld [vmem:[#allocation20 + $0xd0] ss:$8 sps:$4 sm:$0xff]  }
 0x54a   : > { %v3137_v6 = vadd.f32 %v3121_v29, %v9180_v63  ;;  %v3149_v26 = vpack.c.bf16 %v3139_v37, %v3138_v32  ;;  %v9190_v29 = vmax.f32 %v9189_v33, 0.0  ;;  %v6385_v63 = vld [vmem:[#allocation19 + $0xa0] ss:$8 sps:$4 sm:$0xff]   ;;  %v6391_v32 = vld [vmem:[#allocation19 + $0x90] ss:$8 sps:$4 sm:$0xff]  }
 0x54c   : > { %v3148_v12 = vpack.c.bf16 %v3137_v6, %v3136_v0  ;;  %v6387_v0 = vld [vmem:[#allocation19 + $0xa4] ss:$8 sps:$4 sm:$0xff]   ;;  %v6388_v6 = vld [vmem:[#allocation19 + $0x110] ss:$8 sps:$4 sm:$0xff]  }
 0x54d   : > { %v5988_v1 = vpop.f32.mrf.mxu0  ;;  %4019 = vmatpush1.bf16.msra.mxu1 %v6388_v6 }
 0x54e   : > { %6006 = vmatprep.mubr.msk.bf16.mxu1 %vm2132_vm0, %v3148_v12  ;;  %v3083_v62 = vadd.f32 %v5988_v1, %v5804_v52  ;;  %v6394_v52 = vld [vmem:[#allocation19 + $0x100] ss:$8 sps:$4 sm:$0xff]   ;;  %4020 = vmatprep.subr.bf16.mxu1 %v6396_v16  ;;  %v6399_v12 = vld [vmem:[#allocation19 + $0x84] ss:$8 sps:$4 sm:$0xff]  }
 0x54f   : > { %v3074_v54 = vpop.f32.mrf.mxu0  ;;  %6007 = vmatmul.mubr.msk.bf16.gmra.mxu1 %vm2132_vm0, %v3149_v26  ;;  %v6397_v26 = vld [vmem:[#allocation19 + $0x80] ss:$8 sps:$4 sm:$0xff]  }
 0x550   : > { %v3075_v41 = vadd.f32 %v5798_v36, %v3074_v54  ;;  %v3110_v40 = vadd.f32 %v8412_v14, %v3083_v62 }
 0x551   : > { %v5989_v46 = vpop.f32.mrf.mxu0  ;;  %4021 = vmatpush1.bf16.msra.mxu1 %v6394_v52 }
 0x552   : > { %v3108_v45 = vadd.f32 %v8412_v14, %v3075_v41  ;;  %v3086_v57 = vadd.f32 %v5989_v46, %v5807_v56  ;;  %v3126_v4 = vmax.f32 %v3110_v40, 0.0  ;;  %v6402_v46 = vld [vmem:[#allocation20 + $0x174] ss:$8 sps:$4 sm:$0xff]  }
 0x553   : > { %v3077_v23 = vpop.f32.mrf.mxu0 }
 0x554   : > { %v3111_v30 = vadd.f32 %v8412_v14, %v3086_v57  ;;  %v3078_v18 = vadd.f32 %v5801_v31, %v3077_v23  ;;  %v3124_v43 = vmax.f32 %v3108_v45, 0.0  ;;  %v3142_v5 = vadd.f32 %v3126_v4, %v9190_v29  ;;  %v6403_v31 = vld [vmem:[#allocation20 + $0x70] ss:$8 sps:$4 sm:$0xff]   ;;  %v6405_v45 = vld [vmem:[#allocation20 + $0x74] ss:$8 sps:$4 sm:$0xff]  }
 0x555   : > { %v8494_v1 = vpop.f32.mrf.mxu0  ;;  %v6411_v57 = vld [vmem:[#allocation20 + $0x64] ss:$8 sps:$4 sm:$0xff]   ;;  %4595 = vmatprep.subr.bf16.mxu1 %v6405_v45  ;;  %v6409_v23 = vld [vmem:[#allocation20 + $0x60] ss:$8 sps:$4 sm:$0xff]   ;;  %v8534_v45 = vld [vmem:[%s8933_s17] ss:$0 sm:$0xff] }
 0x556   : > { %v3127_v20 = vmax.f32 %v3111_v30, 0.0  ;;  %v3109_v10 = vadd.f32 %v8412_v14, %v3078_v18  ;;  %v3140_v8 = vadd.f32 %v3124_v43, %v9186_v38  ;;  %v6381_v14 = vld [vmem:[#allocation19 + $0xb4] ss:$8 sps:$4 sm:$0xff]   ;;  %v6415_v43 = vld [vmem:[#allocation20 + $0x50] ss:$8 sps:$4 sm:$0xff]  }
 0x557   : > { %3917 = vmatprep.subr.bf16.mxu0 %v6381_v14  ;;  %v8497_v36 = vpop.f32.mrf.mxu0  ;;  %v6417_v30 = vld [vmem:[#allocation20 + $0x54] ss:$8 sps:$4 sm:$0xff]   ;;  %v6421_v4 = vld [vmem:[#allocation20 + $0x40] ss:$8 sps:$4 sm:$0xff]   ;;  %v6459_v14 = vld [vmem:[#allocation20 + $0xe4] ss:$8 sps:$4 sm:$0xff]  }
 0x558   : > { %v3125_v53 = vmax.f32 %v3109_v10, 0.0  ;;  %v3143_v13 = vadd.f32 %v3127_v20, %v9184_v47  ;;  %3918 = vmatpush2.bf16.msra.mxu0 %v6379_v27  ;;  %v6423_v20 = vld [vmem:[#allocation20 + $0x44] ss:$8 sps:$4 sm:$0xff]   ;;  %v6427_v47 = vld [vmem:[#allocation20 + $0x30] ss:$8 sps:$4 sm:$0xff]  }
 0x559   : > { %3919 = vmatprep.subr.bf16.mxu0 %v6387_v0  ;;  %v8499_v62 = vpop.f32.mrf.mxu0  ;;  %v6433_v38 = vld [vmem:[#allocation20 + $0x20] ss:$8 sps:$4 sm:$0xff]  }
 0x55a   : > { %v3141_v15 = vadd.f32 %v3125_v53, %v9188_v50  ;;  %v3151_v37 = vpack.c.bf16 %v3143_v13, %v3142_v5  ;;  %v6429_v53 = vld [vmem:[#allocation20 + $0x34] ss:$8 sps:$4 sm:$0xff]   ;;  %v6435_v13 = vld [vmem:[#allocation20 + $0x24] ss:$8 sps:$4 sm:$0xff]   ;;  %v6439_v50 = vld [vmem:[#allocation20 + $0x10] ss:$8 sps:$4 sm:$0xff]  }
 0x55b   : > { %v8502_v54 = vpop.f32.mrf.mxu0  ;;  %v6445_v29 = vld [vmem:[#allocation20] ss:$8 sps:$4 sm:$0xff]   ;;  %v6453_v5 = vld [vmem:[#allocation20 + $0xf4] ss:$8 sps:$4 sm:$0xff]  }
 0x55c   : > { %v3150_v55 = vpack.c.bf16 %v3141_v15, %v3140_v8  ;;  %3920 = vmatpush2.bf16.msra.mxu0 %v6385_v63  ;;  %v6441_v8 = vld [vmem:[#allocation20 + $0x14] ss:$8 sps:$4 sm:$0xff]   ;;  %v6447_v15 = vld [vmem:[#allocation20 + $0x4] ss:$8 sps:$4 sm:$0xff]   ;;  %v6457_v27 = vld [vmem:[#allocation20 + $0xe0] ss:$8 sps:$4 sm:$0xff]  }
 0x55d   : > { %3921 = vmatprep.subr.bf16.mxu0 %v6393_v58  ;;  %v8504_v56 = vpop.f32.mrf.mxu0  ;;  %v6471_v63 = vld [vmem:[#allocation20 + $0xc4] ss:$8 sps:$4 sm:$0xff]   ;;  %v6469_v58 = vld [vmem:[#allocation20 + $0xc0] ss:$8 sps:$4 sm:$0xff]  }
 0x55e   : > { %6010 = vmatprep.mubr.msk.bf16.mxu1 %vm2132_vm0, %v3150_v55 }
 0x55f   : > { %6011 = vmatmul.mubr.msk.bf16.gmra.mxu1 %vm2132_vm0, %v3151_v37  ;;  %v8507_v41 = vpop.f32.mrf.mxu0  ;;  %v6451_v37 = vld [vmem:[#allocation20 + $0xf0] ss:$8 sps:$4 sm:$0xff]  }
 0x560   : > { %3922 = vmatpush2.bf16.msra.mxu0 %v6391_v32  ;;  %4038 = vmatprep.mubr.bf16.mxu1 %v6950_v34 }
 0x561   : > { %3923 = vmatprep.subr.bf16.mxu0 %v6399_v12  ;;  %v5843_v40 = vpop.f32.mrf.mxu0 }
 0x563   : > { %v5844_v18 = vpop.f32.mrf.mxu0 }
 0x564   : > { %3924 = vmatpush2.bf16.msra.mxu0 %v6397_v26  ;;  %v5836_v26 = vadd.f32 %v8497_v36, %v8494_v1 }
 0x565   : > { %4708 = vmatprep.subr.bf16.mxu0 %v6402_v46  ;;  %v8509_v10 = vpop.f32.mrf.mxu0  ;;  %v5845_v46 = vadd.f32 %v5844_v18, %v5843_v40 }
 0x567   : > { %4039 = vmatmul.mubr.bf16.vlgmr.msra.gmra.mxu1 %v7434_v39  ;;  %v8511_v21 = vpop.f32.mrf.mxu0 }
 0x568   : > { %4048 = vmatprep.mubr.bf16.mxu1 %v6950_v34  ;;  %4596 = vmatpush1.bf16.msra.mxu1 %v6403_v31 }
 0x569   : > { %4597 = vmatprep.subr.bf16.mxu1 %v6411_v57  ;;  %v8513_v11 = vpop.f32.mrf.mxu0 }
 0x56b   : > { %v8515_v48 = vpop.f32.mrf.mxu0 }
 0x56c   : > { %4598 = vmatpush1.bf16.msra.mxu1 %v6409_v23 }
 0x56d   : > { %4599 = vmatprep.subr.bf16.mxu1 %v6417_v30  ;;  %v8517_v33 = vpop.f32.mrf.mxu0  ;;  %v5839_v30 = vadd.f32 %v8502_v54, %v8499_v62  ;;  %v9191_v54 = vld [vmem:[#allocation37_spill] sm:$0xff] }
 0x56f   : > { %4049 = vmatmul.mubr.bf16.gmra.mxu1 %v7445_v49  ;;  %v8519_v55 = vpop.f32.mrf.mxu0 }
 0x570   : > { %4058 = vmatprep.mubr.bf16.mxu1 %v6950_v34  ;;  %4600 = vmatpush1.bf16.msra.mxu1 %v6415_v43  ;;  %v5842_v43 = vadd.f32 %v8507_v41, %v8504_v56  ;;  %v9192_v56 = vmax.f32 %v9191_v54, 0.0 }
 0x571   : > { %4601 = vmatprep.subr.bf16.mxu1 %v6423_v20  ;;  %v5855_v51 = vpop.f32.mrf.mxu0 }
 0x573   : > { %v5856_v0 = vpop.f32.mrf.mxu0 }
 0x574   : > { %4602 = vmatpush1.bf16.msra.mxu1 %v6421_v4 }
 0x575   : > { %4603 = vmatprep.subr.bf16.mxu1 %v6429_v53  ;;  %v8521_v6 = vpop.f32.mrf.mxu0 }
 0x577   : > { %4059 = vmatmul.mubr.bf16.gmra.mxu1 %v7459_v61  ;;  %v8523_v16 = vpop.f32.mrf.mxu0 }
 0x578   : > { %4068 = vmatprep.mubr.bf16.mxu1 %v6950_v34  ;;  %4604 = vmatpush1.bf16.msra.mxu1 %v6427_v47 }
 0x579   : > { %4605 = vmatprep.subr.bf16.mxu1 %v6435_v13  ;;  %v8525_v32 = vpop.f32.mrf.mxu0 }
 0x57b   : > { %v8527_v12 = vpop.f32.mrf.mxu0 }
 0x57c   : > { %4606 = vmatpush1.bf16.msra.mxu1 %v6433_v38 }
 0x57d   : > { %4607 = vmatprep.subr.bf16.mxu1 %v6441_v8  ;;  %v8536_v23 = vpop.f32.mrf.mxu0 }
 0x57f   : > { %4069 = vmatmul.mubr.bf16.gmra.mxu1 %v7473_v9  ;;  %v8543_v18 = vpop.f32.mrf.mxu0 }
 0x580   : > { %4078 = vmatprep.mubr.bf16.mxu1 %v6950_v34  ;;  %4608 = vmatpush1.bf16.msra.mxu1 %v6439_v50  ;;  %v9193_v50 = vld [vmem:[#allocation38_spill] sm:$0xff] }
 0x581   : > { %4609 = vmatprep.subr.bf16.mxu1 %v6447_v15  ;;  %v8547_v8 = vpop.f32.mrf.mxu0  ;;  %v9194_v15 = vmax.f32 %v9193_v50, 0.0 }
 0x584   : > { %4610 = vmatpush1.bf16.msra.mxu1 %v6445_v29 }
 0x585   : > { %4611 = vmatprep.subr.bf16.mxu1 %v6453_v5  ;;  %v6400_v5 = vld [vmem:[#allocation20 + $0x170] ss:$8 sps:$4 sm:$0xff]  }
 0x587   : > { %4079 = vmatmul.mubr.bf16.gmra.mxu1 %v7499_v25 }
 0x588   : > { %4088 = vmatprep.mubr.bf16.mxu1 %v6950_v34  ;;  %4612 = vmatpush2.bf16.msra.mxu1 %v6451_v37 }
 0x589   : > { %4613 = vmatprep.subr.bf16.mxu1 %v6459_v14 }
 0x58c   : > { %4614 = vmatpush2.bf16.msra.mxu1 %v6457_v27  ;;  %v6408_v27 = vld [vmem:[#allocation20 + $0x164] ss:$8 sps:$4 sm:$0xff]  }
 0x58d   : > { %4615 = vmatprep.subr.bf16.mxu1 %v6465_v19 }
 0x58f   : > { %4089 = vmatmul.mubr.bf16.gmra.mxu1 %v9153_v28 }
 0x590   : > { %4098 = vmatprep.mubr.bf16.mxu1 %v6950_v34  ;;  %4616 = vmatpush2.bf16.msra.mxu1 %v6463_v60  ;;  %v5868_v60 = vpop.f32.mrf.mxu0 }
 0x591   : > { %4617 = vmatprep.subr.bf16.mxu1 %v6471_v63 }
 0x594   : > { %4618 = vmatpush2.bf16.msra.mxu1 %v6469_v58  ;;  %v5848_v58 = vadd.f32 %v8511_v21, %v8509_v10  ;;  %v5851_v10 = vadd.f32 %v8515_v48, %v8513_v11  ;;  %v5854_v21 = vadd.f32 %v8519_v55, %v8517_v33  ;;  %v6418_v11 = vld [vmem:[#allocation20 + $0x140] ss:$8 sps:$4 sm:$0xff]   ;;  %v6426_v55 = vld [vmem:[#allocation20 + $0x134] ss:$8 sps:$4 sm:$0xff]  }
 0x597   : > { %4099 = vmatmul.mubr.bf16.gmra.mxu1 %v9155_v24 }
 0x598   : > { %4108 = vmatprep.mubr.bf16.mxu1 %v6950_v34 }
 0x59f   : > { %4109 = vmatmul.mubr.bf16.gmra.mxu1 %v9157_v17 }
 0x5ef   : > { %v6000_v52 = vpop.f32.mrf.mxu1 }
 0x5f0   : > { %v3476_v4 = vadd.f32 %v6000_v52, %v5842_v43  ;;  %v6414_v43 = vld [vmem:[#allocation20 + $0x154] ss:$8 sps:$4 sm:$0xff]  }
 0x5f1   : > { %v3467_v34 = vpop.f32.mrf.mxu1 }
 0x5f2   : > { %v3468_v31 = vadd.f32 %v5836_v26, %v3467_v34  ;;  %v3539_v62 = vadd.f32 %v8534_v45, %v3476_v4  ;;  %v6406_v26 = vld [vmem:[#allocation20 + $0x160] ss:$8 sps:$4 sm:$0xff]  }
 0x5f3   : > { %v6001_v57 = vpop.f32.mrf.mxu1  ;;  %v9195_v34 = vld [vmem:[#allocation40_spill] sm:$0xff] }
 0x5f4   : > { %v3537_v20 = vadd.f32 %v8534_v45, %v3468_v31  ;;  %v3479_v36 = vadd.f32 %v6001_v57, %v5845_v46  ;;  %v3555_v63 = vmax.f32 %v3539_v62, 0.0  ;;  %v9196_v46 = vmax.f32 %v9195_v34, 0.0  ;;  %v6420_v62 = vld [vmem:[#allocation20 + $0x144] ss:$8 sps:$4 sm:$0xff]  }
 0x5f5   : > { %v3470_v1 = vpop.f32.mrf.mxu1  ;;  %v5857_v57 = vadd.f32 %v5856_v0, %v5855_v51  ;;  %v6412_v51 = vld [vmem:[#allocation20 + $0x150] ss:$8 sps:$4 sm:$0xff]   ;;  %v6432_v34 = vld [vmem:[#allocation20 + $0x124] ss:$8 sps:$4 sm:$0xff]  }
 0x5f6   : > { %v3471_v40 = vadd.f32 %v5839_v30, %v3470_v1  ;;  %v3553_v53 = vmax.f32 %v3537_v20, 0.0  ;;  %v3540_v13 = vadd.f32 %v8534_v45, %v3479_v36  ;;  %v8559_v1 = vpop.f32.mrf.mxu0  ;;  %v9197_v36 = vld [vmem:[#allocation39_spill] sm:$0xff] }
 0x5f8   : > { %v3538_v47 = vadd.f32 %v8534_v45, %v3471_v40  ;;  %v3569_v41 = vadd.f32 %v3553_v53, %v9192_v56  ;;  %v3556_v37 = vmax.f32 %v3540_v13, 0.0  ;;  %v9198_v40 = vmax.f32 %v9197_v36, 0.0  ;;  %v8568_v54 = vpop.f32.mrf.mxu0  ;;  %v9203_v36 = vld [vmem:[#allocation44_spill] sm:$0xff] }
 0x5fa   : > { %v3554_v38 = vmax.f32 %v3538_v47, 0.0  ;;  %v3572_v31 = vadd.f32 %v3556_v37, %v9196_v46  ;;  %v3571_v4 = vadd.f32 %v3555_v63, %v9198_v40  ;;  %v9204_v40 = vmax.f32 %v9203_v36, 0.0 }
 0x5fb   : > { %v5872_v36 = vadd.f32 %v8568_v54, %v8559_v1 }
 0x5fc   : > { %v3570_v29 = vadd.f32 %v3554_v38, %v9194_v15  ;;  %v3586_v0 = vpack.c.bf16 %v3572_v31, %v3571_v4  ;;  %v8573_v15 = vpop.f32.mrf.mxu0 }
 0x5fe   : > { %v3585_v14 = vpack.c.bf16 %v3570_v29, %v3569_v41  ;;  %v8580_v31 = vpop.f32.mrf.mxu0 }
 0x5ff   : > { %v6004_v19 = vpop.f32.mrf.mxu1  ;;  %v5875_v1 = vadd.f32 %v8580_v31, %v8573_v15  ;;  %v6466_v15 = vld [vmem:[#allocation20 + $0x1c0] ss:$8 sps:$4 sm:$0xff]  }
 0x600   : > { %3926 = vmatmul.mubr.bf16.vlgmr.msra.gmra.mxu0 %v3585_v14  ;;  %v3492_v56 = vadd.f32 %v6004_v19, %v5854_v21 }
 0x601   : > { %v3483_v52 = vpop.f32.mrf.mxu1  ;;  %3935 = vmatprep.mubr.bf16.mxu0 %v7457_v59  ;;  %4709 = vmatpush1.bf16.msra.mxu0 %v6400_v5  ;;  %v9199_v5 = vld [vmem:[#allocation41_spill] sm:$0xff] }
 0x602   : > { %v3484_v30 = vadd.f32 %v5848_v58, %v3483_v52  ;;  %4710 = vmatprep.subr.bf16.mxu0 %v6408_v27  ;;  %v3543_v29 = vadd.f32 %v8534_v45, %v3492_v56  ;;  %v9200_v37 = vmax.f32 %v9199_v5, 0.0  ;;  %v9201_v27 = vld [vmem:[#allocation42_spill] sm:$0xff] }
 0x603   : > { %v6005_v20 = vpop.f32.mrf.mxu1  ;;  %v9202_v19 = vmax.f32 %v9201_v27, 0.0  ;;  %v6424_v58 = vld [vmem:[#allocation20 + $0x130] ss:$8 sps:$4 sm:$0xff]  }
 0x604   : > { %v3541_v53 = vadd.f32 %v8534_v45, %v3484_v30  ;;  %v3495_v13 = vadd.f32 %v6005_v20, %v5857_v57  ;;  %v3559_v57 = vmax.f32 %v3543_v29, 0.0  ;;  %v5860_v30 = vadd.f32 %v8523_v16, %v8521_v6  ;;  %v6430_v20 = vld [vmem:[#allocation20 + $0x120] ss:$8 sps:$4 sm:$0xff]  }
 0x605   : > { %v3486_v47 = vpop.f32.mrf.mxu1  ;;  %4711 = vmatpush1.bf16.msra.mxu0 %v6406_v26  ;;  %v5863_v6 = vadd.f32 %v8527_v12, %v8525_v32  ;;  %v5866_v16 = vadd.f32 %v8543_v18, %v8536_v23  ;;  %v6442_v32 = vld [vmem:[#allocation20 + $0x100] ss:$8 sps:$4 sm:$0xff]   ;;  %v6450_v18 = vld [vmem:[#allocation20 + $0x1f4] ss:$8 sps:$4 sm:$0xff]  }
 0x606   : > { %v3487_v38 = vadd.f32 %v5851_v10, %v3486_v47  ;;  %4712 = vmatprep.subr.bf16.mxu0 %v6414_v43  ;;  %v3557_v41 = vmax.f32 %v3541_v53, 0.0  ;;  %v3544_v48 = vadd.f32 %v8534_v45, %v3495_v13  ;;  %v5869_v10 = vadd.f32 %v5868_v60, %v8547_v8  ;;  %v6438_v53 = vld [vmem:[#allocation20 + $0x114] ss:$8 sps:$4 sm:$0xff]  }
 0x608   : > { %v3542_v50 = vadd.f32 %v8534_v45, %v3487_v38  ;;  %3936 = vmatmul.mubr.bf16.gmra.mxu0 %v3586_v0  ;;  %v3573_v14 = vadd.f32 %v3557_v41, %v9200_v37  ;;  %v3560_v52 = vmax.f32 %v3544_v48, 0.0  ;;  %v9205_v0 = vld [vmem:[#allocation43_spill] sm:$0xff]  ;;  %v6436_v41 = vld [vmem:[#allocation20 + $0x110] ss:$8 sps:$4 sm:$0xff]  }
 0x609   : > { %3945 = vmatprep.mubr.bf16.mxu0 %v7471_v7  ;;  %4713 = vmatpush1.bf16.msra.mxu0 %v6412_v51  ;;  %v5876_v51 = vpop.f32.mrf.mxu0  ;;  %v9206_v13 = vmax.f32 %v9205_v0, 0.0 }
 0x60a   : > { %v3558_v33 = vmax.f32 %v3542_v50, 0.0  ;;  %4714 = vmatprep.subr.bf16.mxu0 %v6420_v62  ;;  %v3576_v4 = vadd.f32 %v3560_v52, %v9204_v40 }
 0x60b   : > { %v3575_v38 = vadd.f32 %v3559_v57, %v9206_v13  ;;  %v5877_v48 = vpop.f32.mrf.mxu0  ;;  %v6456_v57 = vld [vmem:[#allocation20 + $0x1e4] ss:$8 sps:$4 sm:$0xff]   ;;  %v6462_v13 = vld [vmem:[#allocation20 + $0x1d4] ss:$8 sps:$4 sm:$0xff]  }
 0x60c   : > { %v3574_v63 = vadd.f32 %v3558_v33, %v9202_v19  ;;  %v5878_v54 = vadd.f32 %v5877_v48, %v5876_v51  ;;  %v6474_v48 = vld [vmem:[#allocation20 + $0x1b4] ss:$8 sps:$4 sm:$0xff]  }
 0x60d   : > { %4715 = vmatpush1.bf16.msra.mxu0 %v6418_v11  ;;  %v3588_v8 = vpack.c.bf16 %v3576_v4, %v3575_v38  ;;  %v6444_v11 = vld [vmem:[#allocation20 + $0x104] ss:$8 sps:$4 sm:$0xff]   ;;  %v5879_v5 = vpop.f32.mrf.mxu0  ;;  %v6454_v4 = vld [vmem:[#allocation20 + $0x1e0] ss:$8 sps:$4 sm:$0xff]  }
 0x60e   : > { %v3587_v26 = vpack.c.bf16 %v3574_v63, %v3573_v14  ;;  %4716 = vmatprep.subr.bf16.mxu0 %v6426_v55  ;;  %v9207_v14 = vld [vmem:[#allocation45_spill] sm:$0xff]  ;;  %v9209_v63 = vld [vmem:[#allocation46_spill] sm:$0xff] }
 0x60f   : > { %v6008_v46 = vpop.f32.mrf.mxu1  ;;  %v9208_v27 = vmax.f32 %v9207_v14, 0.0 }
 0x610   : > { %3946 = vmatmul.mubr.bf16.gmra.mxu0 %v3587_v26  ;;  %v3508_v33 = vadd.f32 %v6008_v46, %v5866_v16  ;;  %v6448_v26 = vld [vmem:[#allocation20 + $0x1f0] ss:$8 sps:$4 sm:$0xff]  }
 0x611   : > { %v3499_v43 = vpop.f32.mrf.mxu1  ;;  %3955 = vmatprep.mubr.bf16.mxu0 %v7494_v22  ;;  %4717 = vmatpush1.bf16.msra.mxu0 %v6424_v58  ;;  %v9210_v58 = vmax.f32 %v9209_v63, 0.0 }
 0x612   : > { %v3500_v21 = vadd.f32 %v5860_v30, %v3499_v43  ;;  %4718 = vmatprep.subr.bf16.mxu0 %v6432_v34  ;;  %v3547_v37 = vadd.f32 %v8534_v45, %v3508_v33  ;;  %v5880_v43 = vpop.f32.mrf.mxu0  ;;  %v6468_v33 = vld [vmem:[#allocation20 + $0x1c4] ss:$8 sps:$4 sm:$0xff]  }
 0x613   : > { %v6009_v47 = vpop.f32.mrf.mxu1 }
 0x614   : > { %v3545_v62 = vadd.f32 %v8534_v45, %v3500_v21  ;;  %v3511_v60 = vadd.f32 %v6009_v47, %v5869_v10  ;;  %v9211_v10 = vld [vmem:[#allocation48_spill] sm:$0xff]  ;;  %v5881_v47 = vadd.f32 %v5880_v43, %v5879_v5 }
 0x615   : > { %v3502_v56 = vpop.f32.mrf.mxu1  ;;  %4719 = vmatpush1.bf16.msra.mxu0 %v6430_v20  ;;  %v3563_v20 = vmax.f32 %v3547_v37, 0.0  ;;  %v9212_v21 = vmax.f32 %v9211_v10, 0.0  ;;  %v9217_v37 = vld [vmem:[#allocation50_spill] sm:$0xff]  ;;  %v6483_v10 = vld [vmem:[#allocation20 + $0xa4] ss:$8 sps:$4 sm:$0xff]  }
 0x616   : > { %v3503_v50 = vadd.f32 %v5863_v6, %v3502_v56  ;;  %4720 = vmatprep.subr.bf16.mxu0 %v6438_v53  ;;  %v3561_v55 = vmax.f32 %v3545_v62, 0.0  ;;  %v3548_v12 = vadd.f32 %v8534_v45, %v3511_v60  ;;  %v9213_v6 = vld [vmem:[#allocation47_spill] sm:$0xff]  ;;  %v9218_v14 = vmax.f32 %v9217_v37, 0.0 }
 0x617   : > { %v9214_v16 = vmax.f32 %v9213_v6, 0.0  ;;  %v6495_v6 = vld [vmem:[#allocation20 + $0x84] ss:$8 sps:$4 sm:$0xff]  }
 0x618   : > { %v3546_v29 = vadd.f32 %v8534_v45, %v3503_v50  ;;  %3956 = vmatmul.mubr.bf16.gmra.mxu0 %v3588_v8  ;;  %v3577_v19 = vadd.f32 %v3561_v55, %v9208_v27  ;;  %v3564_v34 = vmax.f32 %v3548_v12, 0.0  ;;  %v6460_v8 = vld [vmem:[#allocation20 + $0x1d0] ss:$8 sps:$4 sm:$0xff]  }
 0x619   : > { %3965 = vmatprep.mubr.bf16.mxu0 %v7529_v42  ;;  %4721 = vmatpush1.bf16.msra.mxu0 %v6436_v41  ;;  %v3579_v62 = vadd.f32 %v3563_v20, %v9214_v16  ;;  %v6477_v20 = vld [vmem:[#allocation20 + $0xb4] ss:$8 sps:$4 sm:$0xff]   ;;  %v6493_v16 = vld [vmem:[#allocation20 + $0x80] ss:$8 sps:$4 sm:$0xff]  }
 0x61a   : > { %v3562_v23 = vmax.f32 %v3546_v29, 0.0  ;;  %4722 = vmatprep.subr.bf16.mxu0 %v6444_v11  ;;  %v3580_v53 = vadd.f32 %v3564_v34, %v9212_v21  ;;  %4619 = vmatprep.subr.bf16.mxu1 %v6477_v20  ;;  %v6486_v21 = vld [vmem:[#allocation20 + $0x194] ss:$8 sps:$4 sm:$0xff]  }
 0x61c   : > { %v3578_v52 = vadd.f32 %v3562_v23, %v9210_v58  ;;  %v3590_v60 = vpack.c.bf16 %v3580_v53, %v3579_v62  ;;  %v9215_v23 = vld [vmem:[#allocation49_spill] sm:$0xff]  ;;  %v6481_v53 = vld [vmem:[#allocation20 + $0xa0] ss:$8 sps:$4 sm:$0xff]  }
 0x61d   : > { %4723 = vmatpush1.bf16.msra.mxu0 %v6442_v32 }
 0x61e   : > { %v3589_v46 = vpack.c.bf16 %v3578_v52, %v3577_v19  ;;  %4724 = vmatprep.subr.bf16.mxu0 %v6450_v18  ;;  %v9216_v18 = vmax.f32 %v9215_v23, 0.0  ;;  %v6472_v19 = vld [vmem:[#allocation20 + $0x1b0] ss:$8 sps:$4 sm:$0xff]  }
 0x61f   : > { %v6012_v30 = vpop.f32.mrf.mxu1 }
 0x620   : > { %3966 = vmatmul.mubr.bf16.gmra.mxu0 %v3589_v46  ;;  %v3524_v55 = vadd.f32 %v6012_v30, %v5878_v54  ;;  %v3641_v54 = vld [vmem:[%s9223_s25] sm:$0x3]  ;;  %s8869_s25 = scalar_lea.hbm %s9226_s9, %s5385_s4 }
 0x621   : > { %v3515_v40 = vpop.f32.mrf.mxu1  ;;  %3975 = vmatprep.mubr.bf16.mxu0 %v9154_v35  ;;  %4725 = vmatpush2.bf16.msra.mxu0 %v6448_v26  ;;  %v9219_v26 = vld [vmem:[#allocation52_spill] sm:$0xff] }
 0x622   : > { %v3516_v0 = vadd.f32 %v5872_v36, %v3515_v40  ;;  %4726 = vmatprep.subr.bf16.mxu0 %v6456_v57  ;;  %v3551_v12 = vadd.f32 %v8534_v45, %v3524_v55  ;;  %v9220_v34 = vmax.f32 %v9219_v26, 0.0  ;;  %v6480_v36 = vld [vmem:[#allocation20 + $0x1a4] ss:$8 sps:$4 sm:$0xff]   ;;  %v6475_v40 = vld [vmem:[#allocation20 + $0xb0] ss:$8 sps:$4 sm:$0xff]  }
 0x623   : > { %v6013_v38 = vpop.f32.mrf.mxu1  ;;  %4620 = vmatpush2.bf16.msra.mxu1 %v6475_v40 }
 0x624   : > { %v3549_v56 = vadd.f32 %v8534_v45, %v3516_v0  ;;  %v3527_v50 = vadd.f32 %v6013_v38, %v5881_v47  ;;  %v3567_v52 = vmax.f32 %v3551_v12, 0.0  ;;  %v6484_v47 = vld [vmem:[#allocation20 + $0x190] ss:$8 sps:$4 sm:$0xff]   ;;  %4621 = vmatprep.subr.bf16.mxu1 %v6483_v10  ;;  %v6489_v0 = vld [vmem:[#allocation20 + $0x94] ss:$8 sps:$4 sm:$0xff]  }
 0x625   : > { %v3518_v41 = vpop.f32.mrf.mxu1  ;;  %4727 = vmatpush2.bf16.msra.mxu0 %v6454_v4  ;;  %v6478_v4 = vld [vmem:[#allocation20 + $0x1a0] ss:$8 sps:$4 sm:$0xff]   ;;  %v6487_v38 = vld [vmem:[#allocation20 + $0x90] ss:$8 sps:$4 sm:$0xff]  }
 0x626   : > { %v3519_v11 = vadd.f32 %v5875_v1, %v3518_v41  ;;  %4728 = vmatprep.subr.bf16.mxu0 %v6462_v13  ;;  %v3565_v29 = vmax.f32 %v3549_v56, 0.0  ;;  %v3552_v31 = vadd.f32 %v8534_v45, %v3527_v50  ;;  %v6492_v13 = vld [vmem:[#allocation20 + $0x184] ss:$8 sps:$4 sm:$0xff]  }
 0x627   : > { %4622 = vmatpush2.bf16.msra.mxu1 %v6481_v53 }
 0x628   : > { %v3550_v32 = vadd.f32 %v8534_v45, %v3519_v11  ;;  %3976 = vmatmul.mubr.bf16.gmra.mxu0 %v3590_v60  ;;  %v3581_v5 = vadd.f32 %v3565_v29, %v9216_v18  ;;  %v3568_v63 = vmax.f32 %v3552_v31, 0.0  ;;  %v9221_v45 = vld [vmem:[#allocation51_spill] sm:$0xff]  ;;  %4623 = vmatprep.subr.bf16.mxu1 %v6489_v0 }
 0x629   : > { %3985 = vmatprep.mubr.bf16.mxu0 %v9156_v3  ;;  %4729 = vmatpush2.bf16.msra.mxu0 %v6460_v8  ;;  %v9222_v57 = vmax.f32 %v9221_v45, 0.0 }
 0x62a   : > { %v3566_v51 = vmax.f32 %v3550_v32, 0.0  ;;  %4730 = vmatprep.subr.bf16.mxu0 %v6468_v33  ;;  %v3584_v46 = vadd.f32 %v3568_v63, %v9220_v34 }
 0x62b   : > { %v3583_v30 = vadd.f32 %v3567_v52, %v9222_v57  ;;  %4624 = vmatpush2.bf16.msra.mxu1 %v6487_v38 }
 0x62c   : > { %v3582_v27 = vadd.f32 %v3566_v51, %v9218_v14  ;;  %4625 = vmatprep.subr.bf16.mxu1 %v6495_v6 }
 0x62d   : > { %4731 = vmatpush2.bf16.msra.mxu0 %v6466_v15  ;;  %v3592_v43 = vpack.c.bf16 %v3584_v46, %v3583_v30  ;;  %v6496_v46 = vld [vmem:[%s7420_s8 + $0x10] sm:$0xff] }
 0x62e   : > { %v3591_v58 = vpack.c.bf16 %v3582_v27, %v3581_v5  ;;  %4732 = vmatprep.subr.bf16.mxu0 %v6474_v48 }
 0x62f   : > { %4626 = vmatpush2.bf16.msra.mxu1 %v6493_v16 }
 0x630   : > { %3986 = vmatmul.mubr.bf16.gmra.mxu0 %v3591_v58 }
 0x631   : > { %3995 = vmatprep.mubr.bf16.mxu0 %v9158_v2  ;;  %4733 = vmatpush2.bf16.msra.mxu0 %v6472_v19 }
 0x632   : > { %4734 = vmatprep.subr.bf16.mxu0 %v6480_v36  ;;  %v6498_v36 = vld [vmem:[%s7420_s8 + $0x18] sm:$0xff] }
 0x635   : > { %4735 = vmatpush2.bf16.msra.mxu0 %v6478_v4  ;;  %v6499_v4 = vld [vmem:[%s7420_s8] sm:$0xff] }
 0x636   : > { %4736 = vmatprep.subr.bf16.mxu0 %v6486_v21 }
 0x638   : > { %3996 = vmatmul.mubr.bf16.gmra.mxu0 %v3592_v43  ;;  %v6497_v43 = vld [vmem:[%s7420_s8 + $0x8] sm:$0xff] }
 0x639   : > { %4740 = vmatprep.mubr.bf16.mxu0 %v7434_v39  ;;  %4737 = vmatpush2.bf16.msra.mxu0 %v6484_v47  ;;  %v6490_v39 = vld [vmem:[#allocation20 + $0x180] ss:$8 sps:$4 sm:$0xff]  }
 0x63a   : > { %4738 = vmatprep.subr.bf16.mxu0 %v6492_v13 }
 0x63d   : > { %4739 = vmatpush2.bf16.msra.mxu0 %v6490_v39 }
 0x640   : > { %4741 = vmatmul.mubr.bf16.vlgmr.msra.gmra.mxu0 %v7439_v44  ;;  %v4040_v44 = vpop.f32.mrf.mxu1 }
 0x641   : > { %4750 = vmatprep.mubr.bf16.mxu0 %v7445_v49 }
 0x642   : > { %v4042_v49 = vpop.f32.mrf.mxu1 }
 0x648   : > { %4751 = vmatmul.mubr.bf16.gmra.mxu0 %v7457_v59  ;;  %v4044_v59 = vpop.f32.mrf.mxu1 }
 0x649   : > { %4760 = vmatprep.mubr.bf16.mxu0 %v7459_v61 }
 0x64a   : > { %v4046_v61 = vpop.f32.mrf.mxu1 }
 0x650   : > { %4761 = vmatmul.mubr.bf16.gmra.mxu0 %v7471_v7  ;;  %v4050_v7 = vpop.f32.mrf.mxu1 }
 0x651   : > { %4770 = vmatprep.mubr.bf16.mxu0 %v7473_v9 }
 0x652   : > { %v4052_v9 = vpop.f32.mrf.mxu1 }
 0x658   : > { %4771 = vmatmul.mubr.bf16.gmra.mxu0 %v7494_v22  ;;  %v4054_v22 = vpop.f32.mrf.mxu1 }
 0x659   : > { %4780 = vmatprep.mubr.bf16.mxu0 %v7499_v25 }
 0x65a   : > { %v4056_v25 = vpop.f32.mrf.mxu1 }
 0x660   : > { %4781 = vmatmul.mubr.bf16.gmra.mxu0 %v7529_v42  ;;  %v8642_v42 = vpop.f32.mrf.mxu1 }
 0x661   : > { %4790 = vmatprep.mubr.bf16.mxu0 %v9153_v28 }
 0x662   : > { %v8644_v28 = vpop.f32.mrf.mxu1 }
 0x668   : > { %4791 = vmatmul.mubr.bf16.gmra.mxu0 %v9154_v35  ;;  %v8646_v35 = vpop.f32.mrf.mxu1 }
 0x669   : > { %4800 = vmatprep.mubr.bf16.mxu0 %v9155_v24 }
 0x66a   : > { %v8648_v24 = vpop.f32.mrf.mxu1 }
 0x670   : > { %4801 = vmatmul.mubr.bf16.gmra.mxu0 %v9156_v3  ;;  %v3643_v3 = vlaneseq }
 0x671   : > { %4810 = vmatprep.mubr.bf16.mxu0 %v9157_v17  ;;  %v8650_v17 = vpop.f32.mrf.mxu1 }
 0x672   : > { %v8652_v62 = vshrl.u32 %v3643_v3, 7 }
 0x674   : > { %v3645_v1 = vsub.s32 0, %v8652_v62  ;;  %v3649_v56 = vsub.s32 1, %v8652_v62 }
 0x676   : > { %v8665_v8 = vrot.slane %v3641_v54, %v3645_v1  ;;  %v8669_v60 = vrot.slane %v3641_v54, %v3649_v56 }
 0x678   : > { %4811 = vmatmul.mubr.bf16.gmra.mxu0 %v9158_v2  ;;  %v8654_v2 = vpop.f32.mrf.mxu1 }
 0x67a   : > { %v8661_v41 = vpop.f32.mrf.mxu1 }
 0x67c   : > { %v8671_v11 = vpop.f32.mrf.mxu1 }
 0x67e   : > { %v8675_v15 = vpop.f32.mrf.mxu1 }
 0x680   : > { %v8679_v37 = vpop.f32.mrf.mxu1 }
 0x682   : > { %v8684_v30 = vpop.f32.mrf.mxu1 }
 0x6c0   : > { %v3927_v50 = vpop.f32.mrf.mxu0 }
 0x6c1   : > { %v3928_v33 = vadd.f32 %v3927_v50, %v8665_v8 }
 0x6c2   : > { %v3929_v55 = vpop.f32.mrf.mxu0 }
 0x6c3   : > { %v3930_v29 = vadd.f32 %v3929_v55, %v8669_v60  ;;  %v4041_v48 = vadd.f32 %v4040_v44, %v3928_v33  ;;  %v8691_v44 = vpop.f32.mrf.mxu1  ;;  %v6500_v55 = vld [vmem:[%s7420_s8 + $0x30] sm:$0xff] }
 0x6c4   : > { %v3931_v32 = vpop.f32.mrf.mxu0 }
 0x6c5   : > { %v4043_v31 = vadd.f32 %v4042_v49, %v3930_v29  ;;  %v3932_v51 = vadd.f32 %v3931_v32, %v8665_v8  ;;  %v4119_v63 = vmax.f32 %v4041_v48, 0.0  ;;  %v6501_v32 = vld [vmem:[%s7420_s8 + $0x38] sm:$0xff]  ;;  %v6502_v48 = vld [vmem:[%s7420_s8 + $0x28] sm:$0xff] }
 0x6c6   : > { %v3933_v12 = vpop.f32.mrf.mxu0 }
 0x6c7   : > { %v4045_v23 = vadd.f32 %v4044_v59, %v3932_v51  ;;  %v3934_v18 = vadd.f32 %v3933_v12, %v8669_v60  ;;  %v4120_v14 = vmax.f32 %v4043_v31, 0.0  ;;  %v4151_v10 = vadd.f32 %v6499_v4, %v4119_v63 }
 0x6c8   : > { %v3937_v5 = vpop.f32.mrf.mxu0 }
 0x6c9   : > { %v4121_v27 = vmax.f32 %v4045_v23, 0.0  ;;  %v4047_v19 = vadd.f32 %v4046_v61, %v3934_v18  ;;  %v3938_v26 = vadd.f32 %v3937_v5, %v8665_v8  ;;  %v4152_v20 = vadd.f32 %v6497_v43, %v4120_v14  ;;  %v6503_v18 = vld [vmem:[%s7420_s8 + $0x20] sm:$0xff] }
 0x6ca   : > { %v3939_v58 = vpop.f32.mrf.mxu0 }
 0x6cb   : > { %v4122_v52 = vmax.f32 %v4047_v19, 0.0  ;;  %v3940_v34 = vadd.f32 %v3939_v58, %v8669_v60  ;;  %v4153_v45 = vadd.f32 %v6496_v46, %v4121_v27  ;;  %v4051_v0 = vadd.f32 %v4050_v7, %v3938_v26 }
 0x6cc   : > { %v3941_v57 = vpop.f32.mrf.mxu0 }
 0x6cd   : > { %v4154_v40 = vadd.f32 %v6498_v36, %v4122_v52  ;;  %v4053_v21 = vadd.f32 %v4052_v9, %v3940_v34  ;;  %v3942_v53 = vadd.f32 %v3941_v57, %v8665_v8  ;;  %v4183_v39 = vpack.c.bf16 %v4153_v45, %v4151_v10  ;;  %v6505_v10 = vld [vmem:[%s7420_s8 + $0x50] sm:$0xff] }
 0x6ce   : > { %v3943_v47 = vpop.f32.mrf.mxu0  ;;  %v4123_v3 = vmax.f32 %v4051_v0, 0.0 }
 0x6cf   : > { %v3944_v13 = vadd.f32 %v3943_v47, %v8669_v60  ;;  %v4184_v38 = vpack.c.bf16 %v4154_v40, %v4152_v20  ;;  %v4055_v6 = vadd.f32 %v4054_v22, %v3942_v53  ;;  %v4124_v59 = vmax.f32 %v4053_v21, 0.0  ;;  %v8695_v22 = vpop.f32.mrf.mxu1  ;;  %v6504_v40 = vld [vmem:[%s7420_s8 + $0x48] sm:$0xff]  ;;  %v6506_v53 = vld [vmem:[%s7420_s8 + $0x58] sm:$0xff] }
 0x6d0   : > { %v3947_v16 = vpop.f32.mrf.mxu0  ;;  %v4155_v5 = vadd.f32 %v6503_v18, %v4123_v3 }
 0x6d1   : > { %v4057_v49 = vadd.f32 %v4056_v25, %v3944_v13  ;;  %4627 = vmatprep.mubr.bf16.mxu1 %v4184_v38  ;;  %v4125_v61 = vmax.f32 %v4055_v6, 0.0  ;;  %v3948_v54 = vadd.f32 %v3947_v16, %v8665_v8  ;;  %v4156_v12 = vadd.f32 %v6502_v48, %v4124_v59  ;;  %v8706_v52 = vpop.f32.mrf.mxu1  ;;  %v6507_v38 = vld [vmem:[%s7420_s8 + $0x40] sm:$0xff] }
 0x6d2   : > { %v3949_v9 = vpop.f32.mrf.mxu0  ;;  %4628 = vmatmul.mubr.bf16.vlgmr.msra.gmra.mxu1 %v4183_v39 }
 0x6d3   : > { %v4126_v7 = vmax.f32 %v4057_v49, 0.0  ;;  %v3950_v50 = vadd.f32 %v3949_v9, %v8669_v60  ;;  %v4157_v29 = vadd.f32 %v6500_v55, %v4125_v61  ;;  %v4061_v14 = vadd.f32 %v8642_v42, %v3948_v54  ;;  %v8711_v36 = vpop.f32.mrf.mxu1 }
 0x6d4   : > { %v3951_v33 = vpop.f32.mrf.mxu0 }
 0x6d5   : > { %v4158_v25 = vadd.f32 %v6501_v32, %v4126_v7  ;;  %v4063_v31 = vadd.f32 %v8644_v28, %v3950_v50  ;;  %v3952_v51 = vadd.f32 %v3951_v33, %v8665_v8  ;;  %v4185_v28 = vpack.c.bf16 %v4157_v29, %v4155_v5  ;;  %v4096_v9 = vpop.f32.mrf.mxu1 }
 0x6d6   : > { %v3953_v23 = vpop.f32.mrf.mxu0  ;;  %v4127_v57 = vmax.f32 %v4061_v14, 0.0  ;;  %v6511_v14 = vld [vmem:[%s7420_s8 + $0x60] sm:$0xff] }
 0x6d7   : > { %v4065_v27 = vadd.f32 %v8646_v35, %v3952_v51  ;;  %v3954_v19 = vadd.f32 %v3953_v23, %v8669_v60  ;;  %v4186_v58 = vpack.c.bf16 %v4158_v25, %v4156_v12  ;;  %v4128_v26 = vmax.f32 %v4063_v31, 0.0  ;;  %v8725_v32 = vpop.f32.mrf.mxu1  ;;  %v6508_v25 = vld [vmem:[%s7420_s8 + $0x70] sm:$0xff]  ;;  %v6509_v51 = vld [vmem:[%s7420_s8 + $0x78] sm:$0xff]  ;;  %v6510_v23 = vld [vmem:[%s7420_s8 + $0x68] sm:$0xff] }
 0x6d8   : > { %v3957_v63 = vpop.f32.mrf.mxu0  ;;  %v4159_v39 = vadd.f32 %v6507_v38, %v4127_v57  ;;  %v6515_v38 = vld [vmem:[%s7420_s8 + $0x80] sm:$0xff] }
 0x6d9   : > { %v4129_v34 = vmax.f32 %v4065_v27, 0.0  ;;  %v4067_v46 = vadd.f32 %v8648_v24, %v3954_v19  ;;  %4637 = vmatprep.mubr.bf16.mxu1 %v4186_v58  ;;  %v3958_v35 = vadd.f32 %v3957_v63, %v8665_v8  ;;  %v4160_v4 = vadd.f32 %v6504_v40, %v4128_v26 }
 0x6da   : > { %v3959_v45 = vpop.f32.mrf.mxu0  ;;  %4638 = vmatmul.mubr.bf16.gmra.mxu1 %v4185_v28 }
 0x6db   : > { %v4130_v42 = vmax.f32 %v4067_v46, 0.0  ;;  %v3960_v43 = vadd.f32 %v3959_v45, %v8669_v60  ;;  %v4161_v21 = vadd.f32 %v6505_v10, %v4129_v34  ;;  %v4071_v6 = vadd.f32 %v8650_v17, %v3958_v35  ;;  %v4102_v34 = vpop.f32.mrf.mxu1 }
 0x6dc   : > { %v3961_v20 = vpop.f32.mrf.mxu0 }
 0x6dd   : > { %v4162_v47 = vadd.f32 %v6506_v53, %v4130_v42  ;;  %v4073_v24 = vadd.f32 %v8654_v2, %v3960_v43  ;;  %v3962_v0 = vadd.f32 %v3961_v20, %v8665_v8  ;;  %v4187_v3 = vpack.c.bf16 %v4161_v21, %v4159_v39  ;;  %v4104_v40 = vpop.f32.mrf.mxu1  ;;  %v6513_v21 = vld [vmem:[%s7420_s8 + $0x90] sm:$0xff] }
 0x6de   : > { %v3963_v13 = vpop.f32.mrf.mxu0  ;;  %v4131_v33 = vmax.f32 %v4071_v6, 0.0 }
 0x6df   : > { %v3964_v16 = vadd.f32 %v3963_v13, %v8669_v60  ;;  %v4188_v49 = vpack.c.bf16 %v4162_v47, %v4160_v4  ;;  %v4075_v59 = vadd.f32 %v8661_v41, %v3962_v0  ;;  %v4132_v2 = vmax.f32 %v4073_v24, 0.0  ;;  %v6512_v4 = vld [vmem:[%s7420_s8 + $0x88] sm:$0xff]  ;;  %v6514_v47 = vld [vmem:[%s7420_s8 + $0x98] sm:$0xff] }
 0x6e0   : > { %v3967_v61 = vpop.f32.mrf.mxu0  ;;  %v4163_v27 = vadd.f32 %v6511_v14, %v4131_v33 }
 0x6e1   : > { %v4077_v7 = vadd.f32 %v8671_v11, %v3964_v16  ;;  %4647 = vmatprep.mubr.bf16.mxu1 %v4188_v49  ;;  %v4133_v54 = vmax.f32 %v4075_v59, 0.0  ;;  %v3968_v55 = vadd.f32 %v3967_v61, %v8665_v8  ;;  %v4164_v18 = vadd.f32 %v6510_v23, %v4132_v2 }
 0x6e2   : > { %v3969_v50 = vpop.f32.mrf.mxu0  ;;  %4648 = vmatmul.mubr.bf16.gmra.mxu1 %v4187_v3  ;;  %v4106_v3 = vpop.f32.mrf.mxu1 }
 0x6e3   : > { %v4134_v17 = vmax.f32 %v4077_v7, 0.0  ;;  %v3970_v29 = vadd.f32 %v3969_v50, %v8669_v60  ;;  %v4165_v31 = vadd.f32 %v6508_v25, %v4133_v54  ;;  %v4081_v19 = vadd.f32 %v8675_v15, %v3968_v55 }
 0x6e4   : > { %v3971_v41 = vpop.f32.mrf.mxu0 }
 0x6e5   : > { %v4166_v11 = vadd.f32 %v6509_v51, %v4134_v17  ;;  %v4083_v48 = vadd.f32 %v8679_v37, %v3970_v29  ;;  %v3972_v12 = vadd.f32 %v3971_v41, %v8665_v8  ;;  %v4189_v46 = vpack.c.bf16 %v4165_v31, %v4163_v27  ;;  %v4110_v29 = vpop.f32.mrf.mxu1  ;;  %v6516_v41 = vld [vmem:[%s7420_s8 + $0xb0] sm:$0xff]  ;;  %v6517_v31 = vld [vmem:[%s7420_s8 + $0xb8] sm:$0xff] }
 0x6e6   : > { %v3973_v5 = vpop.f32.mrf.mxu0  ;;  %v4135_v35 = vmax.f32 %v4081_v19, 0.0 }
 0x6e7   : > { %v4085_v63 = vadd.f32 %v8684_v30, %v3972_v12  ;;  %v3974_v58 = vadd.f32 %v3973_v5, %v8669_v60  ;;  %v4190_v26 = vpack.c.bf16 %v4166_v11, %v4164_v18  ;;  %v4136_v37 = vmax.f32 %v4083_v48, 0.0  ;;  %v6518_v48 = vld [vmem:[%s7420_s8 + $0xa8] sm:$0xff]  ;;  %v6519_v18 = vld [vmem:[%s7420_s8 + $0xa0] sm:$0xff] }
 0x6e8   : > { %v3977_v28 = vpop.f32.mrf.mxu0  ;;  %v4167_v39 = vadd.f32 %v6515_v38, %v4135_v35 }
 0x6e9   : > { %v4137_v45 = vmax.f32 %v4085_v63, 0.0  ;;  %v4087_v57 = vadd.f32 %v8691_v44, %v3974_v58  ;;  %4657 = vmatprep.mubr.bf16.mxu1 %v4190_v26  ;;  %v3978_v30 = vadd.f32 %v3977_v28, %v8665_v8  ;;  %v4168_v10 = vadd.f32 %v6512_v4, %v4136_v37  ;;  %v4112_v63 = vpop.f32.mrf.mxu1 }
 0x6ea   : > { %v3979_v42 = vpop.f32.mrf.mxu0  ;;  %4658 = vmatmul.mubr.bf16.gmra.mxu1 %v4189_v46 }
 0x6eb   : > { %v4138_v15 = vmax.f32 %v4087_v57, 0.0  ;;  %v3980_v43 = vadd.f32 %v3979_v42, %v8669_v60  ;;  %v4169_v53 = vadd.f32 %v6513_v21, %v4137_v45  ;;  %v4091_v6 = vadd.f32 %v8695_v22, %v3978_v30 }
 0x6ec   : > { %v3981_v20 = vpop.f32.mrf.mxu0 }
 0x6ed   : > { %v4170_v24 = vadd.f32 %v6514_v47, %v4138_v15  ;;  %v4093_v44 = vadd.f32 %v8706_v52, %v3980_v43  ;;  %v3982_v0 = vadd.f32 %v3981_v20, %v8665_v8  ;;  %v4191_v7 = vpack.c.bf16 %v4169_v53, %v4167_v39  ;;  %v4114_v15 = vpop.f32.mrf.mxu1  ;;  %v6520_v43 = vld [vmem:[%s7420_s8 + $0xc8] sm:$0xff] }
 0x6ee   : > { %v3983_v13 = vpop.f32.mrf.mxu0  ;;  %v4139_v33 = vmax.f32 %v4091_v6, 0.0 }
 0x6ef   : > { %v3984_v16 = vadd.f32 %v3983_v13, %v8669_v60  ;;  %v4192_v49 = vpack.c.bf16 %v4170_v24, %v4168_v10  ;;  %v4095_v59 = vadd.f32 %v8711_v36, %v3982_v0  ;;  %v4140_v52 = vmax.f32 %v4093_v44, 0.0  ;;  %v6522_v10 = vld [vmem:[%s7420_s8 + $0xd8] sm:$0xff]  ;;  %v6523_v44 = vld [vmem:[%s7420_s8 + $0xc0] sm:$0xff]  ;;  %v4116_v6 = vpop.f32.mrf.mxu1 }
 0x6f0   : > { %v3987_v61 = vpop.f32.mrf.mxu0  ;;  %v4171_v5 = vadd.f32 %v6519_v18, %v4139_v33  ;;  %v6526_v33 = vld [vmem:[%s7420_s8 + $0xf8] sm:$0xff] }
 0x6f1   : > { %v4097_v2 = vadd.f32 %v4096_v9, %v3984_v16  ;;  %4667 = vmatprep.mubr.bf16.mxu1 %v4192_v49  ;;  %v4141_v54 = vmax.f32 %v4095_v59, 0.0  ;;  %v3988_v22 = vadd.f32 %v3987_v61, %v8665_v8  ;;  %v4172_v12 = vadd.f32 %v6518_v48, %v4140_v52 }
 0x6f2   : > { %v3989_v50 = vpop.f32.mrf.mxu0  ;;  %4668 = vmatmul.mubr.bf16.gmra.mxu1 %v4191_v7 }
 0x6f3   : > { %v4142_v17 = vmax.f32 %v4097_v2, 0.0  ;;  %v3990_v55 = vadd.f32 %v3989_v50, %v8669_v60  ;;  %v4173_v25 = vadd.f32 %v6516_v41, %v4141_v54  ;;  %v4101_v14 = vadd.f32 %v8725_v32, %v3988_v22  ;;  %v6524_v2 = vld [vmem:[%s7420_s8 + $0xe8] sm:$0xff]  ;;  %v6525_v54 = vld [vmem:[%s7420_s8 + $0xf0] sm:$0xff] }
 0x6f4   : > { %v3991_v36 = vpop.f32.mrf.mxu0 }
 0x6f5   : > { %v4174_v51 = vadd.f32 %v6517_v31, %v4142_v17  ;;  %v4103_v9 = vadd.f32 %v4102_v34, %v3990_v55  ;;  %v3992_v11 = vadd.f32 %v3991_v36, %v8665_v8  ;;  %v4193_v26 = vpack.c.bf16 %v4173_v25, %v4171_v5 }
 0x6f6   : > { %v3993_v23 = vpop.f32.mrf.mxu0  ;;  %v4143_v57 = vmax.f32 %v4101_v14, 0.0 }
 0x6f7   : > { %v4105_v27 = vadd.f32 %v4104_v40, %v3992_v11  ;;  %v3994_v19 = vadd.f32 %v3993_v23, %v8669_v60  ;;  %v4194_v28 = vpack.c.bf16 %v4174_v51, %v4172_v12  ;;  %v4144_v46 = vmax.f32 %v4103_v9, 0.0  ;;  %v6521_v40 = vld [vmem:[%s7420_s8 + $0xd0] sm:$0xff] }
 0x6f8   : > { %v3997_v58 = vpop.f32.mrf.mxu0  ;;  %v4175_v0 = vadd.f32 %v6523_v44, %v4143_v57 }
 0x6f9   : > { %v4145_v34 = vmax.f32 %v4105_v27, 0.0  ;;  %v4107_v37 = vadd.f32 %v4106_v3, %v3994_v19  ;;  %4677 = vmatprep.mubr.bf16.mxu1 %v4194_v28  ;;  %v3998_v32 = vadd.f32 %v3997_v58, %v8665_v8  ;;  %v4176_v20 = vadd.f32 %v6520_v43, %v4144_v46  ;;  %v4263_v19 = vld [vmem:[%s9224_s24] sm:$0x3]  ;;  %s6846_s24 = sshll.u32 %s6951_s21, 4  ;;  %s6847_s24 = int_to_ptr.vmem [resolvable:$false] %s6846_s24 }
 0x6fa   : > { %v3999_v45 = vpop.f32.mrf.mxu0  ;;  %4678 = vmatmul.mubr.bf16.gmra.mxu1 %v4193_v26  ;;  %v8784_v28 = vrot.slane %v4263_v19, %v3649_v56  ;;  %s6848_s12 = scalar_lea.vmem %s6847_s24, 8192  ;;  %p6849_p4 = scmp.lt.s32.totalorder %s8871_s19, %s6847_s24 }
 0x6fb   : > { %v4146_v42 = vmax.f32 %v4107_v37, 0.0  ;;  %v4000_v35 = vadd.f32 %v3999_v45, %v8669_v60  ;;  %v4177_v4 = vadd.f32 %v6521_v40, %v4145_v34  ;;  %v4111_v13 = vadd.f32 %v4110_v29, %v3998_v32 }
 0x6fc   : > { %v4001_v30 = vpop.f32.mrf.mxu0 }
 0x6fd   : > { %v4178_v21 = vadd.f32 %v6522_v10, %v4146_v42  ;;  %v4113_v53 = vadd.f32 %v4112_v63, %v4000_v35  ;;  %v4002_v47 = vadd.f32 %v4001_v30, %v8665_v8  ;;  %v4195_v49 = vpack.c.bf16 %v4177_v4, %v4175_v0 }
 0x6fe   : > { %v4003_v24 = vpop.f32.mrf.mxu0  ;;  %v4147_v7 = vmax.f32 %v4111_v13, 0.0  ;;  %v8778_v63 = vrot.slane %v4263_v19, %v3645_v1 }
 0x6ff   : > { %v4004_v38 = vadd.f32 %v4003_v24, %v8669_v60  ;;  %v4196_v39 = vpack.c.bf16 %v4178_v21, %v4176_v20  ;;  %v4115_v16 = vadd.f32 %v4114_v15, %v4002_v47  ;;  %v4148_v59 = vmax.f32 %v4113_v53, 0.0  ;;  %v6527_v60 = vld [vmem:[%s7420_s8 + $0xe0] sm:$0xff]  ;;  %s6842_s8 = scalar_lea.vmem %s8871_s19, 4096 }
 0x700   : > { %v4179_v22 = vadd.f32 %v6527_v60, %v4147_v7  ;;  %v4742_v29 = vpop.f32.mrf.mxu0  ;;  %p6843_p3 = scmp.ne.s32.totalorder %s8871_s19, %s6842_s8  ;;  %p6850_p9 = scmp.lt.s32.totalorder %s6848_s12, %s6842_s8 }
 0x701   : > { %v4117_v61 = vadd.f32 %v4116_v6, %v4004_v38  ;;  %4687 = vmatprep.mubr.bf16.mxu1 %v4196_v39  ;;  %v4149_v3 = vmax.f32 %v4115_v16, 0.0  ;;  %v4180_v52 = vadd.f32 %v6524_v2, %v4148_v59 }
 0x702   : > { %4688 = vmatmul.mubr.bf16.gmra.mxu1 %v4195_v49  ;;  %v4744_v41 = vpop.f32.mrf.mxu0  ;;  %p6844_p6 = pnand %p6843_p3, %p9227_p0  ;;  %p6851_p10 = por %p6850_p9, %p6849_p4 }
 0x703   : > { %v4150_v8 = vmax.f32 %v4117_v61, 0.0  ;;  %v4181_v50 = vadd.f32 %v6525_v54, %v4149_v3 }
 0x704   : > { %v4746_v25 = vpop.f32.mrf.mxu0  ;;  %p6845_p2 = pneg %p6844_p6 }
 0x705   : > { %v4182_v17 = vadd.f32 %v6526_v33, %v4150_v8  ;;  %v4197_v36 = vpack.c.bf16 %v4181_v50, %v4179_v22 }
 0x706   : > { %v4748_v31 = vpop.f32.mrf.mxu0  ;;  %p6852_p12 = pnand %p6851_p10, %p6845_p2 }
 0x707   : > { %v4198_v55 = vpack.c.bf16 %v4182_v17, %v4180_v52 }
 0x708   : > { %v4752_v51 = vpop.f32.mrf.mxu0 }
 0x709   : > { %4697 = vmatprep.mubr.bf16.mxu1 %v4198_v55 }
 0x70a   : > { %4698 = vmatmul.mubr.bf16.gmra.mxu1 %v4197_v36  ;;  %v4754_v9 = vpop.f32.mrf.mxu0 }
 0x70c   : > { %v4756_v11 = vpop.f32.mrf.mxu0 }
 0x70e   : > { %v4758_v48 = vpop.f32.mrf.mxu0 }
 0x710   : > { %v4762_v12 = vpop.f32.mrf.mxu0 }
 0x712   : > { %v4764_v23 = vpop.f32.mrf.mxu0 }
 0x714   : > { %v4766_v18 = vpop.f32.mrf.mxu0 }
 0x716   : > { %v4768_v5 = vpop.f32.mrf.mxu0 }
 0x718   : > { %v8769_v14 = vpop.f32.mrf.mxu0 }
 0x71a   : > { %v8771_v27 = vpop.f32.mrf.mxu0 }
 0x71c   : > { %v8780_v58 = vpop.f32.mrf.mxu0 }
 0x71e   : > { %v8787_v34 = vpop.f32.mrf.mxu0 }
 0x720   : > { %v8796_v56 = vpop.f32.mrf.mxu0 }
 0x722   : > { %v8801_v20 = vpop.f32.mrf.mxu0 }
 0x724   : > { %v4786_v47 = vpop.f32.mrf.mxu0 }
 0x726   : > { %v4788_v6 = vpop.f32.mrf.mxu0 }
 0x728   : > { %v4792_v8 = vpop.f32.mrf.mxu0 }
 0x72a   : > { %v4794_v60 = vpop.f32.mrf.mxu0 }
 0x792   : > { %v4629_v26 = vpop.f32.mrf.mxu1 }
 0x793   : > { %v4630_v46 = vadd.f32 %v4629_v26, %v8778_v63 }
 0x794   : > { %v4631_v37 = vpop.f32.mrf.mxu1 }
 0x795   : > { %v4743_v45 = vadd.f32 %v4742_v29, %v4630_v46  ;;  %v4632_v57 = vadd.f32 %v4631_v37, %v8784_v28 }
 0x796   : > { %v4633_v42 = vpop.f32.mrf.mxu1 }
 0x797   : > { %4821 = vst [vmem:[%s8792_s27] sm:$0xff] %v4743_v45  ;;  %v4745_v62 = vadd.f32 %v4744_v41, %v4632_v57  ;;  %v4634_v1 = vadd.f32 %v4633_v42, %v8778_v63 }
 0x798   : > { %v4635_v32 = vpop.f32.mrf.mxu1 }
 0x799   : > { %4822 = vst [vmem:[%s8792_s27 + $0x8] sm:$0xff] %v4745_v62  ;;  %v4747_v35 = vadd.f32 %v4746_v25, %v4634_v1  ;;  %v4636_v15 = vadd.f32 %v4635_v32, %v8784_v28 }
 0x79a   : > { %v4639_v43 = vpop.f32.mrf.mxu1 }
 0x79b   : > { %4823 = vst [vmem:[%s8792_s27 + $0x10] sm:$0xff] %v4747_v35  ;;  %v4749_v30 = vadd.f32 %v4748_v31, %v4636_v15  ;;  %v4640_v40 = vadd.f32 %v4639_v43, %v8778_v63  ;;  %v4796_v31 = vpop.f32.mrf.mxu0 }
 0x79c   : > { %v4641_v4 = vpop.f32.mrf.mxu1 }
 0x79d   : > { %4824 = vst [vmem:[%s8792_s27 + $0x18] sm:$0xff] %v4749_v30  ;;  %v4753_v10 = vadd.f32 %v4752_v51, %v4640_v40  ;;  %v4642_v21 = vadd.f32 %v4641_v4, %v8784_v28 }
 0x79e   : > { %v4643_v53 = vpop.f32.mrf.mxu1 }
 0x79f   : > { %4825 = vst [vmem:[%s8792_s27 + $0x20] sm:$0xff] %v4753_v10  ;;  %v4755_v24 = vadd.f32 %v4754_v9, %v4642_v21  ;;  %v4644_v44 = vadd.f32 %v4643_v53, %v8778_v63 }
 0x7a0   : > { %v4645_v0 = vpop.f32.mrf.mxu1 }
 0x7a1   : > { %4826 = vst [vmem:[%s8792_s27 + $0x28] sm:$0xff] %v4755_v24  ;;  %v4757_v13 = vadd.f32 %v4756_v11, %v4644_v44  ;;  %v4646_v38 = vadd.f32 %v4645_v0, %v8784_v28 }
 0x7a2   : > { %v4649_v39 = vpop.f32.mrf.mxu1 }
 0x7a3   : > { %4827 = vst [vmem:[%s8792_s27 + $0x30] sm:$0xff] %v4757_v13  ;;  %v4759_v16 = vadd.f32 %v4758_v48, %v4646_v38  ;;  %v4650_v49 = vadd.f32 %v4649_v39, %v8778_v63 }
 0x7a4   : > { %v4651_v59 = vpop.f32.mrf.mxu1 }
 0x7a5   : > { %4828 = vst [vmem:[%s8792_s27 + $0x38] sm:$0xff] %v4759_v16  ;;  %v4763_v61 = vadd.f32 %v4762_v12, %v4650_v49  ;;  %v4652_v3 = vadd.f32 %v4651_v59, %v8784_v28 }
 0x7a6   : > { %v4653_v7 = vpop.f32.mrf.mxu1 }
 0x7a7   : > { %4829 = vst [vmem:[%s8792_s27 + $0x40] sm:$0xff] %v4763_v61  ;;  %v4765_v2 = vadd.f32 %v4764_v23, %v4652_v3  ;;  %v4654_v52 = vadd.f32 %v4653_v7, %v8778_v63 }
 0x7a8   : > { %v4655_v54 = vpop.f32.mrf.mxu1 }
 0x7a9   : > { %4830 = vst [vmem:[%s8792_s27 + $0x48] sm:$0xff] %v4765_v2  ;;  %v4767_v50 = vadd.f32 %v4766_v18, %v4654_v52  ;;  %v4656_v33 = vadd.f32 %v4655_v54, %v8784_v28  ;;  %v4798_v18 = vpop.f32.mrf.mxu0 }
 0x7aa   : > { %v4659_v17 = vpop.f32.mrf.mxu1 }
 0x7ab   : > { %4831 = vst [vmem:[%s8792_s27 + $0x50] sm:$0xff] %v4767_v50  ;;  %v4769_v22 = vadd.f32 %v4768_v5, %v4656_v33  ;;  %v4660_v55 = vadd.f32 %v4659_v17, %v8778_v63 }
 0x7ac   : > { %v4661_v36 = vpop.f32.mrf.mxu1 }
 0x7ad   : > { %4832 = vst [vmem:[%s8792_s27 + $0x58] sm:$0xff] %v4769_v22  ;;  %v4773_v29 = vadd.f32 %v8769_v14, %v4660_v55  ;;  %v4662_v41 = vadd.f32 %v4661_v36, %v8784_v28 }
 0x7ae   : > { %v4663_v25 = vpop.f32.mrf.mxu1 }
 0x7af   : > { %4833 = vst [vmem:[%s8792_s27 + $0x60] sm:$0xff] %v4773_v29  ;;  %v4775_v51 = vadd.f32 %v8771_v27, %v4662_v41  ;;  %v4664_v9 = vadd.f32 %v4663_v25, %v8778_v63 }
 0x7b0   : > { %v4665_v11 = vpop.f32.mrf.mxu1 }
 0x7b1   : > { %4834 = vst [vmem:[%s8792_s27 + $0x68] sm:$0xff] %v4775_v51  ;;  %v4777_v48 = vadd.f32 %v8780_v58, %v4664_v9  ;;  %v4666_v12 = vadd.f32 %v4665_v11, %v8784_v28  ;;  %v4802_v58 = vpop.f32.mrf.mxu0 }
 0x7b2   : > { %v4669_v23 = vpop.f32.mrf.mxu1 }
 0x7b3   : > { %4835 = vst [vmem:[%s8792_s27 + $0x70] sm:$0xff] %v4777_v48  ;;  %v4779_v5 = vadd.f32 %v8787_v34, %v4666_v12  ;;  %v4670_v14 = vadd.f32 %v4669_v23, %v8778_v63  ;;  %v4804_v1 = vpop.f32.mrf.mxu0 }
 0x7b4   : > { %v4671_v19 = vpop.f32.mrf.mxu1 }
 0x7b5   : > { %4836 = vst [vmem:[%s8792_s27 + $0x78] sm:$0xff] %v4779_v5  ;;  %v4783_v27 = vadd.f32 %v8796_v56, %v4670_v14  ;;  %v4672_v26 = vadd.f32 %v4671_v19, %v8784_v28 }
 0x7b6   : > { %v4673_v46 = vpop.f32.mrf.mxu1 }
 0x7b7   : > { %4837 = vst [vmem:[%s8792_s27 + $0x80] sm:$0xff] %v4783_v27  ;;  %v4785_v37 = vadd.f32 %v8801_v20, %v4672_v26  ;;  %v4674_v45 = vadd.f32 %v4673_v46, %v8778_v63  ;;  %v4806_v20 = vpop.f32.mrf.mxu0 }
 0x7b8   : > { %v4675_v57 = vpop.f32.mrf.mxu1 }
 0x7b9   : > { %4838 = vst [vmem:[%s8792_s27 + $0x88] sm:$0xff] %v4785_v37  ;;  %v4787_v34 = vadd.f32 %v4786_v47, %v4674_v45  ;;  %v4676_v42 = vadd.f32 %v4675_v57, %v8784_v28  ;;  %v4808_v24 = vpop.f32.mrf.mxu0 }
 0x7ba   : > { %v4679_v62 = vpop.f32.mrf.mxu1 }
 0x7bb   : > { %4839 = vst [vmem:[%s8792_s27 + $0x90] sm:$0xff] %v4787_v34  ;;  %v4789_v56 = vadd.f32 %v4788_v6, %v4676_v42  ;;  %v4680_v32 = vadd.f32 %v4679_v62, %v8778_v63  ;;  %v4812_v16 = vpop.f32.mrf.mxu0 }
 0x7bc   : > { %v4681_v35 = vpop.f32.mrf.mxu1 }
 0x7bd   : > { %4840 = vst [vmem:[%s8792_s27 + $0x98] sm:$0xff] %v4789_v56  ;;  %v4793_v15 = vadd.f32 %v4792_v8, %v4680_v32  ;;  %v4682_v30 = vadd.f32 %v4681_v35, %v8784_v28  ;;  %v4814_v8 = vpop.f32.mrf.mxu0 }
 0x7be   : > { %v4683_v43 = vpop.f32.mrf.mxu1 }
 0x7bf   : > { %4841 = vst [vmem:[%s8792_s27 + $0xa0] sm:$0xff] %v4793_v15  ;;  %v4795_v40 = vadd.f32 %v4794_v60, %v4682_v30  ;;  %v4684_v4 = vadd.f32 %v4683_v43, %v8778_v63  ;;  %v4816_v60 = vpop.f32.mrf.mxu0 }
 0x7c0   : > { %v4685_v10 = vpop.f32.mrf.mxu1 }
 0x7c1   : > { %4842 = vst [vmem:[%s8792_s27 + $0xa8] sm:$0xff] %v4795_v40  ;;  %v4797_v21 = vadd.f32 %v4796_v31, %v4684_v4  ;;  %v4686_v53 = vadd.f32 %v4685_v10, %v8784_v28  ;;  %v4818_v31 = vpop.f32.mrf.mxu0 }
 0x7c2   : > { %v4689_v47 = vpop.f32.mrf.mxu1 }
 0x7c3   : > { %4843 = vst [vmem:[%s8792_s27 + $0xb0] sm:$0xff] %v4797_v21  ;;  %v4799_v44 = vadd.f32 %v4798_v18, %v4686_v53  ;;  %v4690_v0 = vadd.f32 %v4689_v47, %v8778_v63 }
 0x7c4   : > { %v4691_v13 = vpop.f32.mrf.mxu1 }
 0x7c5   : > { %4844 = vst [vmem:[%s8792_s27 + $0xb8] sm:$0xff] %v4799_v44  ;;  %v4803_v38 = vadd.f32 %v4802_v58, %v4690_v0  ;;  %v4692_v39 = vadd.f32 %v4691_v13, %v8784_v28 }
 0x7c6   : > { %v4693_v6 = vpop.f32.mrf.mxu1 }
 0x7c7   : > { %4845 = vst [vmem:[%s8792_s27 + $0xc0] sm:$0xff] %v4803_v38  ;;  %v4805_v49 = vadd.f32 %v4804_v1, %v4692_v39  ;;  %v4694_v59 = vadd.f32 %v4693_v6, %v8778_v63 }
 0x7c8   : > { %v4695_v61 = vpop.f32.mrf.mxu1 }
 0x7c9   : > { %4846 = vst [vmem:[%s8792_s27 + $0xc8] sm:$0xff] %v4805_v49  ;;  %v4807_v3 = vadd.f32 %v4806_v20, %v4694_v59  ;;  %v4696_v7 = vadd.f32 %v4695_v61, %v8784_v28 }
 0x7ca   : > { %v4699_v2 = vpop.f32.mrf.mxu1 }
 0x7cb   : > { %4847 = vst [vmem:[%s8792_s27 + $0xd0] sm:$0xff] %v4807_v3  ;;  %v4809_v52 = vadd.f32 %v4808_v24, %v4696_v7  ;;  %v4700_v54 = vadd.f32 %v4699_v2, %v8778_v63 }
 0x7cc   : > { %v4701_v50 = vpop.f32.mrf.mxu1 }
 0x7cd   : > { %4848 = vst [vmem:[%s8792_s27 + $0xd8] sm:$0xff] %v4809_v52  ;;  %v4813_v33 = vadd.f32 %v4812_v16, %v4700_v54  ;;  %v4702_v17 = vadd.f32 %v4701_v50, %v8784_v28 }
 0x7ce   : > { %v4703_v22 = vpop.f32.mrf.mxu1 }
 0x7cf   : > { %4849 = vst [vmem:[%s8792_s27 + $0xe0] sm:$0xff] %v4813_v33  ;;  %v4815_v55 = vadd.f32 %v4814_v8, %v4702_v17  ;;  %v4704_v36 = vadd.f32 %v4703_v22, %v8778_v63 }
 0x7d0   : > { %v4705_v29 = vpop.f32.mrf.mxu1 }
 0x7d1   : > { %4850 = vst [vmem:[%s8792_s27 + $0xe8] sm:$0xff] %v4815_v55  ;;  %v4817_v41 = vadd.f32 %v4816_v60, %v4704_v36  ;;  %v4706_v25 = vadd.f32 %v4705_v29, %v8784_v28 }
 0x7d3   : > { %4851 = vst [vmem:[%s8792_s27 + $0xf0] sm:$0xff] %v4817_v41  ;;  %v4819_v63 = vadd.f32 %v4818_v31, %v4706_v25 }
 0x7d5   : > { %4852 = vst [vmem:[%s8792_s27 + $0xf8] sm:$0xff] %v4819_v63 }
 0x7d6   : > { %6855 = shalt.err (!%p6852_p12)
}
 0x7d7   : > { %s6856_s27 = scalar_lea.hbm %s8869_s25, 4096  ;;  %s6860_s16 = scalar_lea.hbm %s9226_s9, 8192 }
 0x7d8   : > { %p6857_p13 = scmp.ne.s32.totalorder %s8869_s25, %s6856_s27  ;;  %p6861_p7 = scmp.lt.s32.totalorder %s8869_s25, %s9226_s9 }
 0x7d9   : > { %p6862_p11 = scmp.lt.s32.totalorder %s6860_s16, %s6856_s27 }
 0x7da   : > { %p6858_p5 = pnand %p6857_p13, %p9227_p0 }
 0x7db   : > { %p6863_p1 = por %p6862_p11, %p6861_p7 }
 0x7dc   : > { %p6859_p8 = pneg %p6858_p5 }
 0x7de   : > { %p6864_p3 = pnand %p6863_p1, %p6859_p8 }
 0x7e0   : > { %6867 = shalt.err (!%p6864_p3)
}
 0x7e1   : > { %s6952_s8 = smov 256   ;;  %s6953_s24 = smov 16  }
 0x7e2   : > { %s9228_s12 = scalar_lea.sflag [#allocation4], %s7290_s15 }
 0x7e3   : > { %6076 = dma.vmem_to_hbm [thread:$0]  (%p9227_p0), %s8871_s19, 4096, %s8869_s25, %s9228_s12, %s6952_s8, %s6952_s8, %s6953_s24  }
 0x7e4 PF: > { %s4883_s4 = sand.u32 1, %s6918_s3   ;;  %p9229_p6 = scmp.ne.s32.totalorder %s9078_s6, 0 }
 0x7e5   : > { %p9230_p2 = scmp.ge.s32.totalorder %s6930_s30, 2  ;;  %s4884_s23 = scalar_lea.sflag [#allocation4], %s4883_s4 }
 0x7e7   : > { %p6117_p4 = pnand %p9230_p2, %p9229_p6 }
 0x7e9   : > { %p6118_p9 = pneg %p6117_p4 }
 0x7eb   : > { %6913 = dma.done.wait (%p6118_p9), %s4884_s23, 4096  }
 0x7ec   : > { %6915 = vsyncadd (%p6118_p9), %s4884_s23, 4294963200  ;;  %p41_p10 = scmp.ge.s32.totalorder %s7224_s26, 4   ;;  %s9231_s3 = smov %s6922_s28 }
 0x7ed   : > { %s9232_s28 = smov %s6926_s29  ;;  %s9233_s29 = smov %s7236_s22 }
 0x7ee   : > { %s9234_s30 = smov %s7224_s26  ;;  %43 = sbr.rel (!%p41_p10) target bundleno = 29 (0x1d), region = 200 }
 0x7f3   :  { %4889 = vsyncpa [#allocation3], 1 }
 0x7f4   :  { %4891 = vsyncpa [#allocation3 + $0x1], 1 }
 0x7f5   :  { %4892 = vsyncpa [#allocation6], 1 }
 0x7f6   :  { %4893 = vsyncpa [#allocation9], 1 }
 0x7f7   :  { %4894 = vsyncpa [#allocation12], 1 }
 0x7f8   :  { %4895 = vsyncpa [#allocation15], 1 }
 0x7f9   :  { %4896 = vsyncpa [#allocation18], 1 }
 0x7fa   :  { %4897 = vsyncpa [#allocation21], 1 }
 0x7fb   :  { %4898 = vsyncpa [#allocation4], 1 }
 0x7fc   :  { %4900 = vsyncpa [#allocation4 + $0x1], 1 }

</bundles_post_ra>
